<compile_context>
chip_gen: v7x
topology: tpu7x:2x2x1
jax: 0.10.0
libtpu: 0.0.40
codegen_flags: <defaults>
</compile_context>

<pallas_src>
import math
from functools import partial

import numpy as np
import jax
import jax.numpy as jnp
from jax.experimental import pallas as pl
from jax.experimental.pallas import tpu as pltpu

LN_EPS = 1e-5


def _pick_batch_block(n_batch: int, seq_len: int, max_rows: int = 256) -> int:
    """Pick NB = batch elements packed per grid step.

    NB divides n_batch, NB*seq_len <= max_rows (large L/S force NB=1, dropping
    the packing mask), and NB is sublane-friendly (NB in {1, n_batch} or
    NB % 8 == 0).  Prefers choices leaving >= 2 grid steps (v7x megacore)."""
    cands = []
    for c in range(1, n_batch + 1):
        if n_batch % c:
            continue
        if c * seq_len > max_rows:
            continue
        if c not in (1, n_batch) and c % 8 != 0:
            continue
        cands.append(c)
    if not cands:
        return 1
    multi = [c for c in cands if n_batch // c >= 2]
    pool = multi if multi else cands
    return max(pool)


def _vmem_limit_bytes() -> int:
    """Generation-aware VMEM limit: ~3/4 of physical, capped to [32, 96] MiB."""
    try:
        cap = pltpu.get_tpu_info().vmem_capacity_bytes
    except Exception:
        cap = 64 * 1024 * 1024  # conservative (v7x-sized) fallback
    return max(32 * 1024 * 1024, min(3 * cap // 4, 96 * 1024 * 1024))


def _make_kernel(L: int, S: int, NB: int, n_head: int, head_dim: int, use_mask: bool):
    H, hd = n_head, head_dim
    E = H * hd
    LF, SF = L * NB, S * NB
    scale = 1.0 / math.sqrt(hd)

    def kernel(*refs):
        if use_mask:
            (x_ref, ctx_ref, amask_ref, ln1_g_ref, ln1_b_ref,
             wq_ref, wk_ref, wv_ref, bq_ref, bk_ref, bv_ref, wo_ref, bo_ref,
             ln2_g_ref, ln2_b_ref, wfc_ref, bfc_ref, wproj_ref, bproj_ref,
             out_ref, attn_scratch) = refs
        else:
            (x_ref, ctx_ref, ln1_g_ref, ln1_b_ref,
             wq_ref, wk_ref, wv_ref, bq_ref, bk_ref, bv_ref, wo_ref, bo_ref,
             ln2_g_ref, ln2_b_ref, wfc_ref, bfc_ref, wproj_ref, bproj_ref,
             out_ref, attn_scratch) = refs

        # Flatten the (L, NB, E) / (S, NB, E) blocks to row-major 2D slabs so all
        # projections / MLP matmuls see LF (= L*NB) rows.
        x = x_ref[...].reshape(LF, E)        # (L*NB, E) f32
        ctx = ctx_ref[...].reshape(SF, E)    # (S*NB, E) f32

        def layernorm(v, g, b):
            mu = jnp.mean(v, axis=-1, keepdims=True)
            var = jnp.mean(jnp.square(v - mu), axis=-1, keepdims=True)
            return (v - mu) * jax.lax.rsqrt(var + LN_EPS) * g + b

        # ---- fused full-width projections (MXU contraction depth = E) ----
        xn = layernorm(x, ln1_g_ref[...], ln1_b_ref[...])
        xn_bf = xn.astype(jnp.bfloat16)
        ctx_bf = ctx.astype(jnp.bfloat16)

        q = jnp.dot(xn_bf, wq_ref[...], preferred_element_type=jnp.float32) + bq_ref[...]
        k = jnp.dot(ctx_bf, wk_ref[...], preferred_element_type=jnp.float32) + bk_ref[...]
        v = jnp.dot(ctx_bf, wv_ref[...], preferred_element_type=jnp.float32) + bv_ref[...]

        q_bf = (q * scale).astype(jnp.bfloat16)   # fold 1/sqrt(hd) into q once
        k_bf = k.astype(jnp.bfloat16)
        v_bf = v.astype(jnp.bfloat16)

        # ---- per-head attention; head h owns lanes [h*hd, (h+1)*hd) of the
        #      concatenated buffer, then ONE full-width out-projection. ----
        # TODO(synk): for large H, switch the static unroll to lax.fori_loop over
        #             VMEM-resident q/k/v with pl.ds head slices.
        for h in range(H):
            sl = slice(h * hd, (h + 1) * hd)
            s = jax.lax.dot_general(
                q_bf[:, sl], k_bf[:, sl],
                (((1,), (1,)), ((), ())),
                preferred_element_type=jnp.float32)              # (LF, SF)
            if use_mask:
                s = s + amask_ref[...]                           # block-diag mask
            s = s - jnp.max(s, axis=-1, keepdims=True)
            p = jnp.exp(s)
            p = p * pl.reciprocal(jnp.sum(p, axis=-1, keepdims=True), approx=True)
            av = jnp.dot(p.astype(jnp.bfloat16), v_bf[:, sl],
                         preferred_element_type=jnp.float32)     # (LF, hd)
            attn_scratch[:, sl] = av

        attn = jnp.dot(attn_scratch[...].astype(jnp.bfloat16), wo_ref[...],
                       preferred_element_type=jnp.float32) + bo_ref[...]

        x1 = x + attn  # first residual

        # ---- MLP on ln_2(x1) ----
        x2n = layernorm(x1, ln2_g_ref[...], ln2_b_ref[...])
        h_fc = jnp.dot(x2n.astype(jnp.bfloat16), wfc_ref[...],
                       preferred_element_type=jnp.float32) + bfc_ref[...]  # (LF, 4E)
        # exact (erf-based) GELU, matching torch.nn.GELU() default
        h_act = 0.5 * h_fc * (1.0 + jax.lax.erf(h_fc * (1.0 / math.sqrt(2.0))))
        y = jnp.dot(h_act.astype(jnp.bfloat16), wproj_ref[...],
                    preferred_element_type=jnp.float32) + bproj_ref[...]   # (LF, E)

        out_ref[...] = (x1 + y).reshape(L, NB, E)

    return kernel


def _invariant_spec(shape, single_buffer: bool):
    """BlockSpec for a grid-invariant operand (same block every step)."""
    idx = lambda b, _nd=len(shape): (0,) * _nd
    if single_buffer:
        return pl.BlockSpec(shape, idx, pipeline_mode=pl.Buffered(1))
    return pl.BlockSpec(shape, idx)


@partial(jax.jit, static_argnames=("n_head", "batch_block", "single_buffer_weights"))
def residual_cross_attention_block(x, context, params, *, n_head: int,
                                   batch_block: int | None = None,
                                   single_buffer_weights: bool = True):
    """x: (L, N, E), context: (S, N, E). Returns (L, N, E) float32."""
    L, N, E = x.shape
    S, N2, E2 = context.shape
    assert N2 == N and E2 == E
    H = n_head
    hd = E // H
    assert hd * H == E

    NB = _pick_batch_block(N, max(L, S)) if batch_block is None else batch_block
    assert N % NB == 0
    grid = (N // NB,)
    use_mask = NB > 1

    x = x.astype(jnp.float32)
    context = context.astype(jnp.float32)
    # TODO(synk): on v5e (HBM-bound), x/context/out could be carried in bf16 to
    #             halve activation DMA; kept f32 here for residual-stream accuracy.

    # Full-width (E x E) / (E x 4E) weights; matmul weights in bf16, rest f32.
    weights = [
        params["ln1_g"].astype(jnp.float32), params["ln1_b"].astype(jnp.float32),
        params["wq"].astype(jnp.bfloat16), params["wk"].astype(jnp.bfloat16),
        params["wv"].astype(jnp.bfloat16),
        params["bq"].astype(jnp.float32), params["bk"].astype(jnp.float32),
        params["bv"].astype(jnp.float32),
        params["wo"].astype(jnp.bfloat16), params["bo"].astype(jnp.float32),
        params["ln2_g"].astype(jnp.float32), params["ln2_b"].astype(jnp.float32),
        params["wfc"].astype(jnp.bfloat16), params["bfc"].astype(jnp.float32),
        params["wproj"].astype(jnp.bfloat16), params["bproj"].astype(jnp.float32),
    ]

    operands = [x, context]
    in_specs = [
        pl.BlockSpec((L, NB, E), lambda b: (0, b, 0)),   # NB batch elements of x
        pl.BlockSpec((S, NB, E), lambda b: (0, b, 0)),   # NB batch elements of ctx
    ]
    if use_mask:
        # Additive block-diagonal mask over the flattened (L*NB, S*NB) rows/cols:
        # flattened row m belongs to batch element (m % NB); cross-batch scores
        # get -1e30 (exp -> 0). Built with numpy at trace time (static shapes).
        row_b = np.arange(L * NB) % NB
        col_b = np.arange(S * NB) % NB
        amask = jnp.asarray(
            np.where(row_b[:, None] == col_b[None, :], 0.0, -1e30).astype(np.float32))
        operands.append(amask)
        in_specs.append(_invariant_spec(amask.shape, single_buffer_weights))
    operands += weights
    in_specs += [_invariant_spec(w.shape, single_buffer_weights) for w in weights]

    out = pl.pallas_call(
        _make_kernel(L, S, NB, H, hd, use_mask),
        grid=grid,
        in_specs=in_specs,
        out_specs=pl.BlockSpec((L, NB, E), lambda b: (0, b, 0)),
        out_shape=jax.ShapeDtypeStruct((L, N, E), jnp.float32),
        scratch_shapes=[pltpu.VMEM((L * NB, E), jnp.float32)],  # concat-head buffer
        compiler_params=pltpu.CompilerParams(
            dimension_semantics=("parallel",),
            vmem_limit_bytes=_vmem_limit_bytes(),
        ),
    )(*operands)

    return out


def init_params(key, d_model: int):
    """Deterministic synthetic parameters (weights stored in 'x @ W + b' form)."""
    E = d_model
    ks = jax.random.split(key, 12)
    std = 0.02

    def w(k, shape):
        return (std * jax.random.normal(k, shape)).astype(jnp.float32)

    return {
        "ln1_g": 1.0 + w(ks[0], (1, E)),
        "ln1_b": w(ks[1], (1, E)),
        "wq": w(ks[2], (E, E)),
        "wk": w(ks[3], (E, E)),
        "wv": w(ks[4], (E, E)),
        "bq": w(ks[5], (1, E)),
        "bk": w(ks[5], (1, E)) * 0.5,
        "bv": w(ks[5], (1, E)) * 0.25,
        "wo": w(ks[6], (E, E)),
        "bo": w(ks[7], (1, E)),
        "ln2_g": 1.0 + w(ks[8], (1, E)),
        "ln2_b": w(ks[9], (1, E)),
        "wfc": w(ks[10], (E, 4 * E)),
        "bfc": w(ks[10], (1, 4 * E)) * 0.5,
        "wproj": w(ks[11], (4 * E, E)),
        "bproj": w(ks[11], (1, E)) * 0.5,
    }


def reference_block(x, context, p, *, n_head: int):
    """Pure-JAX f32 reference with identical semantics (for verification)."""
    L, N, E = x.shape
    S = context.shape[0]
    hd = E // n_head
    xb = jnp.transpose(x, (1, 0, 2))
    cb = jnp.transpose(context, (1, 0, 2))

    def ln(v, g, b):
        mu = v.mean(-1, keepdims=True)
        var = ((v - mu) ** 2).mean(-1, keepdims=True)
        return (v - mu) / jnp.sqrt(var + LN_EPS) * g + b

    xn = ln(xb, p["ln1_g"], p["ln1_b"])
    q = xn @ p["wq"] + p["bq"]
    k = cb @ p["wk"] + p["bk"]
    v = cb @ p["wv"] + p["bv"]
    q = q.reshape(N, L, n_head, hd).transpose(0, 2, 1, 3)
    k = k.reshape(N, S, n_head, hd).transpose(0, 2, 1, 3)
    v = v.reshape(N, S, n_head, hd).transpose(0, 2, 1, 3)
    s = jnp.einsum("bhld,bhsd->bhls", q, k) / math.sqrt(hd)
    pattn = jax.nn.softmax(s, axis=-1)
    a = jnp.einsum("bhls,bhsd->bhld", pattn, v).transpose(0, 2, 1, 3).reshape(N, L, E)
    a = a @ p["wo"] + p["bo"]
    x1 = xb + a
    x2n = ln(x1, p["ln2_g"], p["ln2_b"])
    h = x2n @ p["wfc"] + p["bfc"]
    h = 0.5 * h * (1.0 + jax.lax.erf(h / math.sqrt(2.0)))
    y = h @ p["wproj"] + p["bproj"]
    out = x1 + y
    return jnp.transpose(out, (1, 0, 2))


if __name__ == "__main__":
    d_model, n_head = 32, 4
    L, S, N = 8, 8, 16   # N=16 -> NB=8 packing with 2 grid steps (exercises both)

    key = jax.random.PRNGKey(0)
    kx, kc, kp = jax.random.split(key, 3)
    x = jax.random.normal(kx, (L, N, d_model), dtype=jnp.float32)
    context = jax.random.normal(kc, (S, N, d_model), dtype=jnp.float32)
    params = init_params(kp, d_model)

    run = partial(residual_cross_attention_block, n_head=n_head)
    try:
        out = jax.block_until_ready(run(x, context, params))
    except Exception:
        # Fallback if pipeline_mode=pl.Buffered(1) (single-buffered invariant
        # weights) is not supported by this jax build.
        out = jax.block_until_ready(run(x, context, params, single_buffer_weights=False))

    ref = jax.block_until_ready(reference_block(x, context, params, n_head=n_head))
    assert out.shape == (L, N, d_model)
    assert jnp.allclose(out, ref, rtol=5e-3, atol=5e-3), "Pallas kernel mismatch vs JAX reference"

    print("KERNEL_OK")
</pallas_src>

<mosaic_0001>
module attributes {stable_mosaic.version = 11 : i64} {
  func.func @kernel(%arg0: i32, %arg1: memref<8x8x32xf32, #tpu.memory_space<vmem>>, %arg2: memref<8x8x32xf32, #tpu.memory_space<vmem>>, %arg3: memref<64x64xf32, #tpu.memory_space<vmem>>, %arg4: memref<1x32xf32, #tpu.memory_space<vmem>>, %arg5: memref<1x32xf32, #tpu.memory_space<vmem>>, %arg6: memref<32x32xbf16, #tpu.memory_space<vmem>>, %arg7: memref<32x32xbf16, #tpu.memory_space<vmem>>, %arg8: memref<32x32xbf16, #tpu.memory_space<vmem>>, %arg9: memref<1x32xf32, #tpu.memory_space<vmem>>, %arg10: memref<1x32xf32, #tpu.memory_space<vmem>>, %arg11: memref<1x32xf32, #tpu.memory_space<vmem>>, %arg12: memref<32x32xbf16, #tpu.memory_space<vmem>>, %arg13: memref<1x32xf32, #tpu.memory_space<vmem>>, %arg14: memref<1x32xf32, #tpu.memory_space<vmem>>, %arg15: memref<1x32xf32, #tpu.memory_space<vmem>>, %arg16: memref<32x128xbf16, #tpu.memory_space<vmem>>, %arg17: memref<1x128xf32, #tpu.memory_space<vmem>>, %arg18: memref<128x32xbf16, #tpu.memory_space<vmem>>, %arg19: memref<1x32xf32, #tpu.memory_space<vmem>>, %arg20: memref<8x8x32xf32, #tpu.memory_space<vmem>>, %arg21: memref<64x32xf32, #tpu.memory_space<vmem>>) attributes {dimension_semantics = [#tpu.dimension_semantics<parallel>], iteration_bounds = array<i64: 2>, scalar_prefetch = 0 : i64, scratch_operands = 1 : i64, tpu.core_type = #tpu.core_type<tc>, window_params = [{transform_indices = @transform_0, window_bounds = array<i64: 8, 8, 32>}, {transform_indices = @transform_1, window_bounds = array<i64: 8, 8, 32>}, {pipeline_mode = #tpu.pipeline_mode<synchronous>, transform_indices = @transform_2, window_bounds = array<i64: 64, 64>}, {pipeline_mode = #tpu.pipeline_mode<synchronous>, transform_indices = @transform_3, window_bounds = array<i64: 1, 32>}, {pipeline_mode = #tpu.pipeline_mode<synchronous>, transform_indices = @transform_4, window_bounds = array<i64: 1, 32>}, {pipeline_mode = #tpu.pipeline_mode<synchronous>, transform_indices = @transform_5, window_bounds = array<i64: 32, 32>}, {pipeline_mode = #tpu.pipeline_mode<synchronous>, transform_indices = @transform_6, window_bounds = array<i64: 32, 32>}, {pipeline_mode = #tpu.pipeline_mode<synchronous>, transform_indices = @transform_7, window_bounds = array<i64: 32, 32>}, {pipeline_mode = #tpu.pipeline_mode<synchronous>, transform_indices = @transform_8, window_bounds = array<i64: 1, 32>}, {pipeline_mode = #tpu.pipeline_mode<synchronous>, transform_indices = @transform_9, window_bounds = array<i64: 1, 32>}, {pipeline_mode = #tpu.pipeline_mode<synchronous>, transform_indices = @transform_10, window_bounds = array<i64: 1, 32>}, {pipeline_mode = #tpu.pipeline_mode<synchronous>, transform_indices = @transform_11, window_bounds = array<i64: 32, 32>}, {pipeline_mode = #tpu.pipeline_mode<synchronous>, transform_indices = @transform_12, window_bounds = array<i64: 1, 32>}, {pipeline_mode = #tpu.pipeline_mode<synchronous>, transform_indices = @transform_13, window_bounds = array<i64: 1, 32>}, {pipeline_mode = #tpu.pipeline_mode<synchronous>, transform_indices = @transform_14, window_bounds = array<i64: 1, 32>}, {pipeline_mode = #tpu.pipeline_mode<synchronous>, transform_indices = @transform_15, window_bounds = array<i64: 32, 128>}, {pipeline_mode = #tpu.pipeline_mode<synchronous>, transform_indices = @transform_16, window_bounds = array<i64: 1, 128>}, {pipeline_mode = #tpu.pipeline_mode<synchronous>, transform_indices = @transform_17, window_bounds = array<i64: 128, 32>}, {pipeline_mode = #tpu.pipeline_mode<synchronous>, transform_indices = @transform_18, window_bounds = array<i64: 1, 32>}, {transform_indices = @transform_19, window_bounds = array<i64: 8, 8, 32>}]} {
    %c0 = arith.constant 0 : index
    %c0_0 = arith.constant 0 : index
    %c0_1 = arith.constant 0 : index
    %0 = vector.load %arg1[%c0, %c0_0, %c0_1] : memref<8x8x32xf32, #tpu.memory_space<vmem>>, vector<8x8x32xf32>
    %1 = vector.shape_cast %0 : vector<8x8x32xf32> to vector<64x32xf32>
    %c0_2 = arith.constant 0 : index
    %c0_3 = arith.constant 0 : index
    %c0_4 = arith.constant 0 : index
    %2 = vector.load %arg2[%c0_2, %c0_3, %c0_4] : memref<8x8x32xf32, #tpu.memory_space<vmem>>, vector<8x8x32xf32>
    %3 = vector.shape_cast %2 : vector<8x8x32xf32> to vector<64x32xf32>
    %c0_5 = arith.constant 0 : index
    %c0_6 = arith.constant 0 : index
    %4 = vector.load %arg4[%c0_5, %c0_6] : memref<1x32xf32, #tpu.memory_space<vmem>>, vector<1x32xf32>
    %c0_7 = arith.constant 0 : index
    %c0_8 = arith.constant 0 : index
    %5 = vector.load %arg5[%c0_7, %c0_8] : memref<1x32xf32, #tpu.memory_space<vmem>>, vector<1x32xf32>
    %cst = arith.constant dense<0.000000e+00> : vector<64xf32>
    %6 = vector.multi_reduction <add>, %1, %cst [1] : vector<64x32xf32> to vector<64xf32>
    %7 = vector.shape_cast %6 : vector<64xf32> to vector<64x1xf32>
    %cst_9 = arith.constant 3.200000e+01 : f32
    %8 = vector.broadcast %cst_9 : f32 to vector<64x1xf32>
    %9 = arith.divf %7, %8 : vector<64x1xf32>
    %10 = vector.broadcast %9 : vector<64x1xf32> to vector<64x32xf32>
    %11 = arith.subf %1, %10 : vector<64x32xf32>
    %12 = arith.mulf %11, %11 : vector<64x32xf32>
    %cst_10 = arith.constant dense<0.000000e+00> : vector<64xf32>
    %13 = vector.multi_reduction <add>, %12, %cst_10 [1] : vector<64x32xf32> to vector<64xf32>
    %14 = vector.shape_cast %13 : vector<64xf32> to vector<64x1xf32>
    %cst_11 = arith.constant 3.200000e+01 : f32
    %15 = vector.broadcast %cst_11 : f32 to vector<64x1xf32>
    %16 = arith.divf %14, %15 : vector<64x1xf32>
    %17 = vector.broadcast %9 : vector<64x1xf32> to vector<64x32xf32>
    %18 = arith.subf %1, %17 : vector<64x32xf32>
    %cst_12 = arith.constant 9.99999974E-6 : f32
    %19 = vector.broadcast %cst_12 : f32 to vector<64x1xf32>
    %20 = arith.addf %16, %19 : vector<64x1xf32>
    %21 = math.rsqrt %20 : vector<64x1xf32>
    %22 = vector.broadcast %21 : vector<64x1xf32> to vector<64x32xf32>
    %23 = arith.mulf %18, %22 : vector<64x32xf32>
    %24 = vector.broadcast %4 : vector<1x32xf32> to vector<64x32xf32>
    %25 = arith.mulf %23, %24 : vector<64x32xf32>
    %26 = vector.broadcast %5 : vector<1x32xf32> to vector<64x32xf32>
    %27 = arith.addf %25, %26 : vector<64x32xf32>
    %28 = arith.truncf %27 : vector<64x32xf32> to vector<64x32xbf16>
    %29 = arith.truncf %3 : vector<64x32xf32> to vector<64x32xbf16>
    %c0_13 = arith.constant 0 : index
    %c0_14 = arith.constant 0 : index
    %30 = vector.load %arg6[%c0_13, %c0_14] : memref<32x32xbf16, #tpu.memory_space<vmem>>, vector<32x32xbf16>
    %cst_15 = arith.constant dense<0.000000e+00> : vector<64x32xf32>
    %31 = tpu.matmul %28, %30, %cst_15 {dimension_numbers = #tpu.dot_dimension_numbers<[1], [0], [0], [1], [0, 0, 1, 1], [], []>} : vector<64x32xbf16>, vector<32x32xbf16>, vector<64x32xf32> -> vector<64x32xf32>
    %c0_16 = arith.constant 0 : index
    %c0_17 = arith.constant 0 : index
    %32 = vector.load %arg9[%c0_16, %c0_17] : memref<1x32xf32, #tpu.memory_space<vmem>>, vector<1x32xf32>
    %33 = vector.broadcast %32 : vector<1x32xf32> to vector<64x32xf32>
    %34 = arith.addf %31, %33 : vector<64x32xf32>
    %c0_18 = arith.constant 0 : index
    %c0_19 = arith.constant 0 : index
    %35 = vector.load %arg7[%c0_18, %c0_19] : memref<32x32xbf16, #tpu.memory_space<vmem>>, vector<32x32xbf16>
    %cst_20 = arith.constant dense<0.000000e+00> : vector<64x32xf32>
    %36 = tpu.matmul %29, %35, %cst_20 {dimension_numbers = #tpu.dot_dimension_numbers<[1], [0], [0], [1], [0, 0, 1, 1], [], []>} : vector<64x32xbf16>, vector<32x32xbf16>, vector<64x32xf32> -> vector<64x32xf32>
    %c0_21 = arith.constant 0 : index
    %c0_22 = arith.constant 0 : index
    %37 = vector.load %arg10[%c0_21, %c0_22] : memref<1x32xf32, #tpu.memory_space<vmem>>, vector<1x32xf32>
    %38 = vector.broadcast %37 : vector<1x32xf32> to vector<64x32xf32>
    %39 = arith.addf %36, %38 : vector<64x32xf32>
    %c0_23 = arith.constant 0 : index
    %c0_24 = arith.constant 0 : index
    %40 = vector.load %arg8[%c0_23, %c0_24] : memref<32x32xbf16, #tpu.memory_space<vmem>>, vector<32x32xbf16>
    %cst_25 = arith.constant dense<0.000000e+00> : vector<64x32xf32>
    %41 = tpu.matmul %29, %40, %cst_25 {dimension_numbers = #tpu.dot_dimension_numbers<[1], [0], [0], [1], [0, 0, 1, 1], [], []>} : vector<64x32xbf16>, vector<32x32xbf16>, vector<64x32xf32> -> vector<64x32xf32>
    %c0_26 = arith.constant 0 : index
    %c0_27 = arith.constant 0 : index
    %42 = vector.load %arg11[%c0_26, %c0_27] : memref<1x32xf32, #tpu.memory_space<vmem>>, vector<1x32xf32>
    %43 = vector.broadcast %42 : vector<1x32xf32> to vector<64x32xf32>
    %44 = arith.addf %41, %43 : vector<64x32xf32>
    %cst_28 = arith.constant 0.353553385 : f32
    %45 = vector.broadcast %cst_28 : f32 to vector<64x32xf32>
    %46 = arith.mulf %34, %45 : vector<64x32xf32>
    %47 = arith.truncf %46 : vector<64x32xf32> to vector<64x32xbf16>
    %48 = arith.truncf %39 : vector<64x32xf32> to vector<64x32xbf16>
    %49 = arith.truncf %44 : vector<64x32xf32> to vector<64x32xbf16>
    %50 = vector.extract_strided_slice %47 {offsets = [0, 0], sizes = [64, 8], strides = [1, 1]} : vector<64x32xbf16> to vector<64x8xbf16>
    %51 = vector.extract_strided_slice %48 {offsets = [0, 0], sizes = [64, 8], strides = [1, 1]} : vector<64x32xbf16> to vector<64x8xbf16>
    %cst_29 = arith.constant dense<0.000000e+00> : vector<64x64xf32>
    %52 = tpu.matmul %50, %51, %cst_29 {dimension_numbers = #tpu.dot_dimension_numbers<[1], [1], [0], [0], [0, 0, 1, 0], [], []>} : vector<64x8xbf16>, vector<64x8xbf16>, vector<64x64xf32> -> vector<64x64xf32>
    %c0_30 = arith.constant 0 : index
    %c0_31 = arith.constant 0 : index
    %53 = vector.load %arg3[%c0_30, %c0_31] : memref<64x64xf32, #tpu.memory_space<vmem>>, vector<64x64xf32>
    %54 = arith.addf %52, %53 : vector<64x64xf32>
    %cst_32 = arith.constant dense<0xFF800000> : vector<64xf32>
    %55 = vector.multi_reduction <maximumf>, %54, %cst_32 [1] : vector<64x64xf32> to vector<64xf32>
    %56 = vector.shape_cast %55 : vector<64xf32> to vector<64x1xf32>
    %57 = vector.broadcast %56 : vector<64x1xf32> to vector<64x64xf32>
    %58 = arith.subf %54, %57 : vector<64x64xf32>
    %59 = math.exp %58 : vector<64x64xf32>
    %cst_33 = arith.constant dense<0.000000e+00> : vector<64xf32>
    %60 = vector.multi_reduction <add>, %59, %cst_33 [1] : vector<64x64xf32> to vector<64xf32>
    %61 = vector.shape_cast %60 : vector<64xf32> to vector<64x1xf32>
    %62 = tpu.reciprocal %61 {approx = true} : vector<64x1xf32> -> vector<64x1xf32>
    %63 = vector.broadcast %62 : vector<64x1xf32> to vector<64x64xf32>
    %64 = arith.mulf %59, %63 : vector<64x64xf32>
    %65 = arith.truncf %64 : vector<64x64xf32> to vector<64x64xbf16>
    %66 = vector.extract_strided_slice %49 {offsets = [0, 0], sizes = [64, 8], strides = [1, 1]} : vector<64x32xbf16> to vector<64x8xbf16>
    %cst_34 = arith.constant dense<0.000000e+00> : vector<64x8xf32>
    %67 = tpu.matmul %65, %66, %cst_34 {dimension_numbers = #tpu.dot_dimension_numbers<[1], [0], [0], [1], [0, 0, 1, 1], [], []>} : vector<64x64xbf16>, vector<64x8xbf16>, vector<64x8xf32> -> vector<64x8xf32>
    %c0_35 = arith.constant 0 : index
    %c0_36 = arith.constant 0 : index
    %68 = vector.load %arg21[%c0_35, %c0_36] : memref<64x32xf32, #tpu.memory_space<vmem>>, vector<64x8xf32>
    tpu.vector_store %arg21[%c0_35, %c0_36], %67 {strides = array<i32>} : memref<64x32xf32, #tpu.memory_space<vmem>>, vector<64x8xf32>,
    %69 = vector.extract_strided_slice %47 {offsets = [0, 8], sizes = [64, 8], strides = [1, 1]} : vector<64x32xbf16> to vector<64x8xbf16>
    %70 = vector.extract_strided_slice %48 {offsets = [0, 8], sizes = [64, 8], strides = [1, 1]} : vector<64x32xbf16> to vector<64x8xbf16>
    %cst_37 = arith.constant dense<0.000000e+00> : vector<64x64xf32>
    %71 = tpu.matmul %69, %70, %cst_37 {dimension_numbers = #tpu.dot_dimension_numbers<[1], [1], [0], [0], [0, 0, 1, 0], [], []>} : vector<64x8xbf16>, vector<64x8xbf16>, vector<64x64xf32> -> vector<64x64xf32>
    %c0_38 = arith.constant 0 : index
    %c0_39 = arith.constant 0 : index
    %72 = vector.load %arg3[%c0_38, %c0_39] : memref<64x64xf32, #tpu.memory_space<vmem>>, vector<64x64xf32>
    %73 = arith.addf %71, %72 : vector<64x64xf32>
    %cst_40 = arith.constant dense<0xFF800000> : vector<64xf32>
    %74 = vector.multi_reduction <maximumf>, %73, %cst_40 [1] : vector<64x64xf32> to vector<64xf32>
    %75 = vector.shape_cast %74 : vector<64xf32> to vector<64x1xf32>
    %76 = vector.broadcast %75 : vector<64x1xf32> to vector<64x64xf32>
    %77 = arith.subf %73, %76 : vector<64x64xf32>
    %78 = math.exp %77 : vector<64x64xf32>
    %cst_41 = arith.constant dense<0.000000e+00> : vector<64xf32>
    %79 = vector.multi_reduction <add>, %78, %cst_41 [1] : vector<64x64xf32> to vector<64xf32>
    %80 = vector.shape_cast %79 : vector<64xf32> to vector<64x1xf32>
    %81 = tpu.reciprocal %80 {approx = true} : vector<64x1xf32> -> vector<64x1xf32>
    %82 = vector.broadcast %81 : vector<64x1xf32> to vector<64x64xf32>
    %83 = arith.mulf %78, %82 : vector<64x64xf32>
    %84 = arith.truncf %83 : vector<64x64xf32> to vector<64x64xbf16>
    %85 = vector.extract_strided_slice %49 {offsets = [0, 8], sizes = [64, 8], strides = [1, 1]} : vector<64x32xbf16> to vector<64x8xbf16>
    %cst_42 = arith.constant dense<0.000000e+00> : vector<64x8xf32>
    %86 = tpu.matmul %84, %85, %cst_42 {dimension_numbers = #tpu.dot_dimension_numbers<[1], [0], [0], [1], [0, 0, 1, 1], [], []>} : vector<64x64xbf16>, vector<64x8xbf16>, vector<64x8xf32> -> vector<64x8xf32>
    %c0_43 = arith.constant 0 : index
    %c8 = arith.constant 8 : index
    %87 = vector.load %arg21[%c0_43, %c8] : memref<64x32xf32, #tpu.memory_space<vmem>>, vector<64x8xf32>
    tpu.vector_store %arg21[%c0_43, %c8], %86 {strides = array<i32>} : memref<64x32xf32, #tpu.memory_space<vmem>>, vector<64x8xf32>,
    %88 = vector.extract_strided_slice %47 {offsets = [0, 16], sizes = [64, 8], strides = [1, 1]} : vector<64x32xbf16> to vector<64x8xbf16>
    %89 = vector.extract_strided_slice %48 {offsets = [0, 16], sizes = [64, 8], strides = [1, 1]} : vector<64x32xbf16> to vector<64x8xbf16>
    %cst_44 = arith.constant dense<0.000000e+00> : vector<64x64xf32>
    %90 = tpu.matmul %88, %89, %cst_44 {dimension_numbers = #tpu.dot_dimension_numbers<[1], [1], [0], [0], [0, 0, 1, 0], [], []>} : vector<64x8xbf16>, vector<64x8xbf16>, vector<64x64xf32> -> vector<64x64xf32>
    %c0_45 = arith.constant 0 : index
    %c0_46 = arith.constant 0 : index
    %91 = vector.load %arg3[%c0_45, %c0_46] : memref<64x64xf32, #tpu.memory_space<vmem>>, vector<64x64xf32>
    %92 = arith.addf %90, %91 : vector<64x64xf32>
    %cst_47 = arith.constant dense<0xFF800000> : vector<64xf32>
    %93 = vector.multi_reduction <maximumf>, %92, %cst_47 [1] : vector<64x64xf32> to vector<64xf32>
    %94 = vector.shape_cast %93 : vector<64xf32> to vector<64x1xf32>
    %95 = vector.broadcast %94 : vector<64x1xf32> to vector<64x64xf32>
    %96 = arith.subf %92, %95 : vector<64x64xf32>
    %97 = math.exp %96 : vector<64x64xf32>
    %cst_48 = arith.constant dense<0.000000e+00> : vector<64xf32>
    %98 = vector.multi_reduction <add>, %97, %cst_48 [1] : vector<64x64xf32> to vector<64xf32>
    %99 = vector.shape_cast %98 : vector<64xf32> to vector<64x1xf32>
    %100 = tpu.reciprocal %99 {approx = true} : vector<64x1xf32> -> vector<64x1xf32>
    %101 = vector.broadcast %100 : vector<64x1xf32> to vector<64x64xf32>
    %102 = arith.mulf %97, %101 : vector<64x64xf32>
    %103 = arith.truncf %102 : vector<64x64xf32> to vector<64x64xbf16>
    %104 = vector.extract_strided_slice %49 {offsets = [0, 16], sizes = [64, 8], strides = [1, 1]} : vector<64x32xbf16> to vector<64x8xbf16>
    %cst_49 = arith.constant dense<0.000000e+00> : vector<64x8xf32>
    %105 = tpu.matmul %103, %104, %cst_49 {dimension_numbers = #tpu.dot_dimension_numbers<[1], [0], [0], [1], [0, 0, 1, 1], [], []>} : vector<64x64xbf16>, vector<64x8xbf16>, vector<64x8xf32> -> vector<64x8xf32>
    %c0_50 = arith.constant 0 : index
    %c16 = arith.constant 16 : index
    %106 = vector.load %arg21[%c0_50, %c16] : memref<64x32xf32, #tpu.memory_space<vmem>>, vector<64x8xf32>
    tpu.vector_store %arg21[%c0_50, %c16], %105 {strides = array<i32>} : memref<64x32xf32, #tpu.memory_space<vmem>>, vector<64x8xf32>,
    %107 = vector.extract_strided_slice %47 {offsets = [0, 24], sizes = [64, 8], strides = [1, 1]} : vector<64x32xbf16> to vector<64x8xbf16>
    %108 = vector.extract_strided_slice %48 {offsets = [0, 24], sizes = [64, 8], strides = [1, 1]} : vector<64x32xbf16> to vector<64x8xbf16>
    %cst_51 = arith.constant dense<0.000000e+00> : vector<64x64xf32>
    %109 = tpu.matmul %107, %108, %cst_51 {dimension_numbers = #tpu.dot_dimension_numbers<[1], [1], [0], [0], [0, 0, 1, 0], [], []>} : vector<64x8xbf16>, vector<64x8xbf16>, vector<64x64xf32> -> vector<64x64xf32>
    %c0_52 = arith.constant 0 : index
    %c0_53 = arith.constant 0 : index
    %110 = vector.load %arg3[%c0_52, %c0_53] : memref<64x64xf32, #tpu.memory_space<vmem>>, vector<64x64xf32>
    %111 = arith.addf %109, %110 : vector<64x64xf32>
    %cst_54 = arith.constant dense<0xFF800000> : vector<64xf32>
    %112 = vector.multi_reduction <maximumf>, %111, %cst_54 [1] : vector<64x64xf32> to vector<64xf32>
    %113 = vector.shape_cast %112 : vector<64xf32> to vector<64x1xf32>
    %114 = vector.broadcast %113 : vector<64x1xf32> to vector<64x64xf32>
    %115 = arith.subf %111, %114 : vector<64x64xf32>
    %116 = math.exp %115 : vector<64x64xf32>
    %cst_55 = arith.constant dense<0.000000e+00> : vector<64xf32>
    %117 = vector.multi_reduction <add>, %116, %cst_55 [1] : vector<64x64xf32> to vector<64xf32>
    %118 = vector.shape_cast %117 : vector<64xf32> to vector<64x1xf32>
    %119 = tpu.reciprocal %118 {approx = true} : vector<64x1xf32> -> vector<64x1xf32>
    %120 = vector.broadcast %119 : vector<64x1xf32> to vector<64x64xf32>
    %121 = arith.mulf %116, %120 : vector<64x64xf32>
    %122 = arith.truncf %121 : vector<64x64xf32> to vector<64x64xbf16>
    %123 = vector.extract_strided_slice %49 {offsets = [0, 24], sizes = [64, 8], strides = [1, 1]} : vector<64x32xbf16> to vector<64x8xbf16>
    %cst_56 = arith.constant dense<0.000000e+00> : vector<64x8xf32>
    %124 = tpu.matmul %122, %123, %cst_56 {dimension_numbers = #tpu.dot_dimension_numbers<[1], [0], [0], [1], [0, 0, 1, 1], [], []>} : vector<64x64xbf16>, vector<64x8xbf16>, vector<64x8xf32> -> vector<64x8xf32>
    %c0_57 = arith.constant 0 : index
    %c24 = arith.constant 24 : index
    %125 = vector.load %arg21[%c0_57, %c24] : memref<64x32xf32, #tpu.memory_space<vmem>>, vector<64x8xf32>
    tpu.vector_store %arg21[%c0_57, %c24], %124 {strides = array<i32>} : memref<64x32xf32, #tpu.memory_space<vmem>>, vector<64x8xf32>,
    %c0_58 = arith.constant 0 : index
    %c0_59 = arith.constant 0 : index
    %126 = vector.load %arg21[%c0_58, %c0_59] : memref<64x32xf32, #tpu.memory_space<vmem>>, vector<64x32xf32>
    %127 = arith.truncf %126 : vector<64x32xf32> to vector<64x32xbf16>
    %c0_60 = arith.constant 0 : index
    %c0_61 = arith.constant 0 : index
    %128 = vector.load %arg12[%c0_60, %c0_61] : memref<32x32xbf16, #tpu.memory_space<vmem>>, vector<32x32xbf16>
    %cst_62 = arith.constant dense<0.000000e+00> : vector<64x32xf32>
    %129 = tpu.matmul %127, %128, %cst_62 {dimension_numbers = #tpu.dot_dimension_numbers<[1], [0], [0], [1], [0, 0, 1, 1], [], []>} : vector<64x32xbf16>, vector<32x32xbf16>, vector<64x32xf32> -> vector<64x32xf32>
    %c0_63 = arith.constant 0 : index
    %c0_64 = arith.constant 0 : index
    %130 = vector.load %arg13[%c0_63, %c0_64] : memref<1x32xf32, #tpu.memory_space<vmem>>, vector<1x32xf32>
    %131 = vector.broadcast %130 : vector<1x32xf32> to vector<64x32xf32>
    %132 = arith.addf %129, %131 : vector<64x32xf32>
    %133 = arith.addf %1, %132 : vector<64x32xf32>
    %c0_65 = arith.constant 0 : index
    %c0_66 = arith.constant 0 : index
    %134 = vector.load %arg14[%c0_65, %c0_66] : memref<1x32xf32, #tpu.memory_space<vmem>>, vector<1x32xf32>
    %c0_67 = arith.constant 0 : index
    %c0_68 = arith.constant 0 : index
    %135 = vector.load %arg15[%c0_67, %c0_68] : memref<1x32xf32, #tpu.memory_space<vmem>>, vector<1x32xf32>
    %cst_69 = arith.constant dense<0.000000e+00> : vector<64xf32>
    %136 = vector.multi_reduction <add>, %133, %cst_69 [1] : vector<64x32xf32> to vector<64xf32>
    %137 = vector.shape_cast %136 : vector<64xf32> to vector<64x1xf32>
    %cst_70 = arith.constant 3.200000e+01 : f32
    %138 = vector.broadcast %cst_70 : f32 to vector<64x1xf32>
    %139 = arith.divf %137, %138 : vector<64x1xf32>
    %140 = vector.broadcast %139 : vector<64x1xf32> to vector<64x32xf32>
    %141 = arith.subf %133, %140 : vector<64x32xf32>
    %142 = arith.mulf %141, %141 : vector<64x32xf32>
    %cst_71 = arith.constant dense<0.000000e+00> : vector<64xf32>
    %143 = vector.multi_reduction <add>, %142, %cst_71 [1] : vector<64x32xf32> to vector<64xf32>
    %144 = vector.shape_cast %143 : vector<64xf32> to vector<64x1xf32>
    %cst_72 = arith.constant 3.200000e+01 : f32
    %145 = vector.broadcast %cst_72 : f32 to vector<64x1xf32>
    %146 = arith.divf %144, %145 : vector<64x1xf32>
    %147 = vector.broadcast %139 : vector<64x1xf32> to vector<64x32xf32>
    %148 = arith.subf %133, %147 : vector<64x32xf32>
    %cst_73 = arith.constant 9.99999974E-6 : f32
    %149 = vector.broadcast %cst_73 : f32 to vector<64x1xf32>
    %150 = arith.addf %146, %149 : vector<64x1xf32>
    %151 = math.rsqrt %150 : vector<64x1xf32>
    %152 = vector.broadcast %151 : vector<64x1xf32> to vector<64x32xf32>
    %153 = arith.mulf %148, %152 : vector<64x32xf32>
    %154 = vector.broadcast %134 : vector<1x32xf32> to vector<64x32xf32>
    %155 = arith.mulf %153, %154 : vector<64x32xf32>
    %156 = vector.broadcast %135 : vector<1x32xf32> to vector<64x32xf32>
    %157 = arith.addf %155, %156 : vector<64x32xf32>
    %158 = arith.truncf %157 : vector<64x32xf32> to vector<64x32xbf16>
    %c0_74 = arith.constant 0 : index
    %c0_75 = arith.constant 0 : index
    %159 = vector.load %arg16[%c0_74, %c0_75] : memref<32x128xbf16, #tpu.memory_space<vmem>>, vector<32x128xbf16>
    %cst_76 = arith.constant dense<0.000000e+00> : vector<64x128xf32>
    %160 = tpu.matmul %158, %159, %cst_76 {dimension_numbers = #tpu.dot_dimension_numbers<[1], [0], [0], [1], [0, 0, 1, 1], [], []>} : vector<64x32xbf16>, vector<32x128xbf16>, vector<64x128xf32> -> vector<64x128xf32>
    %c0_77 = arith.constant 0 : index
    %c0_78 = arith.constant 0 : index
    %161 = vector.load %arg17[%c0_77, %c0_78] : memref<1x128xf32, #tpu.memory_space<vmem>>, vector<1x128xf32>
    %162 = vector.broadcast %161 : vector<1x128xf32> to vector<64x128xf32>
    %163 = arith.addf %160, %162 : vector<64x128xf32>
    %cst_79 = arith.constant 5.000000e-01 : f32
    %164 = vector.broadcast %cst_79 : f32 to vector<64x128xf32>
    %165 = arith.mulf %164, %163 : vector<64x128xf32>
    %cst_80 = arith.constant 0.707106769 : f32
    %166 = vector.broadcast %cst_80 : f32 to vector<64x128xf32>
    %167 = arith.mulf %163, %166 : vector<64x128xf32>
    %168 = math.erf %167 : vector<64x128xf32>
    %cst_81 = arith.constant 1.000000e+00 : f32
    %169 = vector.broadcast %cst_81 : f32 to vector<64x128xf32>
    %170 = arith.addf %169, %168 : vector<64x128xf32>
    %171 = arith.mulf %165, %170 : vector<64x128xf32>
    %172 = arith.truncf %171 : vector<64x128xf32> to vector<64x128xbf16>
    %c0_82 = arith.constant 0 : index
    %c0_83 = arith.constant 0 : index
    %173 = vector.load %arg18[%c0_82, %c0_83] : memref<128x32xbf16, #tpu.memory_space<vmem>>, vector<128x32xbf16>
    %cst_84 = arith.constant dense<0.000000e+00> : vector<64x32xf32>
    %174 = tpu.matmul %172, %173, %cst_84 {dimension_numbers = #tpu.dot_dimension_numbers<[1], [0], [0], [1], [0, 0, 1, 1], [], []>} : vector<64x128xbf16>, vector<128x32xbf16>, vector<64x32xf32> -> vector<64x32xf32>
    %c0_85 = arith.constant 0 : index
    %c0_86 = arith.constant 0 : index
    %175 = vector.load %arg19[%c0_85, %c0_86] : memref<1x32xf32, #tpu.memory_space<vmem>>, vector<1x32xf32>
    %176 = vector.broadcast %175 : vector<1x32xf32> to vector<64x32xf32>
    %177 = arith.addf %174, %176 : vector<64x32xf32>
    %178 = arith.addf %133, %177 : vector<64x32xf32>
    %179 = vector.shape_cast %178 : vector<64x32xf32> to vector<8x8x32xf32>
    %c0_87 = arith.constant 0 : index
    %c0_88 = arith.constant 0 : index
    %c0_89 = arith.constant 0 : index
    %180 = vector.load %arg20[%c0_87, %c0_88, %c0_89] : memref<8x8x32xf32, #tpu.memory_space<vmem>>, vector<8x8x32xf32>
    tpu.vector_store %arg20[%c0_87, %c0_88, %c0_89], %179 {strides = array<i32>} : memref<8x8x32xf32, #tpu.memory_space<vmem>>, vector<8x8x32xf32>,
    return
  }
  func.func @transform_0(%arg0: i32) -> (i32, i32, i32) {
    %c0_i32 = arith.constant 0 : i32
    %c0_i32_0 = arith.constant 0 : i32
    %c0_i32_1 = arith.constant 0 : i32
    return %c0_i32, %arg0, %c0_i32_0 : i32, i32, i32
  }
  func.func @transform_1(%arg0: i32) -> (i32, i32, i32) {
    %c0_i32 = arith.constant 0 : i32
    %c0_i32_0 = arith.constant 0 : i32
    %c0_i32_1 = arith.constant 0 : i32
    return %c0_i32, %arg0, %c0_i32_0 : i32, i32, i32
  }
  func.func @transform_2(%arg0: i32) -> (i32, i32) {
    %c0_i32 = arith.constant 0 : i32
    %c0_i32_0 = arith.constant 0 : i32
    %c0_i32_1 = arith.constant 0 : i32
    return %c0_i32, %c0_i32_0 : i32, i32
  }
  func.func @transform_3(%arg0: i32) -> (i32, i32) {
    %c0_i32 = arith.constant 0 : i32
    %c0_i32_0 = arith.constant 0 : i32
    %c0_i32_1 = arith.constant 0 : i32
    return %c0_i32, %c0_i32_0 : i32, i32
  }
  func.func @transform_4(%arg0: i32) -> (i32, i32) {
    %c0_i32 = arith.constant 0 : i32
    %c0_i32_0 = arith.constant 0 : i32
    %c0_i32_1 = arith.constant 0 : i32
    return %c0_i32, %c0_i32_0 : i32, i32
  }
  func.func @transform_5(%arg0: i32) -> (i32, i32) {
    %c0_i32 = arith.constant 0 : i32
    %c0_i32_0 = arith.constant 0 : i32
    %c0_i32_1 = arith.constant 0 : i32
    return %c0_i32, %c0_i32_0 : i32, i32
  }
  func.func @transform_6(%arg0: i32) -> (i32, i32) {
    %c0_i32 = arith.constant 0 : i32
    %c0_i32_0 = arith.constant 0 : i32
    %c0_i32_1 = arith.constant 0 : i32
    return %c0_i32, %c0_i32_0 : i32, i32
  }
  func.func @transform_7(%arg0: i32) -> (i32, i32) {
    %c0_i32 = arith.constant 0 : i32
    %c0_i32_0 = arith.constant 0 : i32
    %c0_i32_1 = arith.constant 0 : i32
    return %c0_i32, %c0_i32_0 : i32, i32
  }
  func.func @transform_8(%arg0: i32) -> (i32, i32) {
    %c0_i32 = arith.constant 0 : i32
    %c0_i32_0 = arith.constant 0 : i32
    %c0_i32_1 = arith.constant 0 : i32
    return %c0_i32, %c0_i32_0 : i32, i32
  }
  func.func @transform_9(%arg0: i32) -> (i32, i32) {
    %c0_i32 = arith.constant 0 : i32
    %c0_i32_0 = arith.constant 0 : i32
    %c0_i32_1 = arith.constant 0 : i32
    return %c0_i32, %c0_i32_0 : i32, i32
  }
  func.func @transform_10(%arg0: i32) -> (i32, i32) {
    %c0_i32 = arith.constant 0 : i32
    %c0_i32_0 = arith.constant 0 : i32
    %c0_i32_1 = arith.constant 0 : i32
    return %c0_i32, %c0_i32_0 : i32, i32
  }
  func.func @transform_11(%arg0: i32) -> (i32, i32) {
    %c0_i32 = arith.constant 0 : i32
    %c0_i32_0 = arith.constant 0 : i32
    %c0_i32_1 = arith.constant 0 : i32
    return %c0_i32, %c0_i32_0 : i32, i32
  }
  func.func @transform_12(%arg0: i32) -> (i32, i32) {
    %c0_i32 = arith.constant 0 : i32
    %c0_i32_0 = arith.constant 0 : i32
    %c0_i32_1 = arith.constant 0 : i32
    return %c0_i32, %c0_i32_0 : i32, i32
  }
  func.func @transform_13(%arg0: i32) -> (i32, i32) {
    %c0_i32 = arith.constant 0 : i32
    %c0_i32_0 = arith.constant 0 : i32
    %c0_i32_1 = arith.constant 0 : i32
    return %c0_i32, %c0_i32_0 : i32, i32
  }
  func.func @transform_14(%arg0: i32) -> (i32, i32) {
    %c0_i32 = arith.constant 0 : i32
    %c0_i32_0 = arith.constant 0 : i32
    %c0_i32_1 = arith.constant 0 : i32
    return %c0_i32, %c0_i32_0 : i32, i32
  }
  func.func @transform_15(%arg0: i32) -> (i32, i32) {
    %c0_i32 = arith.constant 0 : i32
    %c0_i32_0 = arith.constant 0 : i32
    %c0_i32_1 = arith.constant 0 : i32
    return %c0_i32, %c0_i32_0 : i32, i32
  }
  func.func @transform_16(%arg0: i32) -> (i32, i32) {
    %c0_i32 = arith.constant 0 : i32
    %c0_i32_0 = arith.constant 0 : i32
    %c0_i32_1 = arith.constant 0 : i32
    return %c0_i32, %c0_i32_0 : i32, i32
  }
  func.func @transform_17(%arg0: i32) -> (i32, i32) {
    %c0_i32 = arith.constant 0 : i32
    %c0_i32_0 = arith.constant 0 : i32
    %c0_i32_1 = arith.constant 0 : i32
    return %c0_i32, %c0_i32_0 : i32, i32
  }
  func.func @transform_18(%arg0: i32) -> (i32, i32) {
    %c0_i32 = arith.constant 0 : i32
    %c0_i32_0 = arith.constant 0 : i32
    %c0_i32_1 = arith.constant 0 : i32
    return %c0_i32, %c0_i32_0 : i32, i32
  }
  func.func @transform_19(%arg0: i32) -> (i32, i32, i32) {
    %c0_i32 = arith.constant 0 : i32
    %c0_i32_0 = arith.constant 0 : i32
    %c0_i32_1 = arith.constant 0 : i32
    return %c0_i32, %arg0, %c0_i32_0 : i32, i32, i32
  }
}

module attributes {stable_mosaic.version = 11 : i64} {
  func.func @kernel(%arg0: i32, %arg1: memref<8x8x32xf32, #tpu.memory_space<vmem>>, %arg2: memref<8x8x32xf32, #tpu.memory_space<vmem>>, %arg3: memref<64x64xf32, #tpu.memory_space<vmem>>, %arg4: memref<1x32xf32, #tpu.memory_space<vmem>>, %arg5: memref<1x32xf32, #tpu.memory_space<vmem>>, %arg6: memref<32x32xbf16, #tpu.memory_space<vmem>>, %arg7: memref<32x32xbf16, #tpu.memory_space<vmem>>, %arg8: memref<32x32xbf16, #tpu.memory_space<vmem>>, %arg9: memref<1x32xf32, #tpu.memory_space<vmem>>, %arg10: memref<1x32xf32, #tpu.memory_space<vmem>>, %arg11: memref<1x32xf32, #tpu.memory_space<vmem>>, %arg12: memref<32x32xbf16, #tpu.memory_space<vmem>>, %arg13: memref<1x32xf32, #tpu.memory_space<vmem>>, %arg14: memref<1x32xf32, #tpu.memory_space<vmem>>, %arg15: memref<1x32xf32, #tpu.memory_space<vmem>>, %arg16: memref<32x128xbf16, #tpu.memory_space<vmem>>, %arg17: memref<1x128xf32, #tpu.memory_space<vmem>>, %arg18: memref<128x32xbf16, #tpu.memory_space<vmem>>, %arg19: memref<1x32xf32, #tpu.memory_space<vmem>>, %arg20: memref<8x8x32xf32, #tpu.memory_space<vmem>>, %arg21: memref<64x32xf32, #tpu.memory_space<vmem>>) attributes {dimension_semantics = [#tpu.dimension_semantics<parallel>], iteration_bounds = array<i64: 2>, scalar_prefetch = 0 : i64, scratch_operands = 1 : i64, tpu.core_type = #tpu.core_type<tc>, window_params = [{transform_indices = @transform_0, window_bounds = array<i64: 8, 8, 32>}, {transform_indices = @transform_1, window_bounds = array<i64: 8, 8, 32>}, {pipeline_mode = #tpu.pipeline_mode<synchronous>, transform_indices = @transform_2, window_bounds = array<i64: 64, 64>}, {pipeline_mode = #tpu.pipeline_mode<synchronous>, transform_indices = @transform_3, window_bounds = array<i64: 1, 32>}, {pipeline_mode = #tpu.pipeline_mode<synchronous>, transform_indices = @transform_4, window_bounds = array<i64: 1, 32>}, {pipeline_mode = #tpu.pipeline_mode<synchronous>, transform_indices = @transform_5, window_bounds = array<i64: 32, 32>}, {pipeline_mode = #tpu.pipeline_mode<synchronous>, transform_indices = @transform_6, window_bounds = array<i64: 32, 32>}, {pipeline_mode = #tpu.pipeline_mode<synchronous>, transform_indices = @transform_7, window_bounds = array<i64: 32, 32>}, {pipeline_mode = #tpu.pipeline_mode<synchronous>, transform_indices = @transform_8, window_bounds = array<i64: 1, 32>}, {pipeline_mode = #tpu.pipeline_mode<synchronous>, transform_indices = @transform_9, window_bounds = array<i64: 1, 32>}, {pipeline_mode = #tpu.pipeline_mode<synchronous>, transform_indices = @transform_10, window_bounds = array<i64: 1, 32>}, {pipeline_mode = #tpu.pipeline_mode<synchronous>, transform_indices = @transform_11, window_bounds = array<i64: 32, 32>}, {pipeline_mode = #tpu.pipeline_mode<synchronous>, transform_indices = @transform_12, window_bounds = array<i64: 1, 32>}, {pipeline_mode = #tpu.pipeline_mode<synchronous>, transform_indices = @transform_13, window_bounds = array<i64: 1, 32>}, {pipeline_mode = #tpu.pipeline_mode<synchronous>, transform_indices = @transform_14, window_bounds = array<i64: 1, 32>}, {pipeline_mode = #tpu.pipeline_mode<synchronous>, transform_indices = @transform_15, window_bounds = array<i64: 32, 128>}, {pipeline_mode = #tpu.pipeline_mode<synchronous>, transform_indices = @transform_16, window_bounds = array<i64: 1, 128>}, {pipeline_mode = #tpu.pipeline_mode<synchronous>, transform_indices = @transform_17, window_bounds = array<i64: 128, 32>}, {pipeline_mode = #tpu.pipeline_mode<synchronous>, transform_indices = @transform_18, window_bounds = array<i64: 1, 32>}, {transform_indices = @transform_19, window_bounds = array<i64: 8, 8, 32>}]} {
    %c0 = arith.constant 0 : index
    %c0_0 = arith.constant 0 : index
    %c0_1 = arith.constant 0 : index
    %0 = vector.load %arg1[%c0, %c0_0, %c0_1] : memref<8x8x32xf32, #tpu.memory_space<vmem>>, vector<8x8x32xf32>
    %1 = vector.shape_cast %0 : vector<8x8x32xf32> to vector<64x32xf32>
    %c0_2 = arith.constant 0 : index
    %c0_3 = arith.constant 0 : index
    %c0_4 = arith.constant 0 : index
    %2 = vector.load %arg2[%c0_2, %c0_3, %c0_4] : memref<8x8x32xf32, #tpu.memory_space<vmem>>, vector<8x8x32xf32>
    %3 = vector.shape_cast %2 : vector<8x8x32xf32> to vector<64x32xf32>
    %c0_5 = arith.constant 0 : index
    %c0_6 = arith.constant 0 : index
    %4 = vector.load %arg4[%c0_5, %c0_6] : memref<1x32xf32, #tpu.memory_space<vmem>>, vector<1x32xf32>
    %c0_7 = arith.constant 0 : index
    %c0_8 = arith.constant 0 : index
    %5 = vector.load %arg5[%c0_7, %c0_8] : memref<1x32xf32, #tpu.memory_space<vmem>>, vector<1x32xf32>
    %cst = arith.constant dense<0.000000e+00> : vector<64xf32>
    %6 = vector.multi_reduction <add>, %1, %cst [1] : vector<64x32xf32> to vector<64xf32>
    %7 = vector.shape_cast %6 : vector<64xf32> to vector<64x1xf32>
    %cst_9 = arith.constant 3.200000e+01 : f32
    %8 = vector.broadcast %cst_9 : f32 to vector<64x1xf32>
    %9 = arith.divf %7, %8 : vector<64x1xf32>
    %10 = vector.broadcast %9 : vector<64x1xf32> to vector<64x32xf32>
    %11 = arith.subf %1, %10 : vector<64x32xf32>
    %12 = arith.mulf %11, %11 : vector<64x32xf32>
    %cst_10 = arith.constant dense<0.000000e+00> : vector<64xf32>
    %13 = vector.multi_reduction <add>, %12, %cst_10 [1] : vector<64x32xf32> to vector<64xf32>
    %14 = vector.shape_cast %13 : vector<64xf32> to vector<64x1xf32>
    %cst_11 = arith.constant 3.200000e+01 : f32
    %15 = vector.broadcast %cst_11 : f32 to vector<64x1xf32>
    %16 = arith.divf %14, %15 : vector<64x1xf32>
    %17 = vector.broadcast %9 : vector<64x1xf32> to vector<64x32xf32>
    %18 = arith.subf %1, %17 : vector<64x32xf32>
    %cst_12 = arith.constant 9.99999974E-6 : f32
    %19 = vector.broadcast %cst_12 : f32 to vector<64x1xf32>
    %20 = arith.addf %16, %19 : vector<64x1xf32>
    %21 = math.rsqrt %20 : vector<64x1xf32>
    %22 = vector.broadcast %21 : vector<64x1xf32> to vector<64x32xf32>
    %23 = arith.mulf %18, %22 : vector<64x32xf32>
    %24 = vector.broadcast %4 : vector<1x32xf32> to vector<64x32xf32>
    %25 = arith.mulf %23, %24 : vector<64x32xf32>
    %26 = vector.broadcast %5 : vector<1x32xf32> to vector<64x32xf32>
    %27 = arith.addf %25, %26 : vector<64x32xf32>
    %28 = arith.truncf %27 : vector<64x32xf32> to vector<64x32xbf16>
    %29 = arith.truncf %3 : vector<64x32xf32> to vector<64x32xbf16>
    %c0_13 = arith.constant 0 : index
    %c0_14 = arith.constant 0 : index
    %30 = vector.load %arg6[%c0_13, %c0_14] : memref<32x32xbf16, #tpu.memory_space<vmem>>, vector<32x32xbf16>
    %cst_15 = arith.constant dense<0.000000e+00> : vector<64x32xf32>
    %31 = tpu.matmul %28, %30, %cst_15 {dimension_numbers = #tpu.dot_dimension_numbers<[1], [0], [0], [1], [0, 0, 1, 1], [], []>} : vector<64x32xbf16>, vector<32x32xbf16>, vector<64x32xf32> -> vector<64x32xf32>
    %c0_16 = arith.constant 0 : index
    %c0_17 = arith.constant 0 : index
    %32 = vector.load %arg9[%c0_16, %c0_17] : memref<1x32xf32, #tpu.memory_space<vmem>>, vector<1x32xf32>
    %33 = vector.broadcast %32 : vector<1x32xf32> to vector<64x32xf32>
    %34 = arith.addf %31, %33 : vector<64x32xf32>
    %c0_18 = arith.constant 0 : index
    %c0_19 = arith.constant 0 : index
    %35 = vector.load %arg7[%c0_18, %c0_19] : memref<32x32xbf16, #tpu.memory_space<vmem>>, vector<32x32xbf16>
    %cst_20 = arith.constant dense<0.000000e+00> : vector<64x32xf32>
    %36 = tpu.matmul %29, %35, %cst_20 {dimension_numbers = #tpu.dot_dimension_numbers<[1], [0], [0], [1], [0, 0, 1, 1], [], []>} : vector<64x32xbf16>, vector<32x32xbf16>, vector<64x32xf32> -> vector<64x32xf32>
    %c0_21 = arith.constant 0 : index
    %c0_22 = arith.constant 0 : index
    %37 = vector.load %arg10[%c0_21, %c0_22] : memref<1x32xf32, #tpu.memory_space<vmem>>, vector<1x32xf32>
    %38 = vector.broadcast %37 : vector<1x32xf32> to vector<64x32xf32>
    %39 = arith.addf %36, %38 : vector<64x32xf32>
    %c0_23 = arith.constant 0 : index
    %c0_24 = arith.constant 0 : index
    %40 = vector.load %arg8[%c0_23, %c0_24] : memref<32x32xbf16, #tpu.memory_space<vmem>>, vector<32x32xbf16>
    %cst_25 = arith.constant dense<0.000000e+00> : vector<64x32xf32>
    %41 = tpu.matmul %29, %40, %cst_25 {dimension_numbers = #tpu.dot_dimension_numbers<[1], [0], [0], [1], [0, 0, 1, 1], [], []>} : vector<64x32xbf16>, vector<32x32xbf16>, vector<64x32xf32> -> vector<64x32xf32>
    %c0_26 = arith.constant 0 : index
    %c0_27 = arith.constant 0 : index
    %42 = vector.load %arg11[%c0_26, %c0_27] : memref<1x32xf32, #tpu.memory_space<vmem>>, vector<1x32xf32>
    %43 = vector.broadcast %42 : vector<1x32xf32> to vector<64x32xf32>
    %44 = arith.addf %41, %43 : vector<64x32xf32>
    %cst_28 = arith.constant 0.353553385 : f32
    %45 = vector.broadcast %cst_28 : f32 to vector<64x32xf32>
    %46 = arith.mulf %34, %45 : vector<64x32xf32>
    %47 = arith.truncf %46 : vector<64x32xf32> to vector<64x32xbf16>
    %48 = arith.truncf %39 : vector<64x32xf32> to vector<64x32xbf16>
    %49 = arith.truncf %44 : vector<64x32xf32> to vector<64x32xbf16>
    %50 = vector.extract_strided_slice %47 {offsets = [0, 0], sizes = [64, 8], strides = [1, 1]} : vector<64x32xbf16> to vector<64x8xbf16>
    %51 = vector.extract_strided_slice %48 {offsets = [0, 0], sizes = [64, 8], strides = [1, 1]} : vector<64x32xbf16> to vector<64x8xbf16>
    %cst_29 = arith.constant dense<0.000000e+00> : vector<64x64xf32>
    %52 = tpu.matmul %50, %51, %cst_29 {dimension_numbers = #tpu.dot_dimension_numbers<[1], [1], [0], [0], [0, 0, 1, 0], [], []>} : vector<64x8xbf16>, vector<64x8xbf16>, vector<64x64xf32> -> vector<64x64xf32>
    %c0_30 = arith.constant 0 : index
    %c0_31 = arith.constant 0 : index
    %53 = vector.load %arg3[%c0_30, %c0_31] : memref<64x64xf32, #tpu.memory_space<vmem>>, vector<64x64xf32>
    %54 = arith.addf %52, %53 : vector<64x64xf32>
    %cst_32 = arith.constant dense<0xFF800000> : vector<64xf32>
    %55 = vector.multi_reduction <maximumf>, %54, %cst_32 [1] : vector<64x64xf32> to vector<64xf32>
    %56 = vector.shape_cast %55 : vector<64xf32> to vector<64x1xf32>
    %57 = vector.broadcast %56 : vector<64x1xf32> to vector<64x64xf32>
    %58 = arith.subf %54, %57 : vector<64x64xf32>
    %59 = math.exp %58 : vector<64x64xf32>
    %cst_33 = arith.constant dense<0.000000e+00> : vector<64xf32>
    %60 = vector.multi_reduction <add>, %59, %cst_33 [1] : vector<64x64xf32> to vector<64xf32>
    %61 = vector.shape_cast %60 : vector<64xf32> to vector<64x1xf32>
    %62 = tpu.reciprocal %61 {approx = true} : vector<64x1xf32> -> vector<64x1xf32>
    %63 = vector.broadcast %62 : vector<64x1xf32> to vector<64x64xf32>
    %64 = arith.mulf %59, %63 : vector<64x64xf32>
    %65 = arith.truncf %64 : vector<64x64xf32> to vector<64x64xbf16>
    %66 = vector.extract_strided_slice %49 {offsets = [0, 0], sizes = [64, 8], strides = [1, 1]} : vector<64x32xbf16> to vector<64x8xbf16>
    %cst_34 = arith.constant dense<0.000000e+00> : vector<64x8xf32>
    %67 = tpu.matmul %65, %66, %cst_34 {dimension_numbers = #tpu.dot_dimension_numbers<[1], [0], [0], [1], [0, 0, 1, 1], [], []>} : vector<64x64xbf16>, vector<64x8xbf16>, vector<64x8xf32> -> vector<64x8xf32>
    %c0_35 = arith.constant 0 : index
    %c0_36 = arith.constant 0 : index
    %68 = vector.load %arg21[%c0_35, %c0_36] : memref<64x32xf32, #tpu.memory_space<vmem>>, vector<64x8xf32>
    tpu.vector_store %arg21[%c0_35, %c0_36], %67 {strides = array<i32>} : memref<64x32xf32, #tpu.memory_space<vmem>>, vector<64x8xf32>,
    %69 = vector.extract_strided_slice %47 {offsets = [0, 8], sizes = [64, 8], strides = [1, 1]} : vector<64x32xbf16> to vector<64x8xbf16>
    %70 = vector.extract_strided_slice %48 {offsets = [0, 8], sizes = [64, 8], strides = [1, 1]} : vector<64x32xbf16> to vector<64x8xbf16>
    %cst_37 = arith.constant dense<0.000000e+00> : vector<64x64xf32>
    %71 = tpu.matmul %69, %70, %cst_37 {dimension_numbers = #tpu.dot_dimension_numbers<[1], [1], [0], [0], [0, 0, 1, 0], [], []>} : vector<64x8xbf16>, vector<64x8xbf16>, vector<64x64xf32> -> vector<64x64xf32>
    %c0_38 = arith.constant 0 : index
    %c0_39 = arith.constant 0 : index
    %72 = vector.load %arg3[%c0_38, %c0_39] : memref<64x64xf32, #tpu.memory_space<vmem>>, vector<64x64xf32>
    %73 = arith.addf %71, %72 : vector<64x64xf32>
    %cst_40 = arith.constant dense<0xFF800000> : vector<64xf32>
    %74 = vector.multi_reduction <maximumf>, %73, %cst_40 [1] : vector<64x64xf32> to vector<64xf32>
    %75 = vector.shape_cast %74 : vector<64xf32> to vector<64x1xf32>
    %76 = vector.broadcast %75 : vector<64x1xf32> to vector<64x64xf32>
    %77 = arith.subf %73, %76 : vector<64x64xf32>
    %78 = math.exp %77 : vector<64x64xf32>
    %cst_41 = arith.constant dense<0.000000e+00> : vector<64xf32>
    %79 = vector.multi_reduction <add>, %78, %cst_41 [1] : vector<64x64xf32> to vector<64xf32>
    %80 = vector.shape_cast %79 : vector<64xf32> to vector<64x1xf32>
    %81 = tpu.reciprocal %80 {approx = true} : vector<64x1xf32> -> vector<64x1xf32>
    %82 = vector.broadcast %81 : vector<64x1xf32> to vector<64x64xf32>
    %83 = arith.mulf %78, %82 : vector<64x64xf32>
    %84 = arith.truncf %83 : vector<64x64xf32> to vector<64x64xbf16>
    %85 = vector.extract_strided_slice %49 {offsets = [0, 8], sizes = [64, 8], strides = [1, 1]} : vector<64x32xbf16> to vector<64x8xbf16>
    %cst_42 = arith.constant dense<0.000000e+00> : vector<64x8xf32>
    %86 = tpu.matmul %84, %85, %cst_42 {dimension_numbers = #tpu.dot_dimension_numbers<[1], [0], [0], [1], [0, 0, 1, 1], [], []>} : vector<64x64xbf16>, vector<64x8xbf16>, vector<64x8xf32> -> vector<64x8xf32>
    %c0_43 = arith.constant 0 : index
    %c8 = arith.constant 8 : index
    %87 = vector.load %arg21[%c0_43, %c8] : memref<64x32xf32, #tpu.memory_space<vmem>>, vector<64x8xf32>
    tpu.vector_store %arg21[%c0_43, %c8], %86 {strides = array<i32>} : memref<64x32xf32, #tpu.memory_space<vmem>>, vector<64x8xf32>,
    %88 = vector.extract_strided_slice %47 {offsets = [0, 16], sizes = [64, 8], strides = [1, 1]} : vector<64x32xbf16> to vector<64x8xbf16>
    %89 = vector.extract_strided_slice %48 {offsets = [0, 16], sizes = [64, 8], strides = [1, 1]} : vector<64x32xbf16> to vector<64x8xbf16>
    %cst_44 = arith.constant dense<0.000000e+00> : vector<64x64xf32>
    %90 = tpu.matmul %88, %89, %cst_44 {dimension_numbers = #tpu.dot_dimension_numbers<[1], [1], [0], [0], [0, 0, 1, 0], [], []>} : vector<64x8xbf16>, vector<64x8xbf16>, vector<64x64xf32> -> vector<64x64xf32>
    %c0_45 = arith.constant 0 : index
    %c0_46 = arith.constant 0 : index
    %91 = vector.load %arg3[%c0_45, %c0_46] : memref<64x64xf32, #tpu.memory_space<vmem>>, vector<64x64xf32>
    %92 = arith.addf %90, %91 : vector<64x64xf32>
    %cst_47 = arith.constant dense<0xFF800000> : vector<64xf32>
    %93 = vector.multi_reduction <maximumf>, %92, %cst_47 [1] : vector<64x64xf32> to vector<64xf32>
    %94 = vector.shape_cast %93 : vector<64xf32> to vector<64x1xf32>
    %95 = vector.broadcast %94 : vector<64x1xf32> to vector<64x64xf32>
    %96 = arith.subf %92, %95 : vector<64x64xf32>
    %97 = math.exp %96 : vector<64x64xf32>
    %cst_48 = arith.constant dense<0.000000e+00> : vector<64xf32>
    %98 = vector.multi_reduction <add>, %97, %cst_48 [1] : vector<64x64xf32> to vector<64xf32>
    %99 = vector.shape_cast %98 : vector<64xf32> to vector<64x1xf32>
    %100 = tpu.reciprocal %99 {approx = true} : vector<64x1xf32> -> vector<64x1xf32>
    %101 = vector.broadcast %100 : vector<64x1xf32> to vector<64x64xf32>
    %102 = arith.mulf %97, %101 : vector<64x64xf32>
    %103 = arith.truncf %102 : vector<64x64xf32> to vector<64x64xbf16>
    %104 = vector.extract_strided_slice %49 {offsets = [0, 16], sizes = [64, 8], strides = [1, 1]} : vector<64x32xbf16> to vector<64x8xbf16>
    %cst_49 = arith.constant dense<0.000000e+00> : vector<64x8xf32>
    %105 = tpu.matmul %103, %104, %cst_49 {dimension_numbers = #tpu.dot_dimension_numbers<[1], [0], [0], [1], [0, 0, 1, 1], [], []>} : vector<64x64xbf16>, vector<64x8xbf16>, vector<64x8xf32> -> vector<64x8xf32>
    %c0_50 = arith.constant 0 : index
    %c16 = arith.constant 16 : index
    %106 = vector.load %arg21[%c0_50, %c16] : memref<64x32xf32, #tpu.memory_space<vmem>>, vector<64x8xf32>
    tpu.vector_store %arg21[%c0_50, %c16], %105 {strides = array<i32>} : memref<64x32xf32, #tpu.memory_space<vmem>>, vector<64x8xf32>,
    %107 = vector.extract_strided_slice %47 {offsets = [0, 24], sizes = [64, 8], strides = [1, 1]} : vector<64x32xbf16> to vector<64x8xbf16>
    %108 = vector.extract_strided_slice %48 {offsets = [0, 24], sizes = [64, 8], strides = [1, 1]} : vector<64x32xbf16> to vector<64x8xbf16>
    %cst_51 = arith.constant dense<0.000000e+00> : vector<64x64xf32>
    %109 = tpu.matmul %107, %108, %cst_51 {dimension_numbers = #tpu.dot_dimension_numbers<[1], [1], [0], [0], [0, 0, 1, 0], [], []>} : vector<64x8xbf16>, vector<64x8xbf16>, vector<64x64xf32> -> vector<64x64xf32>
    %c0_52 = arith.constant 0 : index
    %c0_53 = arith.constant 0 : index
    %110 = vector.load %arg3[%c0_52, %c0_53] : memref<64x64xf32, #tpu.memory_space<vmem>>, vector<64x64xf32>
    %111 = arith.addf %109, %110 : vector<64x64xf32>
    %cst_54 = arith.constant dense<0xFF800000> : vector<64xf32>
    %112 = vector.multi_reduction <maximumf>, %111, %cst_54 [1] : vector<64x64xf32> to vector<64xf32>
    %113 = vector.shape_cast %112 : vector<64xf32> to vector<64x1xf32>
    %114 = vector.broadcast %113 : vector<64x1xf32> to vector<64x64xf32>
    %115 = arith.subf %111, %114 : vector<64x64xf32>
    %116 = math.exp %115 : vector<64x64xf32>
    %cst_55 = arith.constant dense<0.000000e+00> : vector<64xf32>
    %117 = vector.multi_reduction <add>, %116, %cst_55 [1] : vector<64x64xf32> to vector<64xf32>
    %118 = vector.shape_cast %117 : vector<64xf32> to vector<64x1xf32>
    %119 = tpu.reciprocal %118 {approx = true} : vector<64x1xf32> -> vector<64x1xf32>
    %120 = vector.broadcast %119 : vector<64x1xf32> to vector<64x64xf32>
    %121 = arith.mulf %116, %120 : vector<64x64xf32>
    %122 = arith.truncf %121 : vector<64x64xf32> to vector<64x64xbf16>
    %123 = vector.extract_strided_slice %49 {offsets = [0, 24], sizes = [64, 8], strides = [1, 1]} : vector<64x32xbf16> to vector<64x8xbf16>
    %cst_56 = arith.constant dense<0.000000e+00> : vector<64x8xf32>
    %124 = tpu.matmul %122, %123, %cst_56 {dimension_numbers = #tpu.dot_dimension_numbers<[1], [0], [0], [1], [0, 0, 1, 1], [], []>} : vector<64x64xbf16>, vector<64x8xbf16>, vector<64x8xf32> -> vector<64x8xf32>
    %c0_57 = arith.constant 0 : index
    %c24 = arith.constant 24 : index
    %125 = vector.load %arg21[%c0_57, %c24] : memref<64x32xf32, #tpu.memory_space<vmem>>, vector<64x8xf32>
    tpu.vector_store %arg21[%c0_57, %c24], %124 {strides = array<i32>} : memref<64x32xf32, #tpu.memory_space<vmem>>, vector<64x8xf32>,
    %c0_58 = arith.constant 0 : index
    %c0_59 = arith.constant 0 : index
    %126 = vector.load %arg21[%c0_58, %c0_59] : memref<64x32xf32, #tpu.memory_space<vmem>>, vector<64x32xf32>
    %127 = arith.truncf %126 : vector<64x32xf32> to vector<64x32xbf16>
    %c0_60 = arith.constant 0 : index
    %c0_61 = arith.constant 0 : index
    %128 = vector.load %arg12[%c0_60, %c0_61] : memref<32x32xbf16, #tpu.memory_space<vmem>>, vector<32x32xbf16>
    %cst_62 = arith.constant dense<0.000000e+00> : vector<64x32xf32>
    %129 = tpu.matmul %127, %128, %cst_62 {dimension_numbers = #tpu.dot_dimension_numbers<[1], [0], [0], [1], [0, 0, 1, 1], [], []>} : vector<64x32xbf16>, vector<32x32xbf16>, vector<64x32xf32> -> vector<64x32xf32>
    %c0_63 = arith.constant 0 : index
    %c0_64 = arith.constant 0 : index
    %130 = vector.load %arg13[%c0_63, %c0_64] : memref<1x32xf32, #tpu.memory_space<vmem>>, vector<1x32xf32>
    %131 = vector.broadcast %130 : vector<1x32xf32> to vector<64x32xf32>
    %132 = arith.addf %129, %131 : vector<64x32xf32>
    %133 = arith.addf %1, %132 : vector<64x32xf32>
    %c0_65 = arith.constant 0 : index
    %c0_66 = arith.constant 0 : index
    %134 = vector.load %arg14[%c0_65, %c0_66] : memref<1x32xf32, #tpu.memory_space<vmem>>, vector<1x32xf32>
    %c0_67 = arith.constant 0 : index
    %c0_68 = arith.constant 0 : index
    %135 = vector.load %arg15[%c0_67, %c0_68] : memref<1x32xf32, #tpu.memory_space<vmem>>, vector<1x32xf32>
    %cst_69 = arith.constant dense<0.000000e+00> : vector<64xf32>
    %136 = vector.multi_reduction <add>, %133, %cst_69 [1] : vector<64x32xf32> to vector<64xf32>
    %137 = vector.shape_cast %136 : vector<64xf32> to vector<64x1xf32>
    %cst_70 = arith.constant 3.200000e+01 : f32
    %138 = vector.broadcast %cst_70 : f32 to vector<64x1xf32>
    %139 = arith.divf %137, %138 : vector<64x1xf32>
    %140 = vector.broadcast %139 : vector<64x1xf32> to vector<64x32xf32>
    %141 = arith.subf %133, %140 : vector<64x32xf32>
    %142 = arith.mulf %141, %141 : vector<64x32xf32>
    %cst_71 = arith.constant dense<0.000000e+00> : vector<64xf32>
    %143 = vector.multi_reduction <add>, %142, %cst_71 [1] : vector<64x32xf32> to vector<64xf32>
    %144 = vector.shape_cast %143 : vector<64xf32> to vector<64x1xf32>
    %cst_72 = arith.constant 3.200000e+01 : f32
    %145 = vector.broadcast %cst_72 : f32 to vector<64x1xf32>
    %146 = arith.divf %144, %145 : vector<64x1xf32>
    %147 = vector.broadcast %139 : vector<64x1xf32> to vector<64x32xf32>
    %148 = arith.subf %133, %147 : vector<64x32xf32>
    %cst_73 = arith.constant 9.99999974E-6 : f32
    %149 = vector.broadcast %cst_73 : f32 to vector<64x1xf32>
    %150 = arith.addf %146, %149 : vector<64x1xf32>
    %151 = math.rsqrt %150 : vector<64x1xf32>
    %152 = vector.broadcast %151 : vector<64x1xf32> to vector<64x32xf32>
    %153 = arith.mulf %148, %152 : vector<64x32xf32>
    %154 = vector.broadcast %134 : vector<1x32xf32> to vector<64x32xf32>
    %155 = arith.mulf %153, %154 : vector<64x32xf32>
    %156 = vector.broadcast %135 : vector<1x32xf32> to vector<64x32xf32>
    %157 = arith.addf %155, %156 : vector<64x32xf32>
    %158 = arith.truncf %157 : vector<64x32xf32> to vector<64x32xbf16>
    %c0_74 = arith.constant 0 : index
    %c0_75 = arith.constant 0 : index
    %159 = vector.load %arg16[%c0_74, %c0_75] : memref<32x128xbf16, #tpu.memory_space<vmem>>, vector<32x128xbf16>
    %cst_76 = arith.constant dense<0.000000e+00> : vector<64x128xf32>
    %160 = tpu.matmul %158, %159, %cst_76 {dimension_numbers = #tpu.dot_dimension_numbers<[1], [0], [0], [1], [0, 0, 1, 1], [], []>} : vector<64x32xbf16>, vector<32x128xbf16>, vector<64x128xf32> -> vector<64x128xf32>
    %c0_77 = arith.constant 0 : index
    %c0_78 = arith.constant 0 : index
    %161 = vector.load %arg17[%c0_77, %c0_78] : memref<1x128xf32, #tpu.memory_space<vmem>>, vector<1x128xf32>
    %162 = vector.broadcast %161 : vector<1x128xf32> to vector<64x128xf32>
    %163 = arith.addf %160, %162 : vector<64x128xf32>
    %cst_79 = arith.constant 5.000000e-01 : f32
    %164 = vector.broadcast %cst_79 : f32 to vector<64x128xf32>
    %165 = arith.mulf %164, %163 : vector<64x128xf32>
    %cst_80 = arith.constant 0.707106769 : f32
    %166 = vector.broadcast %cst_80 : f32 to vector<64x128xf32>
    %167 = arith.mulf %163, %166 : vector<64x128xf32>
    %168 = math.erf %167 : vector<64x128xf32>
    %cst_81 = arith.constant 1.000000e+00 : f32
    %169 = vector.broadcast %cst_81 : f32 to vector<64x128xf32>
    %170 = arith.addf %169, %168 : vector<64x128xf32>
    %171 = arith.mulf %165, %170 : vector<64x128xf32>
    %172 = arith.truncf %171 : vector<64x128xf32> to vector<64x128xbf16>
    %c0_82 = arith.constant 0 : index
    %c0_83 = arith.constant 0 : index
    %173 = vector.load %arg18[%c0_82, %c0_83] : memref<128x32xbf16, #tpu.memory_space<vmem>>, vector<128x32xbf16>
    %cst_84 = arith.constant dense<0.000000e+00> : vector<64x32xf32>
    %174 = tpu.matmul %172, %173, %cst_84 {dimension_numbers = #tpu.dot_dimension_numbers<[1], [0], [0], [1], [0, 0, 1, 1], [], []>} : vector<64x128xbf16>, vector<128x32xbf16>, vector<64x32xf32> -> vector<64x32xf32>
    %c0_85 = arith.constant 0 : index
    %c0_86 = arith.constant 0 : index
    %175 = vector.load %arg19[%c0_85, %c0_86] : memref<1x32xf32, #tpu.memory_space<vmem>>, vector<1x32xf32>
    %176 = vector.broadcast %175 : vector<1x32xf32> to vector<64x32xf32>
    %177 = arith.addf %174, %176 : vector<64x32xf32>
    %178 = arith.addf %133, %177 : vector<64x32xf32>
    %179 = vector.shape_cast %178 : vector<64x32xf32> to vector<8x8x32xf32>
    %c0_87 = arith.constant 0 : index
    %c0_88 = arith.constant 0 : index
    %c0_89 = arith.constant 0 : index
    %180 = vector.load %arg20[%c0_87, %c0_88, %c0_89] : memref<8x8x32xf32, #tpu.memory_space<vmem>>, vector<8x8x32xf32>
    tpu.vector_store %arg20[%c0_87, %c0_88, %c0_89], %179 {strides = array<i32>} : memref<8x8x32xf32, #tpu.memory_space<vmem>>, vector<8x8x32xf32>,
    return
  }
  func.func @transform_0(%arg0: i32) -> (i32, i32, i32) {
    %c0_i32 = arith.constant 0 : i32
    %c0_i32_0 = arith.constant 0 : i32
    %c0_i32_1 = arith.constant 0 : i32
    return %c0_i32, %arg0, %c0_i32_0 : i32, i32, i32
  }
  func.func @transform_1(%arg0: i32) -> (i32, i32, i32) {
    %c0_i32 = arith.constant 0 : i32
    %c0_i32_0 = arith.constant 0 : i32
    %c0_i32_1 = arith.constant 0 : i32
    return %c0_i32, %arg0, %c0_i32_0 : i32, i32, i32
  }
  func.func @transform_2(%arg0: i32) -> (i32, i32) {
    %c0_i32 = arith.constant 0 : i32
    %c0_i32_0 = arith.constant 0 : i32
    %c0_i32_1 = arith.constant 0 : i32
    return %c0_i32, %c0_i32_0 : i32, i32
  }
  func.func @transform_3(%arg0: i32) -> (i32, i32) {
    %c0_i32 = arith.constant 0 : i32
    %c0_i32_0 = arith.constant 0 : i32
    %c0_i32_1 = arith.constant 0 : i32
    return %c0_i32, %c0_i32_0 : i32, i32
  }
  func.func @transform_4(%arg0: i32) -> (i32, i32) {
    %c0_i32 = arith.constant 0 : i32
    %c0_i32_0 = arith.constant 0 : i32
    %c0_i32_1 = arith.constant 0 : i32
    return %c0_i32, %c0_i32_0 : i32, i32
  }
  func.func @transform_5(%arg0: i32) -> (i32, i32) {
    %c0_i32 = arith.constant 0 : i32
    %c0_i32_0 = arith.constant 0 : i32
    %c0_i32_1 = arith.constant 0 : i32
    return %c0_i32, %c0_i32_0 : i32, i32
  }
  func.func @transform_6(%arg0: i32) -> (i32, i32) {
    %c0_i32 = arith.constant 0 : i32
    %c0_i32_0 = arith.constant 0 : i32
    %c0_i32_1 = arith.constant 0 : i32
    return %c0_i32, %c0_i32_0 : i32, i32
  }
  func.func @transform_7(%arg0: i32) -> (i32, i32) {
    %c0_i32 = arith.constant 0 : i32
    %c0_i32_0 = arith.constant 0 : i32
    %c0_i32_1 = arith.constant 0 : i32
    return %c0_i32, %c0_i32_0 : i32, i32
  }
  func.func @transform_8(%arg0: i32) -> (i32, i32) {
    %c0_i32 = arith.constant 0 : i32
    %c0_i32_0 = arith.constant 0 : i32
    %c0_i32_1 = arith.constant 0 : i32
    return %c0_i32, %c0_i32_0 : i32, i32
  }
  func.func @transform_9(%arg0: i32) -> (i32, i32) {
    %c0_i32 = arith.constant 0 : i32
    %c0_i32_0 = arith.constant 0 : i32
    %c0_i32_1 = arith.constant 0 : i32
    return %c0_i32, %c0_i32_0 : i32, i32
  }
  func.func @transform_10(%arg0: i32) -> (i32, i32) {
    %c0_i32 = arith.constant 0 : i32
    %c0_i32_0 = arith.constant 0 : i32
    %c0_i32_1 = arith.constant 0 : i32
    return %c0_i32, %c0_i32_0 : i32, i32
  }
  func.func @transform_11(%arg0: i32) -> (i32, i32) {
    %c0_i32 = arith.constant 0 : i32
    %c0_i32_0 = arith.constant 0 : i32
    %c0_i32_1 = arith.constant 0 : i32
    return %c0_i32, %c0_i32_0 : i32, i32
  }
  func.func @transform_12(%arg0: i32) -> (i32, i32) {
    %c0_i32 = arith.constant 0 : i32
    %c0_i32_0 = arith.constant 0 : i32
    %c0_i32_1 = arith.constant 0 : i32
    return %c0_i32, %c0_i32_0 : i32, i32
  }
  func.func @transform_13(%arg0: i32) -> (i32, i32) {
    %c0_i32 = arith.constant 0 : i32
    %c0_i32_0 = arith.constant 0 : i32
    %c0_i32_1 = arith.constant 0 : i32
    return %c0_i32, %c0_i32_0 : i32, i32
  }
  func.func @transform_14(%arg0: i32) -> (i32, i32) {
    %c0_i32 = arith.constant 0 : i32
    %c0_i32_0 = arith.constant 0 : i32
    %c0_i32_1 = arith.constant 0 : i32
    return %c0_i32, %c0_i32_0 : i32, i32
  }
  func.func @transform_15(%arg0: i32) -> (i32, i32) {
    %c0_i32 = arith.constant 0 : i32
    %c0_i32_0 = arith.constant 0 : i32
    %c0_i32_1 = arith.constant 0 : i32
    return %c0_i32, %c0_i32_0 : i32, i32
  }
  func.func @transform_16(%arg0: i32) -> (i32, i32) {
    %c0_i32 = arith.constant 0 : i32
    %c0_i32_0 = arith.constant 0 : i32
    %c0_i32_1 = arith.constant 0 : i32
    return %c0_i32, %c0_i32_0 : i32, i32
  }
  func.func @transform_17(%arg0: i32) -> (i32, i32) {
    %c0_i32 = arith.constant 0 : i32
    %c0_i32_0 = arith.constant 0 : i32
    %c0_i32_1 = arith.constant 0 : i32
    return %c0_i32, %c0_i32_0 : i32, i32
  }
  func.func @transform_18(%arg0: i32) -> (i32, i32) {
    %c0_i32 = arith.constant 0 : i32
    %c0_i32_0 = arith.constant 0 : i32
    %c0_i32_1 = arith.constant 0 : i32
    return %c0_i32, %c0_i32_0 : i32, i32
  }
  func.func @transform_19(%arg0: i32) -> (i32, i32, i32) {
    %c0_i32 = arith.constant 0 : i32
    %c0_i32_0 = arith.constant 0 : i32
    %c0_i32_1 = arith.constant 0 : i32
    return %c0_i32, %arg0, %c0_i32_0 : i32, i32, i32
  }
}

</mosaic_0001>

<bundles_post_ra>
// kernel: residual_cross_attention_block.1
= control target key start
LH: loop header
LB: loop body
LE: loop exit
PB: predicated region body
PF: predicated region fallthrough
CT: control target
= control target key end

     0   :  { %s5018_s0 = inlined_call_operand.vmem [shape: f32[8,16,32], index: 0, kind: input, shape index: {}]   ;;  %s5019_s1 = inlined_call_operand.vmem [shape: f32[8,16,32], index: 1, kind: input, shape index: {}]   ;;  %s5020_s2 = inlined_call_operand.vmem [shape: f32[64,64], index: 2, kind: input, shape index: {}]   ;;  %s5021_s3 = inlined_call_operand.vmem [shape: f32[1,32], index: 3, kind: input, shape index: {}]   ;;  %s5022_s4 = inlined_call_operand.vmem [shape: f32[1,32], index: 4, kind: input, shape index: {}]   ;;  %s5023_s5 = inlined_call_operand.vmem [shape: bf16[32,32], index: 5, kind: input, shape index: {}]   ;;  %s5024_s6 = inlined_call_operand.vmem [shape: bf16[32,32], index: 6, kind: input, shape index: {}]   ;;  %s5025_s7 = inlined_call_operand.vmem [shape: bf16[32,32], index: 7, kind: input, shape index: {}]   ;;  %s5026_s8 = inlined_call_operand.vmem [shape: f32[1,32], index: 8, kind: input, shape index: {}]   ;;  %s5027_s9 = inlined_call_operand.vmem [shape: f32[1,32], index: 9, kind: input, shape index: {}]   ;;  %s5028_s10 = inlined_call_operand.vmem [shape: f32[1,32], index: 10, kind: input, shape index: {}]   ;;  %s5029_s11 = inlined_call_operand.vmem [shape: bf16[32,32], index: 11, kind: input, shape index: {}]   ;;  %s5030_s12 = inlined_call_operand.vmem [shape: f32[1,32], index: 12, kind: input, shape index: {}]   ;;  %s5031_s13 = inlined_call_operand.vmem [shape: f32[1,32], index: 13, kind: input, shape index: {}]   ;;  %s5032_s14 = inlined_call_operand.vmem [shape: f32[1,32], index: 14, kind: input, shape index: {}]   ;;  %s5033_s15 = inlined_call_operand.vmem [shape: bf16[32,128], index: 15, kind: input, shape index: {}]   ;;  %s5034_s16 = inlined_call_operand.vmem [shape: f32[1,128], index: 16, kind: input, shape index: {}]   ;;  %s5035_s17 = inlined_call_operand.vmem [shape: bf16[128,32], index: 17, kind: input, shape index: {}]   ;;  %s5036_s18 = inlined_call_operand.vmem [shape: f32[1,32], index: 18, kind: input, shape index: {}]   ;;  %s5037_s19 = inlined_call_operand.hbm [shape: f32[8,16,32], index: 19, kind: output, shape index: {}]  }
   0x1   :  { %5048 = sst [smem:[#allocation12_spill]] %s5018_s0 }
   0x2   :  { %5049 = sst [smem:[#allocation13_spill]] %s5019_s1 }
   0x3   :  { %5050 = sst [smem:[#allocation14_spill]] %s5020_s2 }
   0x4   :  { %5051 = sst [smem:[#allocation15_spill]] %s5021_s3 }
   0x5   :  { %5052 = sst [smem:[#allocation16_spill]] %s5022_s4 }
   0x6   :  { %5053 = sst [smem:[#allocation17_spill]] %s5023_s5 }
   0x7   :  { %24 = vsyncpa [#allocation6], 0 }
   0x8   :  { %26 = vsyncpa [#allocation6 + $0x1], 0  ;;  %s4019_s0 = smov 0   ;;  %s4021_s30 = smov 0  }
   0x9   :  { %s4023_s20 = smov 0   ;;  %s4025_s21 = smov 0  }
   0xa LB: > { %5054 = sst [smem:[#allocation8_spill]] %s3896_s0  ;;  %s5039_s1 = sadd.s32 4294967295, %s3908_s21   ;;  %s3908_s21 = sphi %s4025_s21, %s5074_s21   ;;  %s3904_s20 = sphi %s4023_s20, %s5078_s20   ;;  %s3900_s30 = sphi %s4021_s30, %s5077_s30   ;;  %s3896_s0 = sphi %s4019_s0, %s5076_s0  }
   0xb   : > { %s3160_s22 = sadd.s32 4294967294, %s3908_s21   ;;  %s4042_s2 = sadd.s32 1, %s3908_s21  }
   0xc   : > { %5055 = sst [smem:[#allocation9_spill]] %s4042_s2  ;;  %s39_s23 = sadd.s32 1, %s3904_s20 }
   0xd   : > { %s36_s24 = ssub.s32 %s3908_s21, %s4042_s2  ;;  %p46_p0 = scmp.ne.s32.totalorder %s3904_s20, %s3900_s30 }
   0xe   : > { %p37_p1 = scmp.eq.s32.totalorder %s36_s24, 0  ;;  %p47_p2 = scmp.eq.s32.totalorder %s3908_s21, 0 }
   0xf   : > { %p459_p3 = scmp.eq.s32.totalorder %s5039_s1, 1  ;;  %p464_p4 = scmp.ne.s32.totalorder %s3900_s30, %s3896_s0 }
  0x10   : > { %s4055_s25 = scalar_select %p37_p1, %s3904_s20, %s39_s23  }
  0x11   : > { %p4057_p5 = por %p47_p2, %p46_p0  ;;  %p4061_p6 = por %p459_p3, %p46_p0 }
  0x12   : > { %5056 = sst [smem:[#allocation10_spill]] %s4055_s25  ;;  %p465_p7 = scmp.eq.s32.totalorder %s3160_s22, 1 }
  0x13   : > { %p3162_p9 = scmp.ge.s32.totalorder %s3908_s21, 2 }
  0x14   : > { %p4065_p8 = por %p465_p7, %p464_p4 }
  0x15   : > { %532 = sbr.rel (%p3162_p9) target bundleno = 56 (0x38), region = 84 }
  0x16   : > { %s5059_s27 = scalar_select %p4065_p8, 1, 0 }
  0x18   : > { %5060 = sst [smem:[#allocation11_spill]] %s5059_s27 }
  0x1c   : > { %535 = sbr.rel (!%p4057_p5) target bundleno = 42 (0x2a), region = 88  ;;  %s537_s28 = sand.u32 (%p4057_p5), 1, %s3904_s20  }
  0x1d   : > { %s3164_s29 = sshll.u32 (%p4057_p5), %s3908_s21, 3  ;;  %s3163_s23 = sshll.u32 (%p4057_p5), %s537_s28, 6 }
  0x1e   : > { %s5061_s22 = sld [smem:[#allocation12_spill]] (%p4057_p5)  ;;  %s539_s2 = scalar_lea.vmem (%p4057_p5), [#allocation3], %s3163_s23 }
  0x24   : > { %s541_s25 = scalar_lea.vmem %s5061_s22, %s3164_s29 }
  0x25   : > { %v583_v0 = vld [vmem:[%s541_s25] sm:$0xff]  ;;  %v585_v1 = vld [vmem:[%s541_s25 + $0x10] sm:$0xff] }
  0x26   : > { %v587_v2 = vld [vmem:[%s541_s25 + $0x20] sm:$0xff]  ;;  %584 = vst [vmem:[%s539_s2] sm:$0xff] %v583_v0  ;;  %586 = vst [vmem:[%s539_s2 + $0x8] sm:$0xff] %v585_v1  ;;  %v589_v3 = vld [vmem:[%s541_s25 + $0x30] sm:$0xff] }
  0x27   : > { %588 = vst [vmem:[%s539_s2 + $0x10] sm:$0xff] %v587_v2  ;;  %v591_v4 = vld [vmem:[%s541_s25 + $0x40] sm:$0xff]  ;;  %v593_v5 = vld [vmem:[%s541_s25 + $0x50] sm:$0xff]  ;;  %590 = vst [vmem:[%s539_s2 + $0x18] sm:$0xff] %v589_v3 }
  0x28   : > { %592 = vst [vmem:[%s539_s2 + $0x20] sm:$0xff] %v591_v4  ;;  %594 = vst [vmem:[%s539_s2 + $0x28] sm:$0xff] %v593_v5  ;;  %v595_v6 = vld [vmem:[%s541_s25 + $0x60] sm:$0xff]  ;;  %v597_v7 = vld [vmem:[%s541_s25 + $0x70] sm:$0xff] }
  0x29   : > { %596 = vst [vmem:[%s539_s2 + $0x30] sm:$0xff] %v595_v6  ;;  %598 = vst [vmem:[%s539_s2 + $0x38] sm:$0xff] %v597_v7 }
  0x2a PF: > { %604 = sbr.rel (!%p4057_p5) target bundleno = 56 (0x38), region = 126  ;;  %s606_s1 = sand.u32 (%p4057_p5), 1, %s3904_s20  }
  0x2b   : > { %s3166_s28 = sshll.u32 (%p4057_p5), %s3908_s21, 3  ;;  %s3165_s29 = sshll.u32 (%p4057_p5), %s606_s1, 6 }
  0x2c   : > { %s5062_s22 = sld [smem:[#allocation13_spill]] (%p4057_p5)  ;;  %s608_s0 = scalar_lea.vmem (%p4057_p5), [#allocation4], %s3165_s29 }
  0x32   : > { %s610_s27 = scalar_lea.vmem %s5062_s22, %s3166_s28 }
  0x33   : > { %v652_v8 = vld [vmem:[%s610_s27] sm:$0xff]  ;;  %v654_v9 = vld [vmem:[%s610_s27 + $0x10] sm:$0xff] }
  0x34   : > { %v656_v10 = vld [vmem:[%s610_s27 + $0x20] sm:$0xff]  ;;  %653 = vst [vmem:[%s608_s0] sm:$0xff] %v652_v8  ;;  %655 = vst [vmem:[%s608_s0 + $0x8] sm:$0xff] %v654_v9  ;;  %v658_v11 = vld [vmem:[%s610_s27 + $0x30] sm:$0xff] }
  0x35   : > { %657 = vst [vmem:[%s608_s0 + $0x10] sm:$0xff] %v656_v10  ;;  %v660_v12 = vld [vmem:[%s610_s27 + $0x40] sm:$0xff]  ;;  %v662_v13 = vld [vmem:[%s610_s27 + $0x50] sm:$0xff]  ;;  %659 = vst [vmem:[%s608_s0 + $0x18] sm:$0xff] %v658_v11 }
  0x36   : > { %661 = vst [vmem:[%s608_s0 + $0x20] sm:$0xff] %v660_v12  ;;  %663 = vst [vmem:[%s608_s0 + $0x28] sm:$0xff] %v662_v13  ;;  %v664_v14 = vld [vmem:[%s610_s27 + $0x60] sm:$0xff]  ;;  %v666_v15 = vld [vmem:[%s610_s27 + $0x70] sm:$0xff] }
  0x37   : > { %665 = vst [vmem:[%s608_s0 + $0x30] sm:$0xff] %v664_v14  ;;  %667 = vst [vmem:[%s608_s0 + $0x38] sm:$0xff] %v666_v15 }
  0x38 PF: > { %p3167_p10 = scmp.ge.s32.totalorder %s3908_s21, 1  ;;  %p672_p11 = scmp.lt.s32.totalorder %s3908_s21, 3 }
  0x3a   : > { %p673_p12 = pnand %p3167_p10, %p672_p11 }
  0x3b   : > { %s5044_s2 = sand.u32 (!%p673_p12), 1, %s3900_s30   ;;  %vm764_vm0 = vcmask (!%p673_p12), 261120   ;;  %v3644_v32 = vld [vmem:[%s5024_s6] sm:$0xff] (!%p673_p12)   ;;  %v3645_v33 = vld [vmem:[%s5024_s6 + $0x8] sm:$0xff] (!%p673_p12)   ;;  %s5063_s5 = sld [smem:[#allocation17_spill]] (!%p673_p12)  ;;  %vm1222_vm1 = vcmask (!%p673_p12), 64512  }
  0x3c   : > { %676 = sbr.rel (%p673_p12) target bundleno = 4403 (0x1133), region = 164  ;;  %s4091_s25 = sshll.u32 (!%p673_p12), %s5044_s2, 6  ;;  %3373 = vmatprep.subr.bf16.mxu1 (!%p673_p12), %v3644_v32  ;;  %vm1312_vm2 = vcmask (!%p673_p12), 523264   ;;  %vm1828_vm3 = vcmask (!%p673_p12), 130112   ;;  %vm2163_vm4 = vcmask (!%p673_p12), 195712   ;;  %vm2498_vm5 = vcmask (!%p673_p12), 261312  }
  0x3d   : > { %s4094_s3 = scalar_lea.vmem (!%p673_p12), [#allocation3], %s4091_s25  ;;  %s4119_s29 = scalar_lea.vmem (!%p673_p12), [#allocation4], %s4091_s25  ;;  %3374 = vmatpush3.bf16.msra.mxu1 (!%p673_p12), %v3644_v32 }
  0x3e   : > { %v746_v16 = vld [vmem:[%s4094_s3] sm:$0xff] (!%p673_p12)  ;;  %v748_v17 = vld [vmem:[%s4094_s3 + $0x10] sm:$0xff] (!%p673_p12)  ;;  %v747_v18 = vld [vmem:[%s4094_s3 + $0x8] sm:$0xff] (!%p673_p12)  ;;  %3375 = vmatprep.subr.bf16.mxu1 (!%p673_p12), %v3645_v33  ;;  %s5064_s23 = sld [smem:[#allocation15_spill]] (!%p673_p12)  ;;  %s5065_s4 = sld [smem:[#allocation16_spill]] (!%p673_p12) }
  0x3f   : > { %v765_v19 = vsel (!%p673_p12), %vm764_vm0, %v746_v16, 0.0  ;;  %v771_v20 = vsel (!%p673_p12), %vm764_vm0, %v748_v17, 0.0  ;;  %v749_v21 = vld [vmem:[%s4094_s3 + $0x18] sm:$0xff] (!%p673_p12)  ;;  %v750_v22 = vld [vmem:[%s4094_s3 + $0x20] sm:$0xff] (!%p673_p12)  ;;  %v751_v23 = vld [vmem:[%s4094_s3 + $0x28] sm:$0xff] (!%p673_p12)  ;;  %v768_v24 = vsel (!%p673_p12), %vm764_vm0, %v747_v18, 0.0 }
  0x40   : > { %766 = vadd.xlane.f32.xlu0 (!%p673_p12), %v765_v19  ;;  %772 = vadd.xlane.f32.xlu1 (!%p673_p12), %v771_v20  ;;  %v774_v25 = vsel (!%p673_p12), %vm764_vm0, %v749_v21, 0.0  ;;  %v777_v26 = vsel (!%p673_p12), %vm764_vm0, %v750_v22, 0.0  ;;  %v780_v27 = vsel (!%p673_p12), %vm764_vm0, %v751_v23, 0.0  ;;  %v752_v28 = vld [vmem:[%s4094_s3 + $0x30] sm:$0xff] (!%p673_p12)  ;;  %v753_v29 = vld [vmem:[%s4094_s3 + $0x38] sm:$0xff] (!%p673_p12)  ;;  %v754_v34 = vld [vmem:[%s4119_s29] sm:$0xff] (!%p673_p12) }
  0x41   : > { %v783_v30 = vsel (!%p673_p12), %vm764_vm0, %v752_v28, 0.0  ;;  %v786_v31 = vsel (!%p673_p12), %vm764_vm0, %v753_v29, 0.0  ;;  %v755_v35 = vld [vmem:[%s4119_s29 + $0x8] sm:$0xff] (!%p673_p12)  ;;  %v756_v37 = vld [vmem:[%s4119_s29 + $0x10] sm:$0xff] (!%p673_p12)  ;;  %v757_v38 = vld [vmem:[%s4119_s29 + $0x18] sm:$0xff] (!%p673_p12)  ;;  %3376 = vmatpush3.bf16.msra.mxu1 (!%p673_p12), %v3645_v33  ;;  %s5066_s0 = sld [smem:[#allocation14_spill]] (!%p673_p12) }
  0x42   : > { %v4123_v36 = vpack.c.bf16 (!%p673_p12), %v755_v35, %v754_v34  ;;  %v4129_v39 = vpack.c.bf16 (!%p673_p12), %v757_v38, %v756_v37  ;;  %v760_v19 = vld [vmem:[%s4119_s29 + $0x30] sm:$0xff] (!%p673_p12)  ;;  %v761_v20 = vld [vmem:[%s4119_s29 + $0x38] sm:$0xff] (!%p673_p12)  ;;  %s3910_s2 = smov (!%p673_p12), 120   ;;  %s3911_s1 = smov (!%p673_p12), 112  }
  0x43   : > { %s5045_s28 = smov 104   ;;  %s3914_s24 = smov 16  }
  0x44   : > { %769 = vadd.xlane.f32.xlu0 %v768_v24  ;;  %775 = vadd.xlane.f32.xlu1 %v774_v25  ;;  %v4194_v24 = vld [vmem:[%s5027_s9] ss:$0 sm:$0xff] }
  0x45   : > { %3377 = vmatprep.mubr.msk.bf16.mxu1 %vm764_vm0, %v4123_v36 }
  0x46   : > { %3378 = vmatmul.mubr.msk.bf16.vlgmr.msra.gmra.mrb[0].mxu1 %vm764_vm0, %v4129_v39 }
  0x47   : > { %s5067_s27 = smov %s5066_s0 }
  0x48   : > { %778 = vadd.xlane.f32.xlu0 %v777_v26  ;;  %781 = vadd.xlane.f32.xlu1 %v780_v27 }
  0x4c   : > { %784 = vadd.xlane.f32.xlu0 %v783_v30  ;;  %787 = vadd.xlane.f32.xlu1 %v786_v31 }
  0xcd   : > { %v767_v40 = vpop.xlane.xlu0 %766  ;;  %v773_v41 = vpop.xlane.xlu1 %772 }
  0xce   : > { %v790_v42 = vmul.f32 0.03125, %v767_v40  ;;  %v792_v43 = vmul.f32 0.03125, %v773_v41 }
  0xd0   : > { %v4133_v44 = vsub.f32 %v746_v16, %v790_v42  ;;  %v4135_v45 = vsub.f32 %v748_v17, %v792_v43  ;;  %v758_v16 = vld [vmem:[%s4119_s29 + $0x20] sm:$0xff]  ;;  %v759_v17 = vld [vmem:[%s4119_s29 + $0x28] sm:$0xff]  ;;  %s3915_s29 = smov 24  }
  0xd1   : > { %v770_v46 = vpop.xlane.xlu0 %769  ;;  %v776_v47 = vpop.xlane.xlu1 %775 }
  0xd2   : > { %v791_v48 = vmul.f32 0.03125, %v770_v46  ;;  %v793_v49 = vmul.f32 0.03125, %v776_v47  ;;  %v806_v50 = vmul.f32 %v4133_v44, %v4133_v44  ;;  %v808_v51 = vmul.f32 %v4135_v45, %v4135_v45 }
  0xd4   : > { %v4141_v52 = vsub.f32 %v747_v18, %v791_v48  ;;  %v4143_v53 = vsub.f32 %v749_v21, %v793_v49  ;;  %v814_v54 = vsel %vm764_vm0, %v806_v50, 0.0  ;;  %v820_v57 = vsel %vm764_vm0, %v808_v51, 0.0 }
  0xd5   : > { %815 = vadd.xlane.f32.xlu0 %v814_v54  ;;  %v779_v55 = vpop.xlane.xlu0 %778  ;;  %v782_v56 = vpop.xlane.xlu1 %781  ;;  %v4175_v18 = vpack.c.bf16 %v759_v17, %v758_v16  ;;  %v4179_v21 = vpack.c.bf16 %v761_v20, %v760_v19 }
  0xd6   : > { %v794_v58 = vmul.f32 0.03125, %v779_v55  ;;  %v795_v59 = vmul.f32 0.03125, %v782_v56  ;;  %v807_v60 = vmul.f32 %v4141_v52, %v4141_v52  ;;  %v809_v61 = vmul.f32 %v4143_v53, %v4143_v53 }
  0xd7   : > { %3381 = vmatprep.mubr.msk.bf16.mxu1 %vm764_vm0, %v4175_v18 }
  0xd8   : > { %v4151_v62 = vsub.f32 %v750_v22, %v794_v58  ;;  %v4153_v63 = vsub.f32 %v751_v23, %v795_v59  ;;  %v817_v0 = vsel %vm764_vm0, %v807_v60, 0.0  ;;  %v823_v3 = vsel %vm764_vm0, %v809_v61, 0.0  ;;  %3382 = vmatmul.mubr.msk.bf16.gmra.mrb[4].mxu1 %vm764_vm0, %v4179_v21  ;;  %v3646_v22 = vld [vmem:[%s5063_s5] sm:$0xff]   ;;  %v3647_v23 = vld [vmem:[%s5063_s5 + $0x8] sm:$0xff]  }
  0xd9   : > { %821 = vadd.xlane.f32.xlu0 %v820_v57  ;;  %818 = vadd.xlane.f32.xlu1 %v817_v0  ;;  %v785_v1 = vpop.xlane.xlu0 %784  ;;  %v788_v2 = vpop.xlane.xlu1 %787 }
  0xda   : > { %v796_v4 = vmul.f32 0.03125, %v785_v1  ;;  %v797_v5 = vmul.f32 0.03125, %v788_v2  ;;  %v810_v6 = vmul.f32 %v4151_v62, %v4151_v62  ;;  %v811_v7 = vmul.f32 %v4153_v63, %v4153_v63  ;;  %3361 = vmatprep.subr.bf16.mxu0 %v3646_v22 }
  0xdb   : > { %3362 = vmatpush3.bf16.msra.mxu0 %v3646_v22 }
  0xdc   : > { %v4161_v8 = vsub.f32 %v752_v28, %v796_v4  ;;  %v4163_v9 = vsub.f32 %v753_v29, %v797_v5  ;;  %v826_v10 = vsel %vm764_vm0, %v810_v6, 0.0  ;;  %v829_v11 = vsel %vm764_vm0, %v811_v7, 0.0  ;;  %3363 = vmatprep.subr.bf16.mxu0 %v3647_v23  ;;  %v3171_v6 = vld [vmem:[%s5064_s23] ss:$0 sm:$0xff]  ;;  %s5047_s23 = smov 8  }
  0xdd   : > { %824 = vadd.xlane.f32.xlu1 %v823_v3  ;;  %827 = vadd.xlane.f32.xlu0 %v826_v10 }
  0xde   : > { %v812_v12 = vmul.f32 %v4161_v8, %v4161_v8  ;;  %v813_v13 = vmul.f32 %v4163_v9, %v4163_v9 }
  0xdf   : > { %3364 = vmatpush3.bf16.msra.mxu0 %v3647_v23 }
  0xe0   : > { %v832_v14 = vsel %vm764_vm0, %v812_v12, 0.0  ;;  %v835_v15 = vsel %vm764_vm0, %v813_v13, 0.0 }
  0xe1   : > { %830 = vadd.xlane.f32.xlu1 %v829_v11  ;;  %833 = vadd.xlane.f32.xlu0 %v832_v14  ;;  %v3172_v14 = vld [vmem:[%s5065_s4] ss:$0 sm:$0xff] }
  0xe5   : > { %836 = vadd.xlane.f32.xlu1 %v835_v15 }
 0x119   : > { %v3379_v25 = vpop.f32.mrb[0].mxu1 }
 0x11a   : > { %v1084_v26 = vadd.f32 %v3379_v25, %v4194_v24  ;;  %v1075_v27 = vpop.f32.mrb[1].mxu1 }
 0x11b   : > { %v1076_v28 = vadd.f32 %v4194_v24, %v1075_v27  ;;  %v3380_v29 = vpop.f32.mrb[2].mxu1 }
 0x11c   : > { %v1087_v30 = vadd.f32 %v3380_v29, %v4194_v24  ;;  %v1078_v31 = vpop.f32.mrb[3].mxu1 }
 0x11d   : > { %v1079_v32 = vadd.f32 %v4194_v24, %v1078_v31 }
 0x11e   : > { %v4200_v33 = vpack.c.bf16 %v1087_v30, %v1084_v26 }
 0x11f   : > { %v4202_v34 = vpack.c.bf16 %v1079_v32, %v1076_v28 }
 0x120   : > { %v1239_v37 = vsel %vm1222_vm1, %v4200_v33, 0 }
 0x121   : > { %3581 = vmatprep.subr.msk.bf16.mxu1 %vm1222_vm1, %v4202_v34  ;;  %v1236_v35 = vsel %vm1222_vm1, %v4202_v34, 0 }
 0x122   : > { %3398 = vmatpush3.bf16.xpose.msra.mxu1 %v1236_v35 }
 0x123   : > { %3582 = vmatprep.subr.msk.bf16.mxu1 %vm1222_vm1, %v4200_v33 }
 0x12a   : > { %3400 = vmatpush3.bf16.xpose.msra.mxu1 %v1239_v37 }
 0x162   : > { %v816_v38 = vpop.xlane.xlu0 %815 }
 0x163   : > { %v838_v40 = vmul.f32 0.03125, %v816_v38 }
 0x165   : > { %v846_v41 = vadd.f32 1e-05, %v838_v40 }
 0x166   : > { %v819_v42 = vpop.xlane.xlu1 %818  ;;  %v822_v43 = vpop.xlane.xlu0 %821 }
 0x167   : > { %3662 = vrsqrt.f32 %v846_v41  ;;  %v839_v46 = vmul.f32 0.03125, %v819_v42  ;;  %v840_v47 = vmul.f32 0.03125, %v822_v43 }
 0x169   : > { %v847_v48 = vadd.f32 1e-05, %v839_v46  ;;  %v848_v49 = vadd.f32 1e-05, %v840_v47 }
 0x16a   : > { %v825_v50 = vpop.xlane.xlu1 %824  ;;  %v828_v51 = vpop.xlane.xlu0 %827 }
 0x16b   : > { %3664 = vrsqrt.f32 %v847_v48  ;;  %v841_v54 = vmul.f32 0.03125, %v825_v50  ;;  %v842_v55 = vmul.f32 0.03125, %v828_v51 }
 0x16c   : > { %3666 = vrsqrt.f32 %v848_v49 }
 0x16d   : > { %v849_v56 = vadd.f32 1e-05, %v841_v54  ;;  %v850_v57 = vadd.f32 1e-05, %v842_v55 }
 0x16e   : > { %v831_v58 = vpop.xlane.xlu1 %830  ;;  %v834_v59 = vpop.xlane.xlu0 %833 }
 0x16f   : > { %3668 = vrsqrt.f32 %v849_v56  ;;  %v843_v60 = vmul.f32 0.03125, %v831_v58  ;;  %v844_v61 = vmul.f32 0.03125, %v834_v59 }
 0x170   : > { %3670 = vrsqrt.f32 %v850_v57 }
 0x171   : > { %v3663_v0 = vpop.eup %3662  ;;  %v851_v1 = vadd.f32 1e-05, %v843_v60  ;;  %v852_v2 = vadd.f32 1e-05, %v844_v61 }
 0x172   : > { %v837_v3 = vpop.xlane.xlu1 %836  ;;  %v862_v4 = vmul.f32 %v3663_v0, %v4133_v44 }
 0x173   : > { %3672 = vrsqrt.f32 %v851_v1  ;;  %v845_v5 = vmul.f32 0.03125, %v837_v3 }
 0x174   : > { %3674 = vrsqrt.f32 %v852_v2  ;;  %v876_v13 = vmul.f32 %v3171_v6, %v862_v4 }
 0x175   : > { %v3665_v7 = vpop.eup %3664  ;;  %v853_v10 = vadd.f32 1e-05, %v845_v5 }
 0x176   : > { %v3667_v11 = vpop.eup %3666  ;;  %v863_v12 = vmul.f32 %v3665_v7, %v4141_v52  ;;  %v890_v19 = vadd.f32 %v3172_v14, %v876_v13 }
 0x177   : > { %3676 = vrsqrt.f32 %v853_v10  ;;  %v864_v44 = vmul.f32 %v3667_v11, %v4135_v45 }
 0x178   : > { %v877_v15 = vmul.f32 %v3171_v6, %v863_v12 }
 0x179   : > { %v3669_v16 = vpop.eup %3668  ;;  %v878_v23 = vmul.f32 %v3171_v6, %v864_v44 }
 0x17a   : > { %v3671_v17 = vpop.eup %3670  ;;  %v891_v20 = vadd.f32 %v3172_v14, %v877_v15  ;;  %v865_v22 = vmul.f32 %v3669_v16, %v4143_v53 }
 0x17b   : > { %v866_v25 = vmul.f32 %v3671_v17, %v4151_v62  ;;  %v892_v29 = vadd.f32 %v3172_v14, %v878_v23 }
 0x17c   : > { %v898_v26 = vpack.c.bf16 %v891_v20, %v890_v19  ;;  %v879_v52 = vmul.f32 %v3171_v6, %v865_v22 }
 0x17d   : > { %v3673_v27 = vpop.eup %3672  ;;  %v880_v31 = vmul.f32 %v3171_v6, %v866_v25 }
 0x17e   : > { %v3675_v28 = vpop.eup %3674  ;;  %3365 = vmatprep.mubr.msk.bf16.mxu0 %vm764_vm0, %v898_v26  ;;  %v893_v30 = vadd.f32 %v3172_v14, %v879_v52  ;;  %v867_v45 = vmul.f32 %v3673_v27, %v4153_v63 }
 0x17f   : > { %v868_v32 = vmul.f32 %v3675_v28, %v4161_v8  ;;  %v894_v53 = vadd.f32 %v3172_v14, %v880_v31  ;;  %v3648_v28 = vld [vmem:[%s5025_s7] sm:$0xff]   ;;  %v4287_v31 = vld [vmem:[%s5067_s27 + $0x10] sm:$0xff] }
 0x180   : > { %v899_v35 = vpack.c.bf16 %v893_v30, %v892_v29  ;;  %v881_v37 = vmul.f32 %v3171_v6, %v867_v45  ;;  %v3649_v29 = vld [vmem:[%s5025_s7 + $0x8] sm:$0xff]   ;;  %3385 = vmatprep.subr.bf16.mxu0 %v3648_v28  ;;  %v4282_v30 = vld [vmem:[%s5066_s0] sm:$0xff]  ;;  %s5070_s0 = sand.u32 1, %s3900_s30  }
 0x181   : > { %v3677_v38 = vpop.eup %3676  ;;  %v882_v41 = vmul.f32 %v3171_v6, %v868_v32 }
 0x182   : > { %3366 = vmatmul.mubr.msk.bf16.vlgmr.msra.gmra.mrb[0].mxu0 %vm764_vm0, %v899_v35  ;;  %v895_v62 = vadd.f32 %v3172_v14, %v881_v37  ;;  %v869_v40 = vmul.f32 %v3677_v38, %v4163_v9  ;;  %v4298_v35 = vld [vmem:[%s5067_s27 + $0x18] sm:$0xff] }
 0x183   : > { %v896_v46 = vadd.f32 %v3172_v14, %v882_v41  ;;  %3386 = vmatpush3.bf16.msra.mxu0 %v3648_v28 }
 0x184   : > { %v900_v42 = vpack.c.bf16 %v895_v62, %v894_v53  ;;  %v883_v43 = vmul.f32 %v3171_v6, %v869_v40  ;;  %3387 = vmatprep.subr.bf16.mxu0 %v3649_v29 }
 0x186   : > { %3369 = vmatprep.mubr.msk.bf16.mxu0 %vm764_vm0, %v900_v42  ;;  %v897_v47 = vadd.f32 %v3172_v14, %v883_v43  ;;  %v4308_v42 = vld [vmem:[%s5067_s27 + $0x20] sm:$0xff] }
 0x187   : > { %3388 = vmatpush3.bf16.msra.mxu0 %v3649_v29 }
 0x188   : > { %v901_v63 = vpack.c.bf16 %v897_v47, %v896_v46  ;;  %v4314_v47 = vld [vmem:[%s5067_s27 + $0x30] sm:$0xff] }
 0x18a   : > { %3370 = vmatmul.mubr.msk.bf16.gmra.mrb[4].mxu0 %vm764_vm0, %v901_v63 }
 0x18b   : > { %3389 = vmatprep.mubr.msk.bf16.mxu0 %vm764_vm0, %v4123_v36 }
 0x192   : > { %3390 = vmatmul.mubr.msk.bf16.vlgmr.msra.gmra.mrb[8].mxu0 %vm764_vm0, %v4129_v39  ;;  %v4292_v39 = vld [vmem:[%s5067_s27 + $0x8] sm:$0xff] }
 0x193   : > { %3393 = vmatprep.mubr.msk.bf16.mxu0 %vm764_vm0, %v4175_v18 }
 0x19a   : > { %3394 = vmatmul.mubr.msk.bf16.gmra.mrb[12].mxu0 %vm764_vm0, %v4179_v21 }
 0x1ab   : > { %v3383_v8 = vpop.f32.mrb[4].mxu1 }
 0x1ac   : > { %v1100_v48 = vadd.f32 %v3383_v8, %v4194_v24  ;;  %v1091_v49 = vpop.f32.mrb[5].mxu1  ;;  %v4319_v8 = vld [vmem:[%s5067_s27 + $0x28] sm:$0xff] }
 0x1ad   : > { %v1092_v50 = vadd.f32 %v4194_v24, %v1091_v49  ;;  %v3384_v9 = vpop.f32.mrb[6].mxu1 }
 0x1ae   : > { %v1103_v51 = vadd.f32 %v3384_v9, %v4194_v24  ;;  %v1094_v54 = vpop.f32.mrb[7].mxu1  ;;  %v4326_v9 = vld [vmem:[%s5067_s27 + $0x38] sm:$0xff] }
 0x1af   : > { %v1095_v55 = vadd.f32 %v4194_v24, %v1094_v54  ;;  %v3173_v24 = vld [vmem:[%s5026_s8] ss:$0 sm:$0xff] }
 0x1b0   : > { %v4236_v56 = vpack.c.bf16 %v1103_v51, %v1100_v48 }
 0x1b1   : > { %v4238_v57 = vpack.c.bf16 %v1095_v55, %v1092_v50 }
 0x1b2   : > { %v1245_v58 = vsel %vm1222_vm1, %v4236_v56, 0 }
 0x1b3   : > { %3583 = vmatprep.subr.msk.bf16.mxu1 %vm1222_vm1, %v4238_v57  ;;  %v1242_v36 = vsel %vm1222_vm1, %v4238_v57, 0 }
 0x1b4   : > { %3402 = vmatpush3.bf16.xpose.msra.mxu1 %v1242_v36 }
 0x1b5   : > { %3584 = vmatprep.subr.msk.bf16.mxu1 %vm1222_vm1, %v4236_v56 }
 0x1bc   : > { %3404 = vmatpush3.bf16.xpose.msra.mxu1 %v1245_v58 }
 0x255   : > { %v3367_v59 = vpop.f32.mrb[0].mxu0 }
 0x256   : > { %v984_v60 = vadd.f32 %v3367_v59, %v3173_v24  ;;  %v975_v61 = vpop.f32.mrb[1].mxu0 }
 0x257   : > { %v976_v0 = vadd.f32 %v3173_v24, %v975_v61  ;;  %v3368_v1 = vpop.f32.mrb[2].mxu0 }
 0x258   : > { %v987_v2 = vadd.f32 %v3368_v1, %v3173_v24  ;;  %v978_v3 = vpop.f32.mrb[3].mxu0  ;;  %v1196_v5 = vmul.f32 0.35355338, %v984_v60 }
 0x259   : > { %v979_v4 = vadd.f32 %v3173_v24, %v978_v3  ;;  %v1194_v7 = vmul.f32 0.35355338, %v976_v0  ;;  %v4344_v0 = vld [vmem:[%s5028_s10] ss:$0 sm:$0xff] }
 0x25a   : > { %v1197_v6 = vmul.f32 0.35355338, %v987_v2 }
 0x25b   : > { %v1195_v10 = vmul.f32 0.35355338, %v979_v4 }
 0x25c   : > { %v4251_v11 = vpack.c.bf16 %v1197_v6, %v1196_v5 }
 0x25d   : > { %v4253_v12 = vpack.c.bf16 %v1195_v10, %v1194_v7  ;;  %v3371_v13 = vpop.f32.mrb[4].mxu0 }
 0x25e   : > { %v1000_v14 = vadd.f32 %v3371_v13, %v3173_v24  ;;  %v991_v44 = vpop.f32.mrb[5].mxu0 }
 0x25f   : > { %v992_v15 = vadd.f32 %v3173_v24, %v991_v44  ;;  %v3372_v16 = vpop.f32.mrb[6].mxu0  ;;  %3405 = vmatprep.mubr.msk.bf16.mxu1 %vm1222_vm1, %v4253_v12 }
 0x260   : > { %v1003_v17 = vadd.f32 %v3372_v16, %v3173_v24  ;;  %v994_v19 = vpop.f32.mrb[7].mxu0  ;;  %3406 = vmatmul.mubr.msk.bf16.vlgmr.msra.gmra.mrb[8].mxu1 %vm1222_vm1, %v4251_v11  ;;  %v1200_v22 = vmul.f32 0.35355338, %v1000_v14 }
 0x261   : > { %v995_v20 = vadd.f32 %v3173_v24, %v994_v19  ;;  %v1198_v25 = vmul.f32 0.35355338, %v992_v15 }
 0x262   : > { %v1201_v23 = vmul.f32 0.35355338, %v1003_v17 }
 0x263   : > { %v1199_v26 = vmul.f32 0.35355338, %v995_v20 }
 0x264   : > { %v4259_v52 = vpack.c.bf16 %v1201_v23, %v1200_v22 }
 0x265   : > { %v4261_v27 = vpack.c.bf16 %v1199_v26, %v1198_v25  ;;  %v3391_v61 = vpop.f32.mrb[8].mxu0 }
 0x266   : > { %v1172_v1 = vadd.f32 %v3391_v61, %v4344_v0  ;;  %v1163_v2 = vpop.f32.mrb[9].mxu0 }
 0x267   : > { %3409 = vmatprep.mubr.msk.bf16.mxu1 %vm1222_vm1, %v4261_v27  ;;  %v1164_v3 = vadd.f32 %v4344_v0, %v1163_v2  ;;  %v3392_v4 = vpop.f32.mrb[10].mxu0 }
 0x268   : > { %3410 = vmatmul.mubr.msk.bf16.gmra.mrb[12].mxu1 %vm1222_vm1, %v4259_v52  ;;  %v1175_v5 = vadd.f32 %v3392_v4, %v4344_v0  ;;  %v1166_v6 = vpop.f32.mrb[11].mxu0 }
 0x269   : > { %v1167_v7 = vadd.f32 %v4344_v0, %v1166_v6 }
 0x26a   : > { %v4350_v10 = vpack.c.bf16 %v1175_v5, %v1172_v1 }
 0x26b   : > { %v4352_v13 = vpack.c.bf16 %v1167_v7, %v1164_v3 }
 0x26d   : > { %3413 = vmatprep.subr.bf16.mxu0 %v4352_v13 }
 0x26e   : > { %3414 = vmatpush3.bf16.msra.mxu0 %v4352_v13 }
 0x26f   : > { %3415 = vmatprep.subr.bf16.mxu0 %v4350_v10 }
 0x272   : > { %3416 = vmatpush3.bf16.msra.mxu0 %v4350_v10 }
 0x333   : > { %v3407_v45 = vpop.f32.mrb[8].mxu1 }
 0x334   : > { %v1281_v32 = vpop.f32.mrb[9].mxu1  ;;  %v1290_v38 = vadd.f32 %v3407_v45, %v4287_v31 }
 0x335   : > { %v1282_v18 = vadd.f32 %v1281_v32, %v4282_v30  ;;  %v3408_v21 = vpop.f32.mrb[10].mxu1 }
 0x336   : > { %v1284_v37 = vpop.f32.mrb[11].mxu1  ;;  %v1293_v40 = vadd.f32 %v3408_v21, %v4298_v35  ;;  %v1319_v46 = vsel %vm1312_vm2, %v1290_v38, -inf }
 0x337   : > { %v1285_v53 = vadd.f32 %v1284_v37, %v4292_v39  ;;  %v1313_v62 = vsel %vm1312_vm2, %v1282_v18, -inf }
 0x338   : > { %1314 = vmax.xlane.f32.xlu0 %v1313_v62  ;;  %v1322_v50 = vsel %vm1312_vm2, %v1293_v40, -inf }
 0x339   : > { %v1316_v41 = vsel %vm1312_vm2, %v1285_v53, -inf }
 0x33a   : > { %1317 = vmax.xlane.f32.xlu1 %v1316_v41 }
 0x33b   : > { %v3411_v43 = vpop.f32.mrb[12].mxu1 }
 0x33c   : > { %1320 = vmax.xlane.f32.xlu0 %v1319_v46  ;;  %v1297_v63 = vpop.f32.mrb[13].mxu1  ;;  %v1306_v54 = vadd.f32 %v3411_v43, %v4314_v47 }
 0x33d   : > { %v1298_v48 = vadd.f32 %v1297_v63, %v4308_v42  ;;  %v3412_v49 = vpop.f32.mrb[14].mxu1 }
 0x33e   : > { %1323 = vmax.xlane.f32.xlu1 %v1322_v50  ;;  %v1300_v51 = vpop.f32.mrb[15].mxu1  ;;  %v4334_v58 = vadd.f32 %v3412_v49, %v4326_v9  ;;  %v1331_v59 = vsel %vm1312_vm2, %v1306_v54, -inf }
 0x33f   : > { %v4330_v55 = vadd.f32 %v1300_v51, %v4319_v8  ;;  %v1325_v36 = vsel %vm1312_vm2, %v1298_v48, -inf }
 0x340   : > { %1326 = vmax.xlane.f32.xlu0 %v1325_v36  ;;  %v1334_v60 = vsel %vm1312_vm2, %v4334_v58, -inf }
 0x341   : > { %v1328_v24 = vsel %vm1312_vm2, %v4330_v55, -inf }
 0x342   : > { %1329 = vmax.xlane.f32.xlu1 %v1328_v24 }
 0x344   : > { %1332 = vmax.xlane.f32.xlu0 %v1331_v59 }
 0x346   : > { %1335 = vmax.xlane.f32.xlu1 %v1334_v60 }
 0x3c5   : > { %v1315_v14 = vpop.xlane.xlu0 %1314 }
 0x3c6   : > { %v1337_v44 = vsub.f32 %v1282_v18, %v1315_v14 }
 0x3c7   : > { %v1318_v15 = vpop.xlane.xlu1 %1317 }
 0x3c8   : > { %v1338_v17 = vsub.f32 %v1285_v53, %v1318_v15  ;;  %v1345_v20 = vmul.f32 1.442695, %v1337_v44 }
 0x3c9   : > { %v1321_v16 = vpop.xlane.xlu0 %1320 }
 0x3ca   : > { %v1339_v19 = vsub.f32 %v1290_v38, %v1321_v16  ;;  %v1347_v28 = vmul.f32 1.442695, %v1338_v17 }
 0x3cb   : > { %v1324_v22 = vpop.xlane.xlu1 %1323 }
 0x3cc   : > { %v1349_v23 = vmul.f32 1.442695, %v1339_v19  ;;  %v1340_v25 = vsub.f32 %v1293_v40, %v1324_v22 }
 0x3cd   : > { %v1327_v26 = vpop.xlane.xlu0 %1326 }
 0x3ce   : > { %3678 = vpow2.f32 %v1349_v23  ;;  %v1351_v29 = vmul.f32 1.442695, %v1340_v25  ;;  %v1341_v45 = vsub.f32 %v1298_v48, %v1327_v26 }
 0x3cf   : > { %3680 = vpow2.f32 %v1345_v20  ;;  %v1330_v5 = vpop.xlane.xlu1 %1329 }
 0x3d0   : > { %3682 = vpow2.f32 %v1351_v29  ;;  %v1353_v37 = vmul.f32 1.442695, %v1341_v45  ;;  %v1342_v7 = vsub.f32 %v4330_v55, %v1330_v5 }
 0x3d1   : > { %v1333_v32 = vpop.xlane.xlu0 %1332  ;;  %3684 = vpow2.f32 %v1347_v28 }
 0x3d2   : > { %v1343_v21 = vsub.f32 %v1306_v54, %v1333_v32  ;;  %v3395_v54 = vpop.f32.mrb[12].mxu0  ;;  %v1355_v44 = vmul.f32 1.442695, %v1342_v7 }
 0x3d3   : > { %v1179_v36 = vpop.f32.mrb[13].mxu0  ;;  %v1188_v2 = vadd.f32 %v3395_v54, %v4344_v0  ;;  %v1336_v6 = vpop.xlane.xlu1 %1335 }
 0x3d4   : > { %v1357_v18 = vmul.f32 1.442695, %v1343_v21  ;;  %v3396_v24 = vpop.f32.mrb[14].mxu0  ;;  %v1180_v60 = vadd.f32 %v4344_v0, %v1179_v36 }
 0x3d5   : > { %v1182_v59 = vpop.f32.mrb[15].mxu0  ;;  %v1191_v3 = vadd.f32 %v3396_v24, %v4344_v0 }
 0x3d6   : > { %3686 = vpow2.f32 %v1357_v18  ;;  %v1183_v61 = vadd.f32 %v4344_v0, %v1182_v59  ;;  %v1344_v0 = vsub.f32 %v4334_v58, %v1336_v6 }
 0x3d7   : > { %3688 = vpow2.f32 %v1353_v37  ;;  %v4392_v4 = vpack.c.bf16 %v1191_v3, %v1188_v2 }
 0x3d8   : > { %v4358_v62 = vpop.eup %3678  ;;  %v4384_v1 = vpack.c.bf16 %v1183_v61, %v1180_v60  ;;  %v1359_v14 = vmul.f32 1.442695, %v1344_v0 }
 0x3d9   : > { %v4360_v38 = vpop.eup %3680  ;;  %v1367_v53 = vsel %vm1312_vm2, %v4358_v62, 0.0 }
 0x3da   : > { %v4364_v40 = vpop.eup %3682  ;;  %1368 = vadd.xlane.f32.xlu0 %v1367_v53  ;;  %v1361_v46 = vsel %vm1312_vm2, %v4360_v38, 0.0  ;;  %3417 = vmatprep.subr.bf16.mxu0 %v4384_v1  ;;  %3690 = vpow2.f32 %v1359_v14 }
 0x3db   : > { %v1370_v41 = vsel %vm1312_vm2, %v4364_v40, 0.0  ;;  %v4368_v43 = vpop.eup %3684  ;;  %3418 = vmatpush3.bf16.msra.mxu0 %v4384_v1  ;;  %3692 = vpow2.f32 %v1355_v44 }
 0x3dc   : > { %1371 = vadd.xlane.f32.xlu1 %v1370_v41  ;;  %v1364_v63 = vsel %vm1312_vm2, %v4368_v43, 0.0  ;;  %3419 = vmatprep.subr.bf16.mxu0 %v4392_v4 }
 0x3de   : > { %1362 = vadd.xlane.f32.xlu0 %v1361_v46 }
 0x3df   : > { %3420 = vmatpush3.bf16.msra.mxu0 %v4392_v4 }
 0x3e0   : > { %v4374_v48 = vpop.eup %3686  ;;  %1365 = vadd.xlane.f32.xlu1 %v1364_v63 }
 0x3e1   : > { %v1379_v49 = vsel %vm1312_vm2, %v4374_v48, 0.0  ;;  %v4378_v50 = vpop.eup %3688 }
 0x3e2   : > { %1380 = vadd.xlane.f32.xlu0 %v1379_v49  ;;  %v1373_v51 = vsel %vm1312_vm2, %v4378_v50, 0.0 }
 0x3e4   : > { %v3691_v15 = vpop.eup %3690 }
 0x3e5   : > { %v1382_v16 = vsel %vm1312_vm2, %v3691_v15, 0.0  ;;  %v3693_v17 = vpop.eup %3692 }
 0x3e6   : > { %1374 = vadd.xlane.f32.xlu0 %v1373_v51  ;;  %v1376_v19 = vsel %vm1312_vm2, %v3693_v17, 0.0 }
 0x3f1   : > { %1516 = vrot.lane.b32.xlu1 %v4200_v33, %s3910_s2 }
 0x3f5   : > { %1518 = vrot.lane.b32.xlu1 %v4238_v57, %s3910_s2 }
 0x3fc   : > { %1514 = vrot.lane.b32.xlu0 %v4202_v34, %s3910_s2 }
 0x400   : > { %1502 = vrot.lane.b32.xlu0 %v4253_v12, %s3910_s2 }
 0x404   : > { %1506 = vrot.lane.b32.xlu0 %v4261_v27, %s3910_s2 }
 0x419   : > { %1383 = vadd.xlane.f32.xlu1 %v1382_v16 }
 0x41d   : > { %1377 = vadd.xlane.f32.xlu1 %v1376_v19 }
 0x42e   : > { %1520 = vrot.lane.b32.xlu1 %v4236_v56, %s3910_s2 }
 0x432   : > { %1504 = vrot.lane.b32.xlu1 %v4251_v11, %s3910_s2 }
 0x436   : > { %1508 = vrot.lane.b32.xlu1 %v4259_v52, %s3910_s2 }
 0x467   : > { %v1369_v55 = vpop.xlane.xlu0 %1368 }
 0x469   : > { %v1372_v58 = vpop.xlane.xlu1 %1371 }
 0x46a   : > { %3694 = vrcp.f32 %v1372_v58 }
 0x46b   : > { %v1363_v20 = vpop.xlane.xlu0 %1362 }
 0x46c   : > { %3696 = vrcp.f32 %v1363_v20 }
 0x46d   : > { %3698 = vrcp.f32 %v1369_v55  ;;  %v1366_v22 = vpop.xlane.xlu1 %1365 }
 0x46e   : > { %3700 = vrcp.f32 %v1366_v22 }
 0x46f   : > { %v1381_v23 = vpop.xlane.xlu0 %1380 }
 0x471   : > { %v1517_v49 = vpop.permute.xlu1 %1516 }
 0x473   : > { %v1375_v25 = vpop.xlane.xlu0 %1374 }
 0x474   : > { %v3695_v26 = vpop.eup %3694 }
 0x475   : > { %v1396_v21 = vmul.f32 %v3695_v26, %v4364_v40  ;;  %v1538_v40 = vsel %vm1222_vm1, %v1517_v49, 0  ;;  %v1519_v51 = vpop.permute.xlu1 %1518 }
 0x476   : > { %v3697_v28 = vpop.eup %3696 }
 0x477   : > { %v3699_v29 = vpop.eup %3698  ;;  %v1515_v45 = vpop.permute.xlu0 %1514  ;;  %v1393_v37 = vmul.f32 %v3697_v28, %v4360_v38 }
 0x478   : > { %v3701_v32 = vpop.eup %3700  ;;  %3585 = vmatprep.subr.msk.bf16.mxu0 %vm1222_vm1, %v1515_v45  ;;  %v1395_v53 = vmul.f32 %v3699_v29, %v4358_v62  ;;  %v1535_v63 = vsel %vm1222_vm1, %v1515_v45, 0  ;;  %v1541_v62 = vsel %vm1222_vm1, %v1519_v51, 0 }
 0x479   : > { %v1394_v18 = vmul.f32 %v3701_v32, %v4368_v43 }
 0x47a   : > { %v1402_v46 = vpack.c.bf16 %v1396_v21, %v1395_v53 }
 0x47b   : > { %v1401_v41 = vpack.c.bf16 %v1394_v18, %v1393_v37  ;;  %v1503_v14 = vpop.permute.xlu0 %1502 }
 0x47d   : > { %3421 = vmatprep.mubr.msk.bf16.mxu0 %vm1312_vm2, %v1401_v41 }
 0x47e   : > { %3422 = vmatmul.mubr.msk.bf16.vlgmr.msra.gmra.mrb[16].mxu0 %vm1312_vm2, %v1402_v46 }
 0x47f   : > { %3430 = vmatpush3.bf16.xpose.msra.mxu0 %v1535_v63  ;;  %v1507_v16 = vpop.permute.xlu0 %1506 }
 0x480   : > { %3586 = vmatprep.subr.msk.bf16.mxu0 %vm1222_vm1, %v1517_v49 }
 0x487   : > { %3432 = vmatpush3.bf16.xpose.msra.mxu0 %v1538_v40 }
 0x488   : > { %3587 = vmatprep.subr.msk.bf16.mxu0 %vm1222_vm1, %v1519_v51 }
 0x48f   : > { %3434 = vmatpush3.bf16.xpose.msra.mxu0 %v1541_v62 }
 0x4a6   : > { %v1384_v38 = vpop.xlane.xlu1 %1383 }
 0x4a7   : > { %3702 = vrcp.f32 %v1384_v38 }
 0x4a8   : > { %3704 = vrcp.f32 %v1375_v25 }
 0x4a9   : > { %3706 = vrcp.f32 %v1381_v23 }
 0x4aa   : > { %v1378_v43 = vpop.xlane.xlu1 %1377 }
 0x4ab   : > { %3708 = vrcp.f32 %v1378_v43 }
 0x4ae   : > { %v1521_v54 = vpop.permute.xlu1 %1520 }
 0x4af   : > { %3588 = vmatprep.subr.msk.bf16.mxu0 %vm1222_vm1, %v1521_v54  ;;  %v1544_v36 = vsel %vm1222_vm1, %v1521_v54, 0 }
 0x4b0   : > { %3436 = vmatpush3.bf16.xpose.msra.mxu0 %v1544_v36 }
 0x4b1   : > { %v3703_v24 = vpop.eup %3702 }
 0x4b2   : > { %v3705_v59 = vpop.eup %3704  ;;  %v1400_v2 = vmul.f32 %v3703_v24, %v3691_v15  ;;  %v1505_v44 = vpop.permute.xlu1 %1504 }
 0x4b3   : > { %v3707_v60 = vpop.eup %3706  ;;  %v1397_v3 = vmul.f32 %v3705_v59, %v4378_v50 }
 0x4b4   : > { %v1399_v6 = vmul.f32 %v3707_v60, %v4374_v48 }
 0x4b5   : > { %v3709_v61 = vpop.eup %3708 }
 0x4b6   : > { %v1398_v5 = vmul.f32 %v3709_v61, %v3693_v17  ;;  %v1404_v7 = vpack.c.bf16 %v1400_v2, %v1399_v6  ;;  %v1509_v15 = vpop.permute.xlu1 %1508 }
 0x4b8   : > { %v1403_v0 = vpack.c.bf16 %v1398_v5, %v1397_v3 }
 0x4ba   : > { %3425 = vmatprep.mubr.msk.bf16.mxu0 %vm1312_vm2, %v1403_v0 }
 0x4bb   : > { %3426 = vmatmul.mubr.msk.bf16.gmra.mrb[20].mxu0 %vm1312_vm2, %v1404_v7 }
 0x4bc   : > { %3437 = vmatprep.mubr.msk.bf16.mxu0 %vm1222_vm1, %v1503_v14 }
 0x4c3   : > { %3438 = vmatmul.mubr.msk.bf16.vlgmr.msra.gmra.mrb[24].mxu0 %vm1222_vm1, %v1505_v44 }
 0x4c4   : > { %3441 = vmatprep.mubr.msk.bf16.mxu0 %vm1222_vm1, %v1507_v16 }
 0x4cb   : > { %3442 = vmatmul.mubr.msk.bf16.gmra.mrb[28].mxu0 %vm1222_vm1, %v1509_v15 }
 0x551   : > { %v3423_v50 = vpop.f32.mrb[16].mxu0 }
 0x552   : > { %1484 = vst.msk [vmem:[#allocation2 + $0x10] sm:$0xff] %vm1222_vm1, %v3423_v50  ;;  %v1451_v48 = vpop.f32.mrb[17].mxu0 }
 0x553   : > { %1482 = vst.msk [vmem:[#allocation2] sm:$0xff] %vm1222_vm1, %v1451_v48  ;;  %v3424_v17 = vpop.f32.mrb[18].mxu0 }
 0x554   : > { %1485 = vst.msk [vmem:[#allocation2 + $0x18] sm:$0xff] %vm1222_vm1, %v3424_v17  ;;  %v1454_v19 = vpop.f32.mrb[19].mxu0 }
 0x555   : > { %1483 = vst.msk [vmem:[#allocation2 + $0x8] sm:$0xff] %vm1222_vm1, %v1454_v19 }
 0x58e   : > { %v3427_v55 = vpop.f32.mrb[20].mxu0 }
 0x58f   : > { %1488 = vst.msk [vmem:[#allocation2 + $0x30] sm:$0xff] %vm1222_vm1, %v3427_v55  ;;  %v1467_v58 = vpop.f32.mrb[21].mxu0 }
 0x590   : > { %1486 = vst.msk [vmem:[#allocation2 + $0x20] sm:$0xff] %vm1222_vm1, %v1467_v58  ;;  %v3428_v20 = vpop.f32.mrb[22].mxu0 }
 0x591   : > { %1489 = vst.msk [vmem:[#allocation2 + $0x38] sm:$0xff] %vm1222_vm1, %v3428_v20  ;;  %v1470_v22 = vpop.f32.mrb[23].mxu0 }
 0x592   : > { %1487 = vst.msk [vmem:[#allocation2 + $0x28] sm:$0xff] %vm1222_vm1, %v1470_v22 }
 0x596   : > { %v3439_v23 = vpop.f32.mrb[24].mxu0 }
 0x597   : > { %v1589_v25 = vadd.f32 %v3439_v23, %v4287_v31  ;;  %v1580_v26 = vpop.f32.mrb[25].mxu0 }
 0x598   : > { %v3440_v28 = vpop.f32.mrb[26].mxu0  ;;  %v1581_v29 = vadd.f32 %v1580_v26, %v4282_v30 }
 0x599   : > { %v1583_v45 = vpop.f32.mrb[27].mxu0  ;;  %v1617_v32 = vsel %vm1312_vm2, %v1589_v25, -inf  ;;  %v1592_v18 = vadd.f32 %v3440_v28, %v4298_v35 }
 0x59a   : > { %v1584_v21 = vadd.f32 %v1583_v45, %v4292_v39  ;;  %1618 = vmax.xlane.f32.xlu0 %v1617_v32  ;;  %v1611_v53 = vsel %vm1312_vm2, %v1581_v29, -inf }
 0x59b   : > { %v1620_v51 = vsel %vm1312_vm2, %v1592_v18, -inf }
 0x59c   : > { %v1614_v37 = vsel %vm1312_vm2, %v1584_v21, -inf }
 0x59d   : > { %1615 = vmax.xlane.f32.xlu1 %v1614_v37 }
 0x59e   : > { %1612 = vmax.xlane.f32.xlu0 %v1611_v53  ;;  %v3443_v41 = vpop.f32.mrb[28].mxu0 }
 0x59f   : > { %v1596_v46 = vpop.f32.mrb[29].mxu0  ;;  %v1605_v49 = vadd.f32 %v3443_v41, %v4314_v47 }
 0x5a0   : > { %v3444_v63 = vpop.f32.mrb[30].mxu0  ;;  %v1597_v62 = vadd.f32 %v1596_v46, %v4308_v42 }
 0x5a1   : > { %v1599_v40 = vpop.f32.mrb[31].mxu0  ;;  %v1629_v38 = vsel %vm1312_vm2, %v1605_v49, -inf  ;;  %v4463_v54 = vadd.f32 %v3444_v63, %v4326_v9 }
 0x5a2   : > { %1621 = vmax.xlane.f32.xlu0 %v1620_v51  ;;  %v1623_v43 = vsel %vm1312_vm2, %v1597_v62, -inf  ;;  %v4466_v36 = vadd.f32 %v1599_v40, %v4319_v8 }
 0x5a3   : > { %v1632_v24 = vsel %vm1312_vm2, %v4463_v54, -inf }
 0x5a4   : > { %v1626_v59 = vsel %vm1312_vm2, %v4466_v36, -inf }
 0x5a6   : > { %1630 = vmax.xlane.f32.xlu0 %v1629_v38 }
 0x5aa   : > { %1624 = vmax.xlane.f32.xlu0 %v1623_v43 }
 0x5ae   : > { %1709 = vrot.lane.b32.xlu1 %v4350_v10, %s3910_s2 }
 0x5b2   : > { %1711 = vrot.lane.b32.xlu1 %v4384_v1, %s3910_s2 }
 0x5c0   : > { %1707 = vrot.lane.b32.xlu0 %v4352_v13, %s3910_s2 }
 0x5d6   : > { %1633 = vmax.xlane.f32.xlu1 %v1632_v24 }
 0x5da   : > { %1627 = vmax.xlane.f32.xlu1 %v1626_v59 }
 0x5eb   : > { %1713 = vrot.lane.b32.xlu1 %v4392_v4, %s3910_s2  ;;  %s4975_s2 = scalar_lea.sflag [#allocation6], %s5070_s0 }
 0x627   : > { %v1619_v60 = vpop.xlane.xlu0 %1618 }
 0x628   : > { %v1637_v61 = vsub.f32 %v1589_v25, %v1619_v60 }
 0x62a   : > { %v1647_v2 = vmul.f32 1.442695, %v1637_v61  ;;  %v1616_v3 = vpop.xlane.xlu1 %1615 }
 0x62b   : > { %v1613_v5 = vpop.xlane.xlu0 %1612  ;;  %v1636_v0 = vsub.f32 %v1584_v21, %v1616_v3 }
 0x62c   : > { %3710 = vpow2.f32 %v1647_v2  ;;  %v1635_v6 = vsub.f32 %v1581_v29, %v1613_v5 }
 0x62d   : > { %v1645_v16 = vmul.f32 1.442695, %v1636_v0 }
 0x62e   : > { %v1643_v7 = vmul.f32 1.442695, %v1635_v6  ;;  %v1710_v25 = vpop.permute.xlu1 %1709 }
 0x62f   : > { %v1622_v14 = vpop.xlane.xlu0 %1621 }
 0x630   : > { %3712 = vpow2.f32 %v1643_v7  ;;  %v1638_v44 = vsub.f32 %v1592_v18, %v1622_v14 }
 0x632   : > { %v1649_v15 = vmul.f32 1.442695, %v1638_v44  ;;  %v1712_v21 = vpop.permute.xlu1 %1711 }
 0x633   : > { %v1631_v50 = vpop.xlane.xlu0 %1630 }
 0x634   : > { %3714 = vpow2.f32 %v1649_v15  ;;  %v1641_v48 = vsub.f32 %v1605_v49, %v1631_v50 }
 0x635   : > { %3716 = vpow2.f32 %v1645_v16 }
 0x636   : > { %v4474_v17 = vpop.eup %3710  ;;  %v1655_v19 = vmul.f32 1.442695, %v1641_v48 }
 0x637   : > { %v1625_v55 = vpop.xlane.xlu0 %1624  ;;  %v1665_v58 = vsel %vm1312_vm2, %v4474_v17, 0.0 }
 0x638   : > { %3718 = vpow2.f32 %v1655_v19  ;;  %v1639_v20 = vsub.f32 %v1597_v62, %v1625_v55  ;;  %1666 = vadd.xlane.f32.xlu0 %v1665_v58 }
 0x63a   : > { %v4478_v22 = vpop.eup %3712  ;;  %v1651_v23 = vmul.f32 1.442695, %v1639_v20 }
 0x63b   : > { %v1708_v26 = vpop.permute.xlu0 %1707  ;;  %v1659_v28 = vsel %vm1312_vm2, %v4478_v22, 0.0 }
 0x63c   : > { %3720 = vpow2.f32 %v1651_v23  ;;  %1660 = vadd.xlane.f32.xlu0 %v1659_v28  ;;  %3445 = vmatprep.subr.bf16.mxu1 %v1708_v26 }
 0x63d   : > { %3446 = vmatpush3.bf16.msra.mxu1 %v1708_v26 }
 0x63e   : > { %v3715_v29 = vpop.eup %3714  ;;  %3447 = vmatprep.subr.bf16.mxu1 %v1710_v25 }
 0x63f   : > { %v1668_v45 = vsel %vm1312_vm2, %v3715_v29, 0.0  ;;  %v3717_v32 = vpop.eup %3716 }
 0x640   : > { %1669 = vadd.xlane.f32.xlu1 %v1668_v45  ;;  %v1662_v18 = vsel %vm1312_vm2, %v3717_v32, 0.0 }
 0x641   : > { %3448 = vmatpush3.bf16.msra.mxu1 %v1710_v25 }
 0x642   : > { %v4483_v37 = vpop.eup %3718  ;;  %3449 = vmatprep.subr.bf16.mxu1 %v1712_v21 }
 0x643   : > { %v1677_v53 = vsel %vm1312_vm2, %v4483_v37, 0.0 }
 0x644   : > { %1663 = vadd.xlane.f32.xlu1 %v1662_v18  ;;  %1678 = vadd.xlane.f32.xlu0 %v1677_v53 }
 0x645   : > { %3450 = vmatpush3.bf16.msra.mxu1 %v1712_v21 }
 0x646   : > { %v4488_v41 = vpop.eup %3720 }
 0x647   : > { %v1671_v46 = vsel %vm1312_vm2, %v4488_v41, 0.0 }
 0x648   : > { %1672 = vadd.xlane.f32.xlu0 %v1671_v46 }
 0x655   : > { %1855 = vrot.lane.b32.xlu1 %v4200_v33, %s3911_s1 }
 0x659   : > { %1857 = vrot.lane.b32.xlu1 %v4238_v57, %s3911_s1 }
 0x663   : > { %v1634_v63 = vpop.xlane.xlu1 %1633 }
 0x664   : > { %v1642_v49 = vsub.f32 %v4463_v54, %v1634_v63 }
 0x666   : > { %v1657_v40 = vmul.f32 1.442695, %v1642_v49 }
 0x667   : > { %v1628_v51 = vpop.xlane.xlu1 %1627 }
 0x668   : > { %3722 = vpow2.f32 %v1657_v40  ;;  %v1640_v62 = vsub.f32 %v4466_v36, %v1628_v51 }
 0x66a   : > { %v1653_v38 = vmul.f32 1.442695, %v1640_v62 }
 0x66b   : > { %v1714_v43 = vpop.permute.xlu1 %1713 }
 0x66c   : > { %3451 = vmatprep.subr.bf16.mxu1 %v1714_v43  ;;  %3724 = vpow2.f32 %v1653_v38 }
 0x66d   : > { %3452 = vmatpush3.bf16.msra.mxu1 %v1714_v43 }
 0x672   : > { %v3723_v24 = vpop.eup %3722 }
 0x673   : > { %v1680_v59 = vsel %vm1312_vm2, %v3723_v24, 0.0 }
 0x674   : > { %1681 = vadd.xlane.f32.xlu0 %v1680_v59 }
 0x676   : > { %v3725_v60 = vpop.eup %3724 }
 0x677   : > { %v1674_v61 = vsel %vm1312_vm2, %v3725_v60, 0.0 }
 0x67d   : > { %1675 = vadd.xlane.f32.xlu1 %v1674_v61 }
 0x68a   : > { %1853 = vrot.lane.b32.xlu0 %v4202_v34, %s3911_s1 }
 0x68e   : > { %1859 = vrot.lane.b32.xlu1 %v4236_v56, %s3911_s1  ;;  %1845 = vrot.lane.b32.xlu0 %v4253_v12, %s3911_s1 }
 0x692   : > { %1847 = vrot.lane.b32.xlu1 %v4251_v11, %s3911_s1  ;;  %1849 = vrot.lane.b32.xlu0 %v4261_v27, %s3911_s1 }
 0x696   : > { %1851 = vrot.lane.b32.xlu1 %v4259_v52, %s3911_s1 }
 0x6c5   : > { %v1667_v54 = vpop.xlane.xlu0 %1666 }
 0x6c9   : > { %v1661_v36 = vpop.xlane.xlu0 %1660 }
 0x6cd   : > { %v1670_v2 = vpop.xlane.xlu1 %1669 }
 0x6ce   : > { %3726 = vrcp.f32 %v1670_v2 }
 0x6cf   : > { %3728 = vrcp.f32 %v1661_v36 }
 0x6d0   : > { %3730 = vrcp.f32 %v1667_v54 }
 0x6d1   : > { %v1664_v3 = vpop.xlane.xlu1 %1663  ;;  %v1679_v19 = vpop.xlane.xlu0 %1678 }
 0x6d2   : > { %3732 = vrcp.f32 %v1664_v3 }
 0x6d5   : > { %v1673_v55 = vpop.xlane.xlu0 %1672  ;;  %v1856_v58 = vpop.permute.xlu1 %1855 }
 0x6d8   : > { %v3727_v5 = vpop.eup %3726 }
 0x6d9   : > { %v3729_v6 = vpop.eup %3728  ;;  %v1694_v14 = vmul.f32 %v3727_v5, %v3715_v29  ;;  %v1858_v25 = vpop.permute.xlu1 %1857 }
 0x6da   : > { %v3731_v0 = vpop.eup %3730  ;;  %v1691_v44 = vmul.f32 %v3729_v6, %v4478_v22  ;;  %v1877_v22 = vsel %vm1222_vm1, %v1856_v58, 0  ;;  %v1880_v18 = vsel %vm1222_vm1, %v1858_v25, 0 }
 0x6db   : > { %v1693_v15 = vmul.f32 %v3731_v0, %v4474_v17 }
 0x6dc   : > { %v3733_v7 = vpop.eup %3732 }
 0x6dd   : > { %v1692_v16 = vmul.f32 %v3733_v7, %v3717_v32  ;;  %v1700_v48 = vpack.c.bf16 %v1694_v14, %v1693_v15 }
 0x6df   : > { %v1699_v50 = vpack.c.bf16 %v1692_v16, %v1691_v44 }
 0x6e1   : > { %3453 = vmatprep.mubr.msk.bf16.mxu1 %vm1312_vm2, %v1699_v50 }
 0x6e2   : > { %3454 = vmatmul.mubr.msk.bf16.vlgmr.msra.gmra.mrb[16].mxu1 %vm1312_vm2, %v1700_v48 }
 0x701   : > { %v1682_v20 = vpop.xlane.xlu0 %1681 }
 0x702   : > { %3734 = vrcp.f32 %v1682_v20 }
 0x703   : > { %3736 = vrcp.f32 %v1673_v55 }
 0x704   : > { %3738 = vrcp.f32 %v1679_v19 }
 0x705   : > { %v1854_v23 = vpop.permute.xlu0 %1853 }
 0x706   : > { %v1874_v26 = vsel %vm1222_vm1, %v1854_v23, 0  ;;  %3589 = vmatprep.subr.msk.bf16.mxu1 %vm1222_vm1, %v1854_v23 }
 0x707   : > { %3462 = vmatpush3.bf16.xpose.msra.mxu1 %v1874_v26 }
 0x708   : > { %3590 = vmatprep.subr.msk.bf16.mxu1 %vm1222_vm1, %v1856_v58 }
 0x709   : > { %v1846_v62 = vpop.permute.xlu0 %1845 }
 0x70a   : > { %v1676_v17 = vpop.xlane.xlu1 %1675 }
 0x70b   : > { %3740 = vrcp.f32 %v1676_v17 }
 0x70c   : > { %v3735_v28 = vpop.eup %3734 }
 0x70d   : > { %v3737_v29 = vpop.eup %3736  ;;  %v1698_v21 = vmul.f32 %v3735_v28, %v3723_v24  ;;  %v1850_v43 = vpop.permute.xlu0 %1849 }
 0x70e   : > { %v3739_v45 = vpop.eup %3738  ;;  %v1695_v53 = vmul.f32 %v3737_v29, %v4488_v41  ;;  %v1860_v63 = vpop.permute.xlu1 %1859 }
 0x70f   : > { %3464 = vmatpush3.bf16.xpose.msra.mxu1 %v1877_v22  ;;  %v1697_v49 = vmul.f32 %v3739_v45, %v4483_v37  ;;  %v1883_v38 = vsel %vm1222_vm1, %v1860_v63, 0 }
 0x710   : > { %3591 = vmatprep.subr.msk.bf16.mxu1 %vm1222_vm1, %v1858_v25 }
 0x711   : > { %v1702_v51 = vpack.c.bf16 %v1698_v21, %v1697_v49 }
 0x712   : > { %v1848_v41 = vpop.permute.xlu1 %1847 }
 0x715   : > { %v3741_v32 = vpop.eup %3740 }
 0x716   : > { %v1696_v46 = vmul.f32 %v3741_v32, %v3725_v60  ;;  %v1852_v37 = vpop.permute.xlu1 %1851 }
 0x717   : > { %3466 = vmatpush3.bf16.xpose.msra.mxu1 %v1880_v18 }
 0x718   : > { %3592 = vmatprep.subr.msk.bf16.mxu1 %vm1222_vm1, %v1860_v63  ;;  %v1701_v40 = vpack.c.bf16 %v1696_v46, %v1695_v53 }
 0x71a   : > { %3457 = vmatprep.mubr.msk.bf16.mxu1 %vm1312_vm2, %v1701_v40 }
 0x71b   : > { %3458 = vmatmul.mubr.msk.bf16.gmra.mrb[20].mxu1 %vm1312_vm2, %v1702_v51 }
 0x71c   : > { %3469 = vmatprep.mubr.msk.bf16.mxu1 %vm1222_vm1, %v1846_v62 }
 0x71f   : > { %3468 = vmatpush3.bf16.xpose.msra.mxu1 %v1883_v38 }
 0x726   : > { %3470 = vmatmul.mubr.msk.bf16.vlgmr.msra.gmra.mrb[24].mxu1 %vm1222_vm1, %v1848_v41 }
 0x727   : > { %3473 = vmatprep.mubr.msk.bf16.mxu1 %vm1222_vm1, %v1850_v43 }
 0x72e   : > { %3474 = vmatmul.mubr.msk.bf16.gmra.mrb[28].mxu1 %vm1222_vm1, %v1852_v37 }
 0x7b5   : > { %v4532_v24 = vpop.f32.mrb[16].mxu1 }
 0x7b6   : > { %v4534_v59 = vpop.f32.mrb[17].mxu1 }
 0x7b7   : > { %v4536_v60 = vpop.f32.mrb[18].mxu1 }
 0x7b8   : > { %v4538_v61 = vpop.f32.mrb[19].mxu1 }
 0x7ee   : > { %v4540_v54 = vpop.f32.mrb[20].mxu1 }
 0x7ef   : > { %v4542_v36 = vpop.f32.mrb[21].mxu1 }
 0x7f0   : > { %v4544_v2 = vpop.f32.mrb[22].mxu1 }
 0x7f1   : > { %v4546_v3 = vpop.f32.mrb[23].mxu1 }
 0x7f9   : > { %v3471_v5 = vpop.f32.mrb[24].mxu1 }
 0x7fa   : > { %v1928_v6 = vadd.f32 %v3471_v5, %v4287_v31  ;;  %v1919_v0 = vpop.f32.mrb[25].mxu1 }
 0x7fb   : > { %v3472_v7 = vpop.f32.mrb[26].mxu1  ;;  %v1920_v14 = vadd.f32 %v1919_v0, %v4282_v30 }
 0x7fc   : > { %v1922_v44 = vpop.f32.mrb[27].mxu1  ;;  %v1956_v16 = vsel %vm1312_vm2, %v1928_v6, -inf  ;;  %v1931_v48 = vadd.f32 %v3472_v7, %v4298_v35 }
 0x7fd   : > { %v1923_v15 = vadd.f32 %v1922_v44, %v4292_v39  ;;  %1957 = vmax.xlane.f32.xlu0 %v1956_v16  ;;  %v1950_v19 = vsel %vm1312_vm2, %v1920_v14, -inf }
 0x7fe   : > { %v1959_v23 = vsel %vm1312_vm2, %v1931_v48, -inf }
 0x7ff   : > { %v1953_v50 = vsel %vm1312_vm2, %v1923_v15, -inf }
 0x800   : > { %1954 = vmax.xlane.f32.xlu1 %v1953_v50 }
 0x801   : > { %1951 = vmax.xlane.f32.xlu0 %v1950_v19  ;;  %v3475_v55 = vpop.f32.mrb[28].mxu1 }
 0x802   : > { %v1935_v31 = vpop.f32.mrb[29].mxu1  ;;  %v1944_v20 = vadd.f32 %v3475_v55, %v4314_v47 }
 0x803   : > { %v3476_v58 = vpop.f32.mrb[30].mxu1  ;;  %v1936_v39 = vadd.f32 %v1935_v31, %v4308_v42 }
 0x804   : > { %v1938_v30 = vpop.f32.mrb[31].mxu1  ;;  %v1968_v25 = vsel %vm1312_vm2, %v1944_v20, -inf  ;;  %v4567_v47 = vadd.f32 %v3476_v58, %v4326_v9 }
 0x805   : > { %1960 = vmax.xlane.f32.xlu0 %v1959_v23  ;;  %v1962_v35 = vsel %vm1312_vm2, %v1936_v39, -inf  ;;  %v4570_v42 = vadd.f32 %v1938_v30, %v4319_v8 }
 0x806   : > { %v1971_v26 = vsel %vm1312_vm2, %v4567_v47, -inf }
 0x807   : > { %v1965_v17 = vsel %vm1312_vm2, %v4570_v42, -inf }
 0x809   : > { %1969 = vmax.xlane.f32.xlu0 %v1968_v25 }
 0x80d   : > { %1963 = vmax.xlane.f32.xlu0 %v1962_v35 }
 0x811   : > { %2044 = vrot.lane.b32.xlu1 %v4350_v10, %s3911_s1 }
 0x815   : > { %2046 = vrot.lane.b32.xlu1 %v4384_v1, %s3911_s1 }
 0x823   : > { %2042 = vrot.lane.b32.xlu0 %v4352_v13, %s3911_s1 }
 0x839   : > { %1972 = vmax.xlane.f32.xlu1 %v1971_v26 }
 0x83d   : > { %1966 = vmax.xlane.f32.xlu1 %v1965_v17 }
 0x84e   : > { %2048 = vrot.lane.b32.xlu1 %v4392_v4, %s3911_s1  ;;  %s744_s1 = scalar_lea.vmem [#allocation5], %s4091_s25  ;;  %s5069_s25 = sadd.s32 4294967295, %s3908_s21  }
 0x88a   : > { %v1958_v22 = vpop.xlane.xlu0 %1957 }
 0x88b   : > { %v1976_v28 = vsub.f32 %v1928_v6, %v1958_v22 }
 0x88d   : > { %v1986_v29 = vmul.f32 1.442695, %v1976_v28  ;;  %v1955_v45 = vpop.xlane.xlu1 %1954 }
 0x88e   : > { %v1952_v9 = vpop.xlane.xlu0 %1951  ;;  %v1975_v8 = vsub.f32 %v1923_v15, %v1955_v45 }
 0x88f   : > { %3742 = vpow2.f32 %v1986_v29  ;;  %v1974_v32 = vsub.f32 %v1920_v14, %v1952_v9 }
 0x890   : > { %v1984_v46 = vmul.f32 1.442695, %v1975_v8 }
 0x891   : > { %v1982_v21 = vmul.f32 1.442695, %v1974_v32  ;;  %v2045_v6 = vpop.permute.xlu1 %2044 }
 0x892   : > { %v1961_v18 = vpop.xlane.xlu0 %1960 }
 0x893   : > { %3744 = vpow2.f32 %v1982_v21  ;;  %v1977_v53 = vsub.f32 %v1931_v48, %v1961_v18 }
 0x895   : > { %v1988_v63 = vmul.f32 1.442695, %v1977_v53  ;;  %v2047_v15 = vpop.permute.xlu1 %2046 }
 0x896   : > { %v1970_v49 = vpop.xlane.xlu0 %1969 }
 0x897   : > { %3746 = vpow2.f32 %v1988_v63  ;;  %v1980_v40 = vsub.f32 %v1944_v20, %v1970_v49 }
 0x898   : > { %3748 = vpow2.f32 %v1984_v46 }
 0x899   : > { %v4578_v51 = vpop.eup %3742  ;;  %v1994_v62 = vmul.f32 1.442695, %v1980_v40 }
 0x89a   : > { %v1964_v38 = vpop.xlane.xlu0 %1963  ;;  %v2004_v41 = vsel %vm1312_vm2, %v4578_v51, 0.0 }
 0x89b   : > { %3750 = vpow2.f32 %v1994_v62  ;;  %v1978_v43 = vsub.f32 %v1936_v39, %v1964_v38  ;;  %2005 = vadd.xlane.f32.xlu0 %v2004_v41 }
 0x89d   : > { %v4582_v37 = vpop.eup %3744  ;;  %v1990_v5 = vmul.f32 1.442695, %v1978_v43 }
 0x89e   : > { %v2043_v0 = vpop.permute.xlu0 %2042  ;;  %v1998_v7 = vsel %vm1312_vm2, %v4582_v37, 0.0 }
 0x89f   : > { %3752 = vpow2.f32 %v1990_v5  ;;  %1999 = vadd.xlane.f32.xlu0 %v1998_v7  ;;  %3477 = vmatprep.subr.bf16.mxu0 %v2043_v0 }
 0x8a0   : > { %3478 = vmatpush3.bf16.msra.mxu0 %v2043_v0 }
 0x8a1   : > { %v3747_v14 = vpop.eup %3746  ;;  %3479 = vmatprep.subr.bf16.mxu0 %v2045_v6 }
 0x8a2   : > { %v2007_v44 = vsel %vm1312_vm2, %v3747_v14, 0.0  ;;  %v3749_v16 = vpop.eup %3748 }
 0x8a3   : > { %2008 = vadd.xlane.f32.xlu1 %v2007_v44  ;;  %v2001_v48 = vsel %vm1312_vm2, %v3749_v16, 0.0 }
 0x8a4   : > { %3480 = vmatpush3.bf16.msra.mxu0 %v2045_v6 }
 0x8a5   : > { %v4587_v50 = vpop.eup %3750  ;;  %3481 = vmatprep.subr.bf16.mxu0 %v2047_v15 }
 0x8a6   : > { %v2016_v19 = vsel %vm1312_vm2, %v4587_v50, 0.0 }
 0x8a7   : > { %2002 = vadd.xlane.f32.xlu1 %v2001_v48  ;;  %2017 = vadd.xlane.f32.xlu0 %v2016_v19 }
 0x8a8   : > { %3482 = vmatpush3.bf16.msra.mxu0 %v2047_v15 }
 0x8a9   : > { %v4592_v55 = vpop.eup %3752 }
 0x8aa   : > { %v2010_v31 = vsel %vm1312_vm2, %v4592_v55, 0.0 }
 0x8ab   : > { %2011 = vadd.xlane.f32.xlu0 %v2010_v31 }
 0x8b8   : > { %2190 = vrot.lane.b32.xlu1 %v4200_v33, %s5045_s28 }
 0x8bc   : > { %2192 = vrot.lane.b32.xlu1 %v4238_v57, %s5045_s28 }
 0x8c6   : > { %v1973_v58 = vpop.xlane.xlu1 %1972 }
 0x8c7   : > { %v1981_v20 = vsub.f32 %v4567_v47, %v1973_v58 }
 0x8c9   : > { %v1996_v30 = vmul.f32 1.442695, %v1981_v20 }
 0x8ca   : > { %v1967_v23 = vpop.xlane.xlu1 %1966 }
 0x8cb   : > { %3754 = vpow2.f32 %v1996_v30  ;;  %v1979_v39 = vsub.f32 %v4570_v42, %v1967_v23 }
 0x8cd   : > { %v1992_v25 = vmul.f32 1.442695, %v1979_v39 }
 0x8ce   : > { %v2049_v35 = vpop.permute.xlu1 %2048 }
 0x8cf   : > { %3483 = vmatprep.subr.bf16.mxu0 %v2049_v35  ;;  %3756 = vpow2.f32 %v1992_v25 }
 0x8d0   : > { %3484 = vmatpush3.bf16.msra.mxu0 %v2049_v35 }
 0x8d5   : > { %v3755_v26 = vpop.eup %3754 }
 0x8d6   : > { %v2019_v17 = vsel %vm1312_vm2, %v3755_v26, 0.0 }
 0x8d7   : > { %2020 = vadd.xlane.f32.xlu0 %v2019_v17 }
 0x8d9   : > { %v3757_v33 = vpop.eup %3756 }
 0x8da   : > { %v2013_v57 = vsel %vm1312_vm2, %v3757_v33, 0.0 }
 0x8e0   : > { %2014 = vadd.xlane.f32.xlu1 %v2013_v57 }
 0x8ed   : > { %2188 = vrot.lane.b32.xlu0 %v4202_v34, %s5045_s28 }
 0x8f1   : > { %2194 = vrot.lane.b32.xlu1 %v4236_v56, %s5045_s28  ;;  %2180 = vrot.lane.b32.xlu0 %v4253_v12, %s5045_s28 }
 0x8f5   : > { %2182 = vrot.lane.b32.xlu1 %v4251_v11, %s5045_s28  ;;  %2184 = vrot.lane.b32.xlu0 %v4261_v27, %s5045_s28 }
 0x8f9   : > { %2186 = vrot.lane.b32.xlu1 %v4259_v52, %s5045_s28  ;;  %s5068_s28 = smov 104  }
 0x928   : > { %v2006_v47 = vpop.xlane.xlu0 %2005 }
 0x92c   : > { %v2000_v42 = vpop.xlane.xlu0 %1999 }
 0x930   : > { %v2009_v22 = vpop.xlane.xlu1 %2008 }
 0x931   : > { %3758 = vrcp.f32 %v2009_v22 }
 0x932   : > { %3760 = vrcp.f32 %v2000_v42 }
 0x933   : > { %3762 = vrcp.f32 %v2006_v47  ;;  %v2173_v47 = vld [vmem:[%s5067_s27 + $0x8] sm:$0xff] }
 0x934   : > { %v2003_v34 = vpop.xlane.xlu1 %2002  ;;  %v2018_v8 = vpop.xlane.xlu0 %2017 }
 0x935   : > { %3764 = vrcp.f32 %v2003_v34 }
 0x938   : > { %v2012_v21 = vpop.xlane.xlu0 %2011  ;;  %v2191_v18 = vpop.permute.xlu1 %2190 }
 0x93b   : > { %v3759_v56 = vpop.eup %3758 }
 0x93c   : > { %v3761_v28 = vpop.eup %3760  ;;  %v2033_v45 = vmul.f32 %v3759_v56, %v3747_v14  ;;  %v2193_v63 = vpop.permute.xlu1 %2192 }
 0x93d   : > { %v3763_v12 = vpop.eup %3762  ;;  %v2030_v11 = vmul.f32 %v3761_v28, %v4582_v37  ;;  %v2215_v5 = vsel %vm1222_vm1, %v2193_v63, 0 }
 0x93e   : > { %v2032_v27 = vmul.f32 %v3763_v12, %v4578_v51  ;;  %v2212_v51 = vsel %vm1222_vm1, %v2191_v18, 0 }
 0x93f   : > { %v3765_v29 = vpop.eup %3764 }
 0x940   : > { %v2031_v9 = vmul.f32 %v3765_v29, %v3749_v16  ;;  %v2039_v52 = vpack.c.bf16 %v2033_v45, %v2032_v27  ;;  %v2175_v29 = vld [vmem:[%s5067_s27 + $0x18] sm:$0xff] }
 0x942   : > { %v2038_v32 = vpack.c.bf16 %v2031_v9, %v2030_v11 }
 0x944   : > { %3485 = vmatprep.mubr.msk.bf16.mxu0 %vm1312_vm2, %v2038_v32 }
 0x945   : > { %3486 = vmatmul.mubr.msk.bf16.vlgmr.msra.gmra.mrb[32].mxu0 %vm1312_vm2, %v2039_v52  ;;  %v2176_v52 = vld [vmem:[%s5067_s27 + $0x20] sm:$0xff] }
 0x964   : > { %v2021_v53 = vpop.xlane.xlu0 %2020 }
 0x965   : > { %3766 = vrcp.f32 %v2021_v53 }
 0x966   : > { %3768 = vrcp.f32 %v2012_v21 }
 0x967   : > { %3770 = vrcp.f32 %v2018_v8  ;;  %v2177_v8 = vld [vmem:[%s5067_s27 + $0x28] sm:$0xff] }
 0x968   : > { %v2189_v46 = vpop.permute.xlu0 %2188 }
 0x969   : > { %v2209_v49 = vsel %vm1222_vm1, %v2189_v46, 0  ;;  %3593 = vmatprep.subr.msk.bf16.mxu0 %vm1222_vm1, %v2189_v46 }
 0x96a   : > { %3494 = vmatpush3.bf16.xpose.msra.mxu0 %v2209_v49 }
 0x96b   : > { %3594 = vmatprep.subr.msk.bf16.mxu0 %vm1222_vm1, %v2191_v18  ;;  %v2179_v18 = vld [vmem:[%s5067_s27 + $0x38] sm:$0xff] }
 0x96c   : > { %v2181_v15 = vpop.permute.xlu0 %2180 }
 0x96d   : > { %v2015_v40 = vpop.xlane.xlu1 %2014 }
 0x96e   : > { %3772 = vrcp.f32 %v2015_v40  ;;  %v2178_v40 = vld [vmem:[%s5067_s27 + $0x30] sm:$0xff] }
 0x96f   : > { %v3767_v62 = vpop.eup %3766 }
 0x970   : > { %v3769_v38 = vpop.eup %3768  ;;  %v2037_v37 = vmul.f32 %v3767_v62, %v3755_v26  ;;  %v2172_v26 = vld [vmem:[%s5067_s27] sm:$0xff] }
 0x971   : > { %v3771_v41 = vpop.eup %3770  ;;  %v2034_v6 = vmul.f32 %v3769_v38, %v4592_v55  ;;  %v2195_v7 = vpop.permute.xlu1 %2194 }
 0x972   : > { %3496 = vmatpush3.bf16.xpose.msra.mxu0 %v2212_v51  ;;  %v2036_v14 = vmul.f32 %v3771_v41, %v4587_v50  ;;  %v2218_v48 = vsel %vm1222_vm1, %v2195_v7, 0  ;;  %v2185_v55 = vpop.permute.xlu0 %2184 }
 0x973   : > { %3595 = vmatprep.subr.msk.bf16.mxu0 %vm1222_vm1, %v2193_v63 }
 0x974   : > { %v2041_v16 = vpack.c.bf16 %v2037_v37, %v2036_v14 }
 0x975   : > { %v2183_v19 = vpop.permute.xlu1 %2182 }
 0x978   : > { %v3773_v43 = vpop.eup %3772 }
 0x979   : > { %v2035_v0 = vmul.f32 %v3773_v43, %v3757_v33  ;;  %v2187_v50 = vpop.permute.xlu1 %2186  ;;  %v2174_v33 = vld [vmem:[%s5067_s27 + $0x10] sm:$0xff] }
 0x97a   : > { %3498 = vmatpush3.bf16.xpose.msra.mxu0 %v2215_v5 }
 0x97b   : > { %3596 = vmatprep.subr.msk.bf16.mxu0 %vm1222_vm1, %v2195_v7  ;;  %v2040_v44 = vpack.c.bf16 %v2035_v0, %v2034_v6 }
 0x97d   : > { %3489 = vmatprep.mubr.msk.bf16.mxu0 %vm1312_vm2, %v2040_v44 }
 0x97e   : > { %3490 = vmatmul.mubr.msk.bf16.gmra.mrb[36].mxu0 %vm1312_vm2, %v2041_v16 }
 0x97f   : > { %3501 = vmatprep.mubr.msk.bf16.mxu0 %vm1222_vm1, %v2181_v15 }
 0x982   : > { %3500 = vmatpush3.bf16.xpose.msra.mxu0 %v2218_v48 }
 0x989   : > { %3502 = vmatmul.mubr.msk.bf16.vlgmr.msra.gmra.mrb[40].mxu0 %vm1222_vm1, %v2183_v19 }
 0x98a   : > { %3505 = vmatprep.mubr.msk.bf16.mxu0 %vm1222_vm1, %v2185_v55 }
 0x991   : > { %3506 = vmatmul.mubr.msk.bf16.gmra.mrb[44].mxu0 %vm1222_vm1, %v2187_v50 }
 0xa18   : > { %v4636_v31 = vpop.f32.mrb[32].mxu0 }
 0xa19   : > { %v4638_v58 = vpop.f32.mrb[33].mxu0 }
 0xa1a   : > { %v4640_v20 = vpop.f32.mrb[34].mxu0 }
 0xa1b   : > { %v4642_v30 = vpop.f32.mrb[35].mxu0 }
 0xa51   : > { %v4644_v23 = vpop.f32.mrb[36].mxu0 }
 0xa52   : > { %v4646_v39 = vpop.f32.mrb[37].mxu0 }
 0xa53   : > { %v4648_v25 = vpop.f32.mrb[38].mxu0 }
 0xa54   : > { %v4650_v35 = vpop.f32.mrb[39].mxu0 }
 0xa5c   : > { %v3503_v17 = vpop.f32.mrb[40].mxu0 }
 0xa5d   : > { %v2254_v57 = vpop.f32.mrb[41].mxu0  ;;  %v2263_v56 = vadd.f32 %v3503_v17, %v2174_v33 }
 0xa5e   : > { %v2255_v42 = vadd.f32 %v2254_v57, %v2172_v26  ;;  %v3504_v22 = vpop.f32.mrb[42].mxu0 }
 0xa5f   : > { %v2257_v34 = vpop.f32.mrb[43].mxu0  ;;  %v2266_v11 = vadd.f32 %v3504_v22, %v2175_v29  ;;  %v2291_v27 = vsel %vm1312_vm2, %v2263_v56, -inf }
 0xa60   : > { %v2258_v28 = vadd.f32 %v2257_v34, %v2173_v47  ;;  %v2285_v12 = vsel %vm1312_vm2, %v2255_v42, -inf }
 0xa61   : > { %2286 = vmax.xlane.f32.xlu0 %v2285_v12  ;;  %v2294_v49 = vsel %vm1312_vm2, %v2266_v11, -inf }
 0xa62   : > { %v2288_v45 = vsel %vm1312_vm2, %v2258_v28, -inf }
 0xa63   : > { %2289 = vmax.xlane.f32.xlu1 %v2288_v45 }
 0xa64   : > { %v3507_v9 = vpop.f32.mrb[44].mxu0 }
 0xa65   : > { %2292 = vmax.xlane.f32.xlu0 %v2291_v27  ;;  %v2270_v32 = vpop.f32.mrb[45].mxu0  ;;  %v2279_v38 = vadd.f32 %v3507_v9, %v2178_v40 }
 0xa66   : > { %v3508_v21 = vpop.f32.mrb[46].mxu0  ;;  %v2271_v46 = vadd.f32 %v2270_v32, %v2176_v52 }
 0xa67   : > { %v2273_v53 = vpop.f32.mrb[47].mxu0  ;;  %v2282_v51 = vadd.f32 %v3508_v21, %v2179_v18  ;;  %v2303_v37 = vsel %vm1312_vm2, %v2279_v38, -inf }
 0xa68   : > { %v4676_v63 = vadd.f32 %v2273_v53, %v2177_v8  ;;  %v2297_v41 = vsel %vm1312_vm2, %v2271_v46, -inf }
 0xa69   : > { %2295 = vmax.xlane.f32.xlu0 %v2294_v49  ;;  %v2306_v43 = vsel %vm1312_vm2, %v2282_v51, -inf }
 0xa6a   : > { %v2300_v62 = vsel %vm1312_vm2, %v4676_v63, -inf }
 0xa6b   : > { %2301 = vmax.xlane.f32.xlu1 %v2300_v62 }
 0xa6d   : > { %2298 = vmax.xlane.f32.xlu0 %v2297_v41 }
 0xa6f   : > { %2307 = vmax.xlane.f32.xlu1 %v2306_v43 }
 0xa71   : > { %2304 = vmax.xlane.f32.xlu0 %v2303_v37 }
 0xaee   : > { %v2287_v5 = vpop.xlane.xlu0 %2286 }
 0xaef   : > { %v2309_v6 = vsub.f32 %v2255_v42, %v2287_v5 }
 0xaf0   : > { %v2290_v0 = vpop.xlane.xlu1 %2289 }
 0xaf1   : > { %v2317_v44 = vmul.f32 1.442695, %v2309_v6  ;;  %v2310_v16 = vsub.f32 %v2258_v28, %v2290_v0 }
 0xaf2   : > { %v2293_v7 = vpop.xlane.xlu0 %2292 }
 0xaf3   : > { %v2311_v14 = vsub.f32 %v2263_v56, %v2293_v7  ;;  %v2319_v55 = vmul.f32 1.442695, %v2310_v16 }
 0xaf5   : > { %v2321_v15 = vmul.f32 1.442695, %v2311_v14 }
 0xaf6   : > { %v2296_v48 = vpop.xlane.xlu0 %2295 }
 0xaf7   : > { %3774 = vpow2.f32 %v2321_v15  ;;  %v2312_v19 = vsub.f32 %v2266_v11, %v2296_v48 }
 0xaf8   : > { %3776 = vpow2.f32 %v2317_v44  ;;  %v2302_v8 = vpop.xlane.xlu1 %2301 }
 0xaf9   : > { %v2323_v50 = vmul.f32 1.442695, %v2312_v19  ;;  %v2314_v53 = vsub.f32 %v4676_v63, %v2302_v8 }
 0xafa   : > { %v2299_v26 = vpop.xlane.xlu0 %2298 }
 0xafb   : > { %3778 = vpow2.f32 %v2323_v50  ;;  %v2313_v17 = vsub.f32 %v2271_v46, %v2299_v26 }
 0xafc   : > { %3780 = vpow2.f32 %v2319_v55  ;;  %v2308_v21 = vpop.xlane.xlu1 %2307 }
 0xafd   : > { %v2325_v42 = vmul.f32 1.442695, %v2313_v17  ;;  %v2316_v18 = vsub.f32 %v2282_v51, %v2308_v21 }
 0xafe   : > { %v2305_v33 = vpop.xlane.xlu0 %2304 }
 0xaff   : > { %v2315_v57 = vsub.f32 %v2279_v38, %v2305_v33  ;;  %v2331_v46 = vmul.f32 1.442695, %v2316_v18 }
 0xb01   : > { %v4687_v47 = vpop.eup %3774  ;;  %v2329_v22 = vmul.f32 1.442695, %v2315_v57 }
 0xb02   : > { %v2339_v34 = vsel %vm1312_vm2, %v4687_v47, 0.0  ;;  %v4691_v56 = vpop.eup %3776 }
 0xb03   : > { %3782 = vpow2.f32 %v2329_v22  ;;  %2340 = vadd.xlane.f32.xlu0 %v2339_v34  ;;  %v2333_v12 = vsel %vm1312_vm2, %v4691_v56, 0.0 }
 0xb04   : > { %3784 = vpow2.f32 %v2325_v42 }
 0xb05   : > { %v4693_v28 = vpop.eup %3778  ;;  %3786 = vpow2.f32 %v2331_v46 }
 0xb06   : > { %v2342_v29 = vsel %vm1312_vm2, %v4693_v28, 0.0  ;;  %v3781_v45 = vpop.eup %3780 }
 0xb07   : > { %2334 = vadd.xlane.f32.xlu0 %v2333_v12  ;;  %2343 = vadd.xlane.f32.xlu1 %v2342_v29  ;;  %v2336_v11 = vsel %vm1312_vm2, %v3781_v45, 0.0 }
 0xb0b   : > { %2337 = vadd.xlane.f32.xlu1 %v2336_v11 }
 0xb0d   : > { %v4700_v9 = vpop.eup %3782 }
 0xb0e   : > { %v2351_v27 = vsel %vm1312_vm2, %v4700_v9, 0.0  ;;  %v4704_v32 = vpop.eup %3784 }
 0xb0f   : > { %2352 = vadd.xlane.f32.xlu0 %v2351_v27  ;;  %v2345_v52 = vsel %vm1312_vm2, %v4704_v32, 0.0 }
 0xb13   : > { %2346 = vadd.xlane.f32.xlu0 %v2345_v52 }
 0xb1c   : > { %2379 = vrot.lane.b32.xlu1 %v4350_v10, %s5068_s28  ;;  %v2327_v10 = vmul.f32 1.442695, %v2314_v53 }
 0xb1e   : > { %3788 = vpow2.f32 %v2327_v10 }
 0xb20   : > { %2381 = vrot.lane.b32.xlu1 %v4384_v1, %s5068_s28 }
 0xb29   : > { %2377 = vrot.lane.b32.xlu0 %v4352_v13, %s5068_s28  ;;  %v4725_v13 = vpop.eup %3786 }
 0xb2a   : > { %v2354_v1 = vsel %vm1312_vm2, %v4725_v13, 0.0 }
 0xb2d   : > { %1804 = vrot.lane.b32.xlu0 %v4534_v59, %s5047_s23 }
 0xb31   : > { %1808 = vrot.lane.b32.xlu0 %v4532_v24, %s5047_s23  ;;  %v4731_v24 = vpop.eup %3788 }
 0xb32   : > { %v2348_v59 = vsel %vm1312_vm2, %v4731_v24, 0.0 }
 0xb35   : > { %2139 = vrot.lane.b32.xlu0 %v4638_v58, %s3914_s24 }
 0xb39   : > { %2143 = vrot.lane.b32.xlu0 %v4636_v31, %s3914_s24 }
 0xb3d   : > { %1812 = vrot.lane.b32.xlu0 %v4542_v36, %s5047_s23 }
 0xb41   : > { %1816 = vrot.lane.b32.xlu0 %v4540_v54, %s5047_s23 }
 0xb44   : > { %2355 = vadd.xlane.f32.xlu1 %v2354_v1 }
 0xb45   : > { %2147 = vrot.lane.b32.xlu0 %v4646_v39, %s3914_s24 }
 0xb48   : > { %2349 = vadd.xlane.f32.xlu1 %v2348_v59 }
 0xb59   : > { %2383 = vrot.lane.b32.xlu1 %v4392_v4, %s5068_s28  ;;  %s3252_s28 = sshll.u32 %s5069_s25, 7 }
 0xb5a   : > { %s4969_s22 = scalar_lea.hbm %s5037_s19, %s3252_s28 }
 0xb5d   : > { %1806 = vrot.lane.b32.xlu1 %v4538_v61, %s5047_s23 }
 0xb61   : > { %1810 = vrot.lane.b32.xlu1 %v4536_v60, %s5047_s23 }
 0xb65   : > { %2141 = vrot.lane.b32.xlu1 %v4642_v30, %s3914_s24 }
 0xb69   : > { %2145 = vrot.lane.b32.xlu1 %v4640_v20, %s3914_s24 }
 0xb6d   : > { %1814 = vrot.lane.b32.xlu1 %v4546_v3, %s5047_s23 }
 0xb71   : > { %1818 = vrot.lane.b32.xlu1 %v4544_v2, %s5047_s23  ;;  %s3916_s23 = smov [#allocation5]  }
 0xb72   : > { %s3850_s4 = sshll.u32 %s3916_s23, 4  ;;  %s3851_s4 = int_to_ptr.vmem [resolvable:$false] %s3850_s4 }
 0xb73   : > { %s3852_s5 = scalar_lea.vmem %s3851_s4, 2048 }
 0xb75   : > { %2149 = vrot.lane.b32.xlu1 %v4650_v35, %s3914_s24 }
 0xb90   : > { %v2341_v4 = vpop.xlane.xlu0 %2340 }
 0xb94   : > { %v2344_v61 = vpop.xlane.xlu1 %2343  ;;  %v2335_v54 = vpop.xlane.xlu0 %2334 }
 0xb95   : > { %3790 = vrcp.f32 %v2335_v54 }
 0xb98   : > { %v2338_v60 = vpop.xlane.xlu1 %2337 }
 0xb99   : > { %3792 = vrcp.f32 %v2338_v60 }
 0xb9a   : > { %3794 = vrcp.f32 %v2344_v61 }
 0xb9b   : > { %3796 = vrcp.f32 %v2341_v4 }
 0xb9c   : > { %v2353_v36 = vpop.xlane.xlu0 %2352  ;;  %v2380_v20 = vpop.permute.xlu1 %2379 }
 0xb9f   : > { %v3791_v58 = vpop.eup %3790 }
 0xba0   : > { %v2347_v31 = vpop.xlane.xlu0 %2346  ;;  %v2365_v3 = vmul.f32 %v3791_v58, %v4691_v56  ;;  %v2382_v49 = vpop.permute.xlu1 %2381 }
 0xba3   : > { %v3793_v30 = vpop.eup %3792 }
 0xba4   : > { %v2378_v39 = vpop.permute.xlu0 %2377  ;;  %v2366_v63 = vmul.f32 %v3793_v30, %v3781_v45  ;;  %v3795_v5 = vpop.eup %3794  ;;  %v3650_v45 = vld [vmem:[%s5029_s11] sm:$0xff]  }
 0xba5   : > { %3509 = vmatprep.subr.bf16.mxu0 %v2378_v39  ;;  %3573 = vmatprep.subr.bf16.mxu1 %v2378_v39  ;;  %v3797_v0 = vpop.eup %3796  ;;  %v2368_v7 = vmul.f32 %v3795_v5, %v4693_v28 }
 0xba6   : > { %3510 = vmatpush3.bf16.msra.mxu0 %v2378_v39  ;;  %3577 = vmatpush3.bf16.msra.mxu1 %v2378_v39  ;;  %v2373_v2 = vpack.c.bf16 %v2366_v63, %v2365_v3  ;;  %v2367_v44 = vmul.f32 %v3797_v0, %v4687_v47  ;;  %v3839_v0 = vld [vmem:[%s4094_s3 + $0x10] sm:$0xff] }
 0xba7   : > { %3511 = vmatprep.subr.bf16.mxu0 %v2380_v20  ;;  %3574 = vmatprep.subr.bf16.mxu1 %v2380_v20 }
 0xba8   : > { %3517 = vmatprep.mubr.msk.bf16.mxu0 %vm1312_vm2, %v2373_v2  ;;  %v1805_v35 = vpop.permute.xlu0 %1804  ;;  %v2374_v16 = vpack.c.bf16 %v2368_v7, %v2367_v44  ;;  %v3840_v44 = vld [vmem:[%s4094_s3 + $0x8] sm:$0xff] }
 0xba9   : > { %1829 = vst.msk [vmem:[#allocation2] sm:$0xff] %vm1828_vm3, %v1805_v35 }
 0xbaa   : > { %3512 = vmatpush3.bf16.msra.mxu0 %v2380_v20  ;;  %3578 = vmatpush3.bf16.msra.mxu1 %v2380_v20 }
 0xbab   : > { %3513 = vmatprep.subr.bf16.mxu0 %v2382_v49  ;;  %3575 = vmatprep.subr.bf16.mxu1 %v2382_v49 }
 0xbac   : > { %v1809_v40 = vpop.permute.xlu0 %1808 }
 0xbad   : > { %1831 = vst.msk [vmem:[#allocation2 + $0x10] sm:$0xff] %vm1828_vm3, %v1809_v40 }
 0xbae   : > { %3514 = vmatpush3.bf16.msra.mxu0 %v2382_v49  ;;  %3579 = vmatpush3.bf16.msra.mxu1 %v2382_v49  ;;  %v3226_v49 = vld [vmem:[%s5030_s12] ss:$0 sm:$0xff] }
 0xbb0   : > { %v2140_v51 = vpop.permute.xlu0 %2139 }
 0xbb1   : > { %2164 = vst.msk [vmem:[#allocation2] sm:$0xff] %vm2163_vm4, %v2140_v51 }
 0xbb4   : > { %v2144_v62 = vpop.permute.xlu0 %2143 }
 0xbb5   : > { %2166 = vst.msk [vmem:[#allocation2 + $0x10] sm:$0xff] %vm2163_vm4, %v2144_v62 }
 0xbb8   : > { %v1813_v38 = vpop.permute.xlu0 %1812 }
 0xbb9   : > { %1833 = vst.msk [vmem:[#allocation2 + $0x20] sm:$0xff] %vm1828_vm3, %v1813_v38 }
 0xbbc   : > { %v1817_v41 = vpop.permute.xlu0 %1816 }
 0xbbd   : > { %1835 = vst.msk [vmem:[#allocation2 + $0x30] sm:$0xff] %vm1828_vm3, %v1817_v41 }
 0xbc0   : > { %v2148_v43 = vpop.permute.xlu0 %2147 }
 0xbc1   : > { %2168 = vst.msk [vmem:[#allocation2 + $0x20] sm:$0xff] %vm2163_vm4, %v2148_v43 }
 0xbd1   : > { %v2356_v37 = vpop.xlane.xlu1 %2355 }
 0xbd2   : > { %3798 = vrcp.f32 %v2356_v37  ;;  %v3838_v37 = vld [vmem:[%s4094_s3] sm:$0xff] }
 0xbd3   : > { %3800 = vrcp.f32 %v2347_v31 }
 0xbd4   : > { %3802 = vrcp.f32 %v2353_v36 }
 0xbd5   : > { %v2350_v6 = vpop.xlane.xlu1 %2349 }
 0xbd6   : > { %3804 = vrcp.f32 %v2350_v6 }
 0xbd9   : > { %v2384_v14 = vpop.permute.xlu1 %2383 }
 0xbda   : > { %3515 = vmatprep.subr.bf16.mxu0 %v2384_v14  ;;  %3576 = vmatprep.subr.bf16.mxu1 %v2384_v14 }
 0xbdb   : > { %3516 = vmatpush3.bf16.msra.mxu0 %v2384_v14  ;;  %3580 = vmatpush3.bf16.msra.mxu1 %v2384_v14 }
 0xbdc   : > { %v3799_v15 = vpop.eup %3798  ;;  %3525 = vmatprep.subr.bf16.mxu1 %v3650_v45 }
 0xbdd   : > { %v1807_v48 = vpop.permute.xlu1 %1806  ;;  %v3801_v19 = vpop.eup %3800  ;;  %v2372_v26 = vmul.f32 %v3799_v15, %v4725_v13 }
 0xbde   : > { %1830 = vst.msk [vmem:[#allocation2 + $0x8] sm:$0xff] %vm1828_vm3, %v1807_v48  ;;  %3518 = vmatmul.mubr.msk.bf16.vlgmr.msra.gmra.mrb[48].mxu0 %vm1312_vm2, %v2374_v16  ;;  %v3803_v55 = vpop.eup %3802  ;;  %v2369_v33 = vmul.f32 %v3801_v19, %v4704_v32  ;;  %v3841_v19 = vld [vmem:[%s4094_s3 + $0x18] sm:$0xff] }
 0xbdf   : > { %v2371_v47 = vmul.f32 %v3803_v55, %v4700_v9  ;;  %v3651_v9 = vld [vmem:[%s5029_s11 + $0x8] sm:$0xff]  }
 0xbe0   : > { %v3805_v50 = vpop.eup %3804 }
 0xbe1   : > { %v1811_v17 = vpop.permute.xlu1 %1810  ;;  %v2370_v57 = vmul.f32 %v3805_v50, %v4731_v24  ;;  %v2376_v22 = vpack.c.bf16 %v2372_v26, %v2371_v47 }
 0xbe2   : > { %1832 = vst.msk [vmem:[#allocation2 + $0x18] sm:$0xff] %vm1828_vm3, %v1811_v17 }
 0xbe3   : > { %v2375_v42 = vpack.c.bf16 %v2370_v57, %v2369_v33 }
 0xbe5   : > { %v2142_v34 = vpop.permute.xlu1 %2141  ;;  %3521 = vmatprep.mubr.msk.bf16.mxu1 %vm1312_vm2, %v2375_v42 }
 0xbe6   : > { %2165 = vst.msk [vmem:[#allocation2 + $0x8] sm:$0xff] %vm2163_vm4, %v2142_v34  ;;  %3522 = vmatmul.mubr.msk.bf16.vlgmr.msra.gmra.mrb[32].mxu1 %vm1312_vm2, %v2376_v22  ;;  %v3842_v34 = vld [vmem:[%s4094_s3 + $0x20] sm:$0xff] }
 0xbe7   : > { %3526 = vmatpush3.bf16.msra.mxu1 %v3650_v45 }
 0xbe8   : > { %3527 = vmatprep.subr.bf16.mxu1 %v3651_v9 }
 0xbe9   : > { %v2146_v56 = vpop.permute.xlu1 %2145 }
 0xbea   : > { %2167 = vst.msk [vmem:[#allocation2 + $0x18] sm:$0xff] %vm2163_vm4, %v2146_v56 }
 0xbeb   : > { %3528 = vmatpush3.bf16.msra.mxu1 %v3651_v9  ;;  %v3844_v9 = vld [vmem:[%s4094_s3 + $0x30] sm:$0xff] }
 0xbed   : > { %v1815_v28 = vpop.permute.xlu1 %1814 }
 0xbee   : > { %1834 = vst.msk [vmem:[#allocation2 + $0x28] sm:$0xff] %vm1828_vm3, %v1815_v28 }
 0xbf1   : > { %v1819_v12 = vpop.permute.xlu1 %1818 }
 0xbf2   : > { %1836 = vst.msk [vmem:[#allocation2 + $0x38] sm:$0xff] %vm1828_vm3, %v1819_v12 }
 0xbf5   : > { %v2150_v29 = vpop.permute.xlu1 %2149 }
 0xbf6   : > { %2169 = vst.msk [vmem:[#allocation2 + $0x28] sm:$0xff] %vm2163_vm4, %v2150_v29  ;;  %v3843_v29 = vld [vmem:[%s4094_s3 + $0x28] sm:$0xff] }
 0xcb1   : > { %v3519_v11 = vpop.f32.mrb[48].mxu0 }
 0xcb2   : > { %2478 = vrot.lane.b32.xlu0 %v3519_v11, %s3915_s29  ;;  %v2435_v27 = vpop.f32.mrb[49].mxu0 }
 0xcb3   : > { %v3520_v32 = vpop.f32.mrb[50].mxu0 }
 0xcb4   : > { %2480 = vrot.lane.b32.xlu1 %v3520_v32, %s3915_s29  ;;  %v2438_v52 = vpop.f32.mrb[51].mxu0  ;;  %v3845_v32 = vld [vmem:[%s4094_s3 + $0x38] sm:$0xff] }
 0xcb6   : > { %2474 = vrot.lane.b32.xlu0 %v2435_v27, %s3915_s29 }
 0xcb8   : > { %2476 = vrot.lane.b32.xlu1 %v2438_v52, %s3915_s29 }
 0xcb9   : > { %v3523_v8 = vpop.f32.mrb[32].mxu1 }
 0xcba   : > { %v2451_v21 = vpop.f32.mrb[33].mxu1  ;;  %2151 = vrot.lane.b32.xlu0 %v4644_v23, %s3914_s24 }
 0xcbb   : > { %v3524_v18 = vpop.f32.mrb[34].mxu1 }
 0xcbc   : > { %v2454_v53 = vpop.f32.mrb[35].mxu1  ;;  %2153 = vrot.lane.b32.xlu1 %v4648_v25, %s3914_s24 }
 0xcbe   : > { %2482 = vrot.lane.b32.xlu0 %v2451_v21, %s3915_s29 }
 0xcc0   : > { %2484 = vrot.lane.b32.xlu1 %v2454_v53, %s3915_s29 }
 0xcc2   : > { %2486 = vrot.lane.b32.xlu0 %v3523_v8, %s3915_s29 }
 0xcc4   : > { %2488 = vrot.lane.b32.xlu1 %v3524_v18, %s3915_s29  ;;  %s3074_s29 = sshll.u32 %s744_s1, 4  ;;  %s4960_s29 = int_to_ptr.vmem [resolvable:$true] %s3074_s29 }
 0xcc5   : > { %s3846_s25 = scalar_lea.vmem %s4960_s29, 1024  ;;  %p3853_p2 = scmp.lt.s32.totalorder %s4960_s29, %s3851_s4 }
 0xcc6   : > { %p3847_p13 = scmp.ne.s32.totalorder %s4960_s29, %s3846_s25  ;;  %p3854_p3 = scmp.lt.s32.totalorder %s3852_s5, %s3846_s25 }
 0xcc8   : > { %p3848_p0 = pnand %p3847_p13, %p4061_p6  ;;  %p3855_p4 = por %p3854_p3, %p3853_p2 }
 0xcca   : > { %p3849_p1 = pneg %p3848_p0 }
 0xccc   : > { %p3856_p5 = pnand %p3855_p4, %p3849_p1 }
 0xd24   : > { %v2479_v46 = vpop.permute.xlu0 %2478 }
 0xd25   : > { %2501 = vst.msk [vmem:[#allocation2 + $0x10] sm:$0xff] %vm2498_vm5, %v2479_v46 }
 0xd26   : > { %v2481_v10 = vpop.permute.xlu1 %2480 }
 0xd27   : > { %2502 = vst.msk [vmem:[#allocation2 + $0x18] sm:$0xff] %vm2498_vm5, %v2481_v10 }
 0xd28   : > { %v2475_v13 = vpop.permute.xlu0 %2474 }
 0xd29   : > { %2499 = vst.msk [vmem:[#allocation2] sm:$0xff] %vm2498_vm5, %v2475_v13 }
 0xd2a   : > { %v2477_v23 = vpop.permute.xlu1 %2476 }
 0xd2b   : > { %2500 = vst.msk [vmem:[#allocation2 + $0x8] sm:$0xff] %vm2498_vm5, %v2477_v23 }
 0xd2c   : > { %v2152_v1 = vpop.permute.xlu0 %2151  ;;  %v2509_v36 = vld [vmem:[#allocation2 + $0x10] sm:$0xff] }
 0xd2d   : > { %2170 = vst.msk [vmem:[#allocation2 + $0x30] sm:$0xff] %vm2163_vm4, %v2152_v1 }
 0xd2e   : > { %v2154_v25 = vpop.permute.xlu1 %2153  ;;  %v2510_v59 = vld [vmem:[#allocation2 + $0x18] sm:$0xff] }
 0xd2f   : > { %2171 = vst.msk [vmem:[#allocation2 + $0x38] sm:$0xff] %vm2163_vm4, %v2154_v25  ;;  %v2516_v58 = vpack.c.bf16 %v2510_v59, %v2509_v36 }
 0xd30   : > { %v2483_v24 = vpop.permute.xlu0 %2482  ;;  %v2507_v61 = vld [vmem:[#allocation2] sm:$0xff] }
 0xd31   : > { %2503 = vst.msk [vmem:[#allocation2 + $0x20] sm:$0xff] %vm2498_vm5, %v2483_v24 }
 0xd32   : > { %v2485_v4 = vpop.permute.xlu1 %2484  ;;  %v2508_v54 = vld [vmem:[#allocation2 + $0x8] sm:$0xff] }
 0xd33   : > { %2504 = vst.msk [vmem:[#allocation2 + $0x28] sm:$0xff] %vm2498_vm5, %v2485_v4  ;;  %v2515_v60 = vpack.c.bf16 %v2508_v54, %v2507_v61 }
 0xd34   : > { %v2487_v31 = vpop.permute.xlu0 %2486 }
 0xd35   : > { %2505 = vst.msk [vmem:[#allocation2 + $0x30] sm:$0xff] %vm2498_vm5, %v2487_v31  ;;  %3529 = vmatprep.mubr.msk.bf16.mxu1 %vm764_vm0, %v2515_v60 }
 0xd36   : > { %v2489_v30 = vpop.permute.xlu1 %2488  ;;  %3530 = vmatmul.mubr.msk.bf16.vlgmr.msra.gmra.mrb[36].mxu1 %vm764_vm0, %v2516_v58 }
 0xd37   : > { %2506 = vst.msk [vmem:[#allocation2 + $0x38] sm:$0xff] %vm2498_vm5, %v2489_v30 }
 0xd38   : > { %v2511_v20 = vld [vmem:[#allocation2 + $0x20] sm:$0xff] }
 0xd3a   : > { %v2512_v39 = vld [vmem:[#allocation2 + $0x28] sm:$0xff] }
 0xd3b   : > { %v2517_v3 = vpack.c.bf16 %v2512_v39, %v2511_v20 }
 0xd3c   : > { %v2513_v63 = vld [vmem:[#allocation2 + $0x30] sm:$0xff] }
 0xd3d   : > { %3533 = vmatprep.mubr.msk.bf16.mxu1 %vm764_vm0, %v2517_v3 }
 0xd3e   : > { %v2514_v2 = vld [vmem:[#allocation2 + $0x38] sm:$0xff] }
 0xd3f   : > { %v2518_v35 = vpack.c.bf16 %v2514_v2, %v2513_v63 }
 0xd41   : > { %3534 = vmatmul.mubr.msk.bf16.gmra.mrb[40].mxu1 %vm764_vm0, %v2518_v35 }
 0xe09   : > { %v3531_v40 = vpop.f32.mrb[36].mxu1 }
 0xe0a   : > { %v2588_v51 = vpop.f32.mrb[37].mxu1  ;;  %v2597_v62 = vadd.f32 %v3531_v40, %v3226_v49 }
 0xe0b   : > { %v2589_v38 = vadd.f32 %v3226_v49, %v2588_v51  ;;  %v3532_v41 = vpop.f32.mrb[38].mxu1 }
 0xe0c   : > { %v2591_v43 = vpop.f32.mrb[39].mxu1  ;;  %v4809_v7 = vadd.f32 %v3839_v0, %v2597_v62  ;;  %v2600_v14 = vadd.f32 %v3532_v41, %v3226_v49 }
 0xe0d   : > { %v4806_v5 = vadd.f32 %v3838_v37, %v2589_v38  ;;  %v2592_v6 = vadd.f32 %v3226_v49, %v2591_v43 }
 0xe0e   : > { %v4819_v55 = vadd.f32 %v3841_v19, %v2600_v14  ;;  %v2635_v50 = vsel %vm764_vm0, %v4809_v7, 0.0 }
 0xe0f   : > { %v4812_v16 = vadd.f32 %v3840_v44, %v2592_v6  ;;  %v2629_v15 = vsel %vm764_vm0, %v4806_v5, 0.0 }
 0xe10   : > { %2630 = vadd.xlane.f32.xlu0 %v2629_v15  ;;  %v2638_v22 = vsel %vm764_vm0, %v4819_v55, 0.0 }
 0xe11   : > { %v2632_v48 = vsel %vm764_vm0, %v4812_v16, 0.0 }
 0xe12   : > { %2633 = vadd.xlane.f32.xlu1 %v2632_v48 }
 0xe14   : > { %2636 = vadd.xlane.f32.xlu0 %v2635_v50  ;;  %v3535_v26 = vpop.f32.mrb[40].mxu1 }
 0xe15   : > { %v2604_v17 = vpop.f32.mrb[41].mxu1  ;;  %v2613_v47 = vadd.f32 %v3535_v26, %v3226_v49 }
 0xe16   : > { %v2605_v33 = vadd.f32 %v3226_v49, %v2604_v17  ;;  %v3536_v57 = vpop.f32.mrb[42].mxu1  ;;  %v3652_v17 = vld [vmem:[%s5033_s15] sm:$0xff]  }
 0xe17   : > { %v2607_v42 = vpop.f32.mrb[43].mxu1  ;;  %v2616_v28 = vadd.f32 %v3536_v57, %v3226_v49  ;;  %v4834_v27 = vadd.f32 %v3844_v9, %v2613_v47  ;;  %3537 = vmatprep.subr.bf16.mxu0 %v3652_v17  ;;  %v3654_v57 = vld [vmem:[%s5035_s17] sm:$0xff]   ;;  %v3655_v47 = vld [vmem:[%s5035_s17 + $0x8] sm:$0xff]  }
 0xe18   : > { %v4826_v56 = vadd.f32 %v3842_v34, %v2605_v33  ;;  %v2608_v12 = vadd.f32 %v3226_v49, %v2607_v42  ;;  %2639 = vadd.xlane.f32.xlu0 %v2638_v22  ;;  %3538 = vmatpush3.bf16.msra.mxu0 %v3652_v17  ;;  %v3653_v33 = vld [vmem:[%s5033_s15 + $0x8] sm:$0xff]  }
 0xe19   : > { %v4837_v52 = vadd.f32 %v3845_v32, %v2616_v28  ;;  %v2647_v21 = vsel %vm764_vm0, %v4834_v27, 0.0  ;;  %3539 = vmatprep.subr.bf16.mxu0 %v3653_v33  ;;  %3549 = vmatprep.subr.bf16.mxu1 %v3654_v57 }
 0xe1a   : > { %v4829_v45 = vadd.f32 %v3843_v29, %v2608_v12  ;;  %v2641_v11 = vsel %vm764_vm0, %v4826_v56, 0.0  ;;  %3550 = vmatpush3.bf16.msra.mxu1 %v3654_v57 }
 0xe1b   : > { %v2650_v18 = vsel %vm764_vm0, %v4837_v52, 0.0  ;;  %3551 = vmatprep.subr.bf16.mxu1 %v3655_v47 }
 0xe1c   : > { %2642 = vadd.xlane.f32.xlu0 %v2641_v11  ;;  %v2644_v8 = vsel %vm764_vm0, %v4829_v45, 0.0  ;;  %3540 = vmatpush3.bf16.msra.mxu0 %v3653_v33 }
 0xe1d   : > { %2645 = vadd.xlane.f32.xlu1 %v2644_v8 }
 0xe1e   : > { %3552 = vmatpush3.bf16.msra.mxu1 %v3655_v47 }
 0xe20   : > { %2648 = vadd.xlane.f32.xlu0 %v2647_v21 }
 0xe21   : > { %2651 = vadd.xlane.f32.xlu1 %v2650_v18 }
 0xe9d   : > { %v2631_v53 = vpop.xlane.xlu0 %2630 }
 0xe9e   : > { %v2653_v46 = vmul.f32 0.03125, %v2631_v53 }
 0xe9f   : > { %v2634_v10 = vpop.xlane.xlu1 %2633 }
 0xea0   : > { %v4846_v13 = vsub.f32 %v4806_v5, %v2653_v46  ;;  %v2654_v23 = vmul.f32 0.03125, %v2634_v10 }
 0xea1   : > { %v2637_v1 = vpop.xlane.xlu0 %2636 }
 0xea2   : > { %v4849_v25 = vsub.f32 %v4812_v16, %v2654_v23  ;;  %v2655_v24 = vmul.f32 0.03125, %v2637_v1  ;;  %v2669_v59 = vmul.f32 %v4846_v13, %v4846_v13 }
 0xea4   : > { %v4854_v4 = vsub.f32 %v4809_v7, %v2655_v24  ;;  %v2677_v61 = vsel %vm764_vm0, %v2669_v59, 0.0  ;;  %v2670_v54 = vmul.f32 %v4849_v25, %v4849_v25  ;;  %v3233_v24 = vld [vmem:[%s5031_s13] ss:$0 sm:$0xff] }
 0xea5   : > { %2678 = vadd.xlane.f32.xlu0 %v2677_v61  ;;  %v2640_v60 = vpop.xlane.xlu0 %2639 }
 0xea6   : > { %v2656_v36 = vmul.f32 0.03125, %v2640_v60  ;;  %v2680_v31 = vsel %vm764_vm0, %v2670_v54, 0.0  ;;  %v2671_v58 = vmul.f32 %v4854_v4, %v4854_v4 }
 0xea7   : > { %2681 = vadd.xlane.f32.xlu1 %v2680_v31 }
 0xea8   : > { %v4863_v30 = vsub.f32 %v4819_v55, %v2656_v36  ;;  %v2683_v20 = vsel %vm764_vm0, %v2671_v58, 0.0 }
 0xea9   : > { %2684 = vadd.xlane.f32.xlu0 %v2683_v20  ;;  %v2643_v39 = vpop.xlane.xlu0 %2642 }
 0xeaa   : > { %v2657_v3 = vmul.f32 0.03125, %v2643_v39  ;;  %v2646_v63 = vpop.xlane.xlu1 %2645  ;;  %v2672_v2 = vmul.f32 %v4863_v30, %v4863_v30 }
 0xeab   : > { %v2658_v35 = vmul.f32 0.03125, %v2646_v63 }
 0xeac   : > { %v4869_v49 = vsub.f32 %v4826_v56, %v2657_v3  ;;  %v2686_v40 = vsel %vm764_vm0, %v2672_v2, 0.0 }
 0xead   : > { %v4873_v51 = vsub.f32 %v4829_v45, %v2658_v35  ;;  %2687 = vadd.xlane.f32.xlu1 %v2686_v40  ;;  %v2649_v62 = vpop.xlane.xlu0 %2648  ;;  %v3234_v35 = vld [vmem:[%s5032_s14] ss:$0 sm:$0xff] }
 0xeae   : > { %v2659_v38 = vmul.f32 0.03125, %v2649_v62  ;;  %v2652_v41 = vpop.xlane.xlu1 %2651  ;;  %v2673_v43 = vmul.f32 %v4869_v49, %v4869_v49 }
 0xeaf   : > { %v2660_v37 = vmul.f32 0.03125, %v2652_v41  ;;  %v2674_v6 = vmul.f32 %v4873_v51, %v4873_v51 }
 0xeb0   : > { %v4880_v0 = vsub.f32 %v4834_v27, %v2659_v38  ;;  %v2689_v14 = vsel %vm764_vm0, %v2673_v43, 0.0 }
 0xeb1   : > { %v4884_v44 = vsub.f32 %v4837_v52, %v2660_v37  ;;  %2690 = vadd.xlane.f32.xlu0 %v2689_v14  ;;  %v2692_v15 = vsel %vm764_vm0, %v2674_v6, 0.0 }
 0xeb2   : > { %2693 = vadd.xlane.f32.xlu1 %v2692_v15  ;;  %v2675_v48 = vmul.f32 %v4880_v0, %v4880_v0 }
 0xeb3   : > { %v2676_v19 = vmul.f32 %v4884_v44, %v4884_v44 }
 0xeb4   : > { %v2695_v50 = vsel %vm764_vm0, %v2675_v48, 0.0 }
 0xeb5   : > { %2696 = vadd.xlane.f32.xlu0 %v2695_v50  ;;  %v2698_v26 = vsel %vm764_vm0, %v2676_v19, 0.0 }
 0xeb6   : > { %2699 = vadd.xlane.f32.xlu1 %v2698_v26 }
 0xf32   : > { %v2679_v42 = vpop.xlane.xlu0 %2678 }
 0xf33   : > { %v2701_v22 = vmul.f32 0.03125, %v2679_v42 }
 0xf34   : > { %v2682_v34 = vpop.xlane.xlu1 %2681 }
 0xf35   : > { %v2709_v28 = vadd.f32 1e-05, %v2701_v22  ;;  %v2702_v12 = vmul.f32 0.03125, %v2682_v34 }
 0xf36   : > { %v2685_v29 = vpop.xlane.xlu0 %2684 }
 0xf37   : > { %3806 = vrsqrt.f32 %v2709_v28  ;;  %v2710_v11 = vadd.f32 1e-05, %v2702_v12  ;;  %v2703_v9 = vmul.f32 0.03125, %v2685_v29 }
 0xf39   : > { %3808 = vrsqrt.f32 %v2710_v11  ;;  %v2711_v32 = vadd.f32 1e-05, %v2703_v9 }
 0xf3a   : > { %v2688_v8 = vpop.xlane.xlu1 %2687 }
 0xf3b   : > { %3810 = vrsqrt.f32 %v2711_v32  ;;  %v2704_v21 = vmul.f32 0.03125, %v2688_v8  ;;  %v3658_v32 = vld [vmem:[%s5035_s17 + $0x20] sm:$0xff]   ;;  %v3659_v8 = vld [vmem:[%s5035_s17 + $0x28] sm:$0xff]  }
 0xf3d   : > { %v2712_v18 = vadd.f32 1e-05, %v2704_v21  ;;  %v3660_v21 = vld [vmem:[%s5035_s17 + $0x30] sm:$0xff]  }
 0xf3e   : > { %v2691_v53 = vpop.xlane.xlu0 %2690 }
 0xf3f   : > { %3812 = vrsqrt.f32 %v2712_v18  ;;  %v2705_v46 = vmul.f32 0.03125, %v2691_v53  ;;  %v2694_v10 = vpop.xlane.xlu1 %2693  ;;  %v3661_v18 = vld [vmem:[%s5035_s17 + $0x38] sm:$0xff]   ;;  %v3235_v53 = vld [vmem:[%s5034_s16] ss:$0 sm:$0xff] }
 0xf40   : > { %v2706_v23 = vmul.f32 0.03125, %v2694_v10 }
 0xf41   : > { %v3807_v1 = vpop.eup %3806  ;;  %v2713_v59 = vadd.f32 1e-05, %v2705_v46 }
 0xf42   : > { %v2725_v61 = vmul.f32 %v3807_v1, %v4846_v13  ;;  %v2714_v54 = vadd.f32 1e-05, %v2706_v23  ;;  %v2697_v60 = vpop.xlane.xlu0 %2696 }
 0xf43   : > { %v3809_v36 = vpop.eup %3808  ;;  %3814 = vrsqrt.f32 %v2713_v59  ;;  %v2707_v31 = vmul.f32 0.03125, %v2697_v60  ;;  %v2700_v58 = vpop.xlane.xlu1 %2699 }
 0xf44   : > { %v2726_v20 = vmul.f32 %v3809_v36, %v4849_v25  ;;  %3816 = vrsqrt.f32 %v2714_v54  ;;  %v2708_v39 = vmul.f32 0.03125, %v2700_v58  ;;  %v2739_v3 = vmul.f32 %v3233_v24, %v2725_v61 }
 0xf45   : > { %v3811_v63 = vpop.eup %3810  ;;  %v2715_v2 = vadd.f32 1e-05, %v2707_v31 }
 0xf46   : > { %v2727_v40 = vmul.f32 %v3811_v63, %v4854_v4  ;;  %v2716_v13 = vadd.f32 1e-05, %v2708_v39  ;;  %v2740_v62 = vmul.f32 %v3233_v24, %v2726_v20  ;;  %v2753_v38 = vadd.f32 %v3234_v35, %v2739_v3 }
 0xf47   : > { %3818 = vrsqrt.f32 %v2715_v2 }
 0xf48   : > { %3820 = vrsqrt.f32 %v2716_v13  ;;  %v2754_v41 = vadd.f32 %v3234_v35, %v2740_v62  ;;  %v2741_v37 = vmul.f32 %v3233_v24, %v2727_v40 }
 0xf49   : > { %v3813_v43 = vpop.eup %3812 }
 0xf4a   : > { %v2728_v25 = vmul.f32 %v3813_v43, %v4863_v30  ;;  %v2761_v6 = vpack.c.bf16 %v2754_v41, %v2753_v38  ;;  %v2755_v50 = vadd.f32 %v3234_v35, %v2741_v37 }
 0xf4c   : > { %v2742_v14 = vmul.f32 %v3233_v24, %v2728_v25  ;;  %3541 = vmatprep.mubr.msk.bf16.mxu0 %vm764_vm0, %v2761_v6 }
 0xf4d   : > { %v3815_v15 = vpop.eup %3814 }
 0xf4e   : > { %v3817_v48 = vpop.eup %3816  ;;  %v2729_v19 = vmul.f32 %v3815_v15, %v4869_v49  ;;  %v2756_v4 = vadd.f32 %v3234_v35, %v2742_v14 }
 0xf4f   : > { %v2730_v26 = vmul.f32 %v3817_v48, %v4873_v51 }
 0xf50   : > { %v2762_v17 = vpack.c.bf16 %v2756_v4, %v2755_v50  ;;  %v2743_v33 = vmul.f32 %v3233_v24, %v2729_v19 }
 0xf51   : > { %v3819_v57 = vpop.eup %3818  ;;  %v2744_v47 = vmul.f32 %v3233_v24, %v2730_v26 }
 0xf52   : > { %v3821_v42 = vpop.eup %3820  ;;  %v2731_v22 = vmul.f32 %v3819_v57, %v4880_v0  ;;  %3542 = vmatmul.mubr.msk.bf16.vlgmr.msra.gmra.mrb[52].mxu0 %vm764_vm0, %v2762_v17  ;;  %v2757_v30 = vadd.f32 %v3234_v35, %v2743_v33  ;;  %v3656_v0 = vld [vmem:[%s5035_s17 + $0x10] sm:$0xff]  }
 0xf53   : > { %v2732_v34 = vmul.f32 %v3821_v42, %v4884_v44  ;;  %v2758_v28 = vadd.f32 %v3234_v35, %v2744_v47  ;;  %3553 = vmatprep.subr.bf16.mxu1 %v3656_v0  ;;  %v3657_v44 = vld [vmem:[%s5035_s17 + $0x18] sm:$0xff]  }
 0xf54   : > { %v2745_v12 = vmul.f32 %v3233_v24, %v2731_v22  ;;  %3554 = vmatpush3.bf16.msra.mxu1 %v3656_v0 }
 0xf55   : > { %v2763_v29 = vpack.c.bf16 %v2758_v28, %v2757_v30  ;;  %v2746_v49 = vmul.f32 %v3233_v24, %v2732_v34  ;;  %3555 = vmatprep.subr.bf16.mxu1 %v3657_v44 }
 0xf56   : > { %v2759_v11 = vadd.f32 %v3234_v35, %v2745_v12 }
 0xf57   : > { %3545 = vmatprep.mubr.msk.bf16.mxu0 %vm764_vm0, %v2763_v29  ;;  %v2760_v51 = vadd.f32 %v3234_v35, %v2746_v49 }
 0xf58   : > { %3556 = vmatpush3.bf16.msra.mxu1 %v3657_v44 }
 0xf59   : > { %v2764_v9 = vpack.c.bf16 %v2760_v51, %v2759_v11  ;;  %3557 = vmatprep.subr.bf16.mxu1 %v3658_v32 }
 0xf5b   : > { %3546 = vmatmul.mubr.msk.bf16.gmra.mrb[56].mxu0 %vm764_vm0, %v2764_v9 }
 0xf5c   : > { %3558 = vmatpush3.bf16.msra.mxu1 %v3658_v32 }
 0xf5d   : > { %3559 = vmatprep.subr.bf16.mxu1 %v3659_v8 }
 0xf60   : > { %3560 = vmatpush3.bf16.msra.mxu1 %v3659_v8 }
 0xf61   : > { %3561 = vmatprep.subr.bf16.mxu1 %v3660_v21 }
 0xf64   : > { %3562 = vmatpush3.bf16.msra.mxu1 %v3660_v21 }
 0xf65   : > { %3563 = vmatprep.subr.bf16.mxu1 %v3661_v18 }
 0xf68   : > { %3564 = vmatpush3.bf16.msra.mxu1 %v3661_v18 }
0x1025   : > { %v3543_v46 = vpop.f32.mrb[52].mxu0 }
0x1026   : > { %v2843_v10 = vadd.f32 %v3543_v46, %v3235_v53  ;;  %v2834_v23 = vpop.f32.mrb[53].mxu0 }
0x1027   : > { %v2835_v1 = vadd.f32 %v3235_v53, %v2834_v23  ;;  %v3544_v24 = vpop.f32.mrb[54].mxu0 }
0x1028   : > { %v2875_v59 = vmul.f32 0.70710677, %v2843_v10  ;;  %v2846_v61 = vadd.f32 %v3544_v24, %v3235_v53  ;;  %v2837_v54 = vpop.f32.mrb[55].mxu0  ;;  %v2867_v19 = vmul.f32 0.5, %v2843_v10  ;;  %v3242_v24 = vld [vmem:[%s5036_s18] ss:$0 sm:$0xff] }
0x1029   : > { %v2873_v60 = vmul.f32 0.70710677, %v2835_v1  ;;  %v2838_v36 = vadd.f32 %v3235_v53, %v2837_v54  ;;  %v2865_v26 = vmul.f32 0.5, %v2835_v1 }
0x102a   : > { %3822 = verf.f32 %v2875_v59  ;;  %v2876_v31 = vmul.f32 0.70710677, %v2846_v61  ;;  %v2868_v50 = vmul.f32 0.5, %v2846_v61 }
0x102b   : > { %3824 = verf.f32 %v2873_v60  ;;  %v2874_v58 = vmul.f32 0.70710677, %v2838_v36  ;;  %v2866_v17 = vmul.f32 0.5, %v2838_v36 }
0x102c   : > { %3826 = verf.f32 %v2876_v31 }
0x102d   : > { %3828 = verf.f32 %v2874_v58 }
0x102e   : > { %v3547_v20 = vpop.f32.mrb[56].mxu0 }
0x102f   : > { %v2859_v39 = vadd.f32 %v3547_v20, %v3235_v53  ;;  %v2850_v3 = vpop.f32.mrb[57].mxu0 }
0x1030   : > { %v2851_v63 = vadd.f32 %v3235_v53, %v2850_v3  ;;  %v3548_v2 = vpop.f32.mrb[58].mxu0 }
0x1031   : > { %v2879_v35 = vmul.f32 0.70710677, %v2859_v39  ;;  %v2862_v40 = vadd.f32 %v3548_v2, %v3235_v53  ;;  %v2853_v13 = vpop.f32.mrb[59].mxu0  ;;  %v2871_v9 = vmul.f32 0.5, %v2859_v39 }
0x1032   : > { %v2877_v62 = vmul.f32 0.70710677, %v2851_v63  ;;  %v2854_v38 = vadd.f32 %v3235_v53, %v2853_v13  ;;  %v2869_v32 = vmul.f32 0.5, %v2851_v63 }
0x1033   : > { %3830 = verf.f32 %v2879_v35  ;;  %v2880_v41 = vmul.f32 0.70710677, %v2862_v40  ;;  %v2872_v0 = vmul.f32 0.5, %v2862_v40 }
0x1034   : > { %v3823_v43 = vpop.eup %3822  ;;  %3832 = verf.f32 %v2877_v62  ;;  %v2878_v37 = vmul.f32 0.70710677, %v2854_v38  ;;  %v2870_v8 = vmul.f32 0.5, %v2854_v38 }
0x1035   : > { %v3825_v25 = vpop.eup %3824  ;;  %v2891_v6 = vadd.f32 1.0, %v3823_v43  ;;  %3834 = verf.f32 %v2880_v41 }
0x1036   : > { %v3827_v14 = vpop.eup %3826  ;;  %v2889_v15 = vadd.f32 1.0, %v3825_v25  ;;  %3836 = verf.f32 %v2878_v37 }
0x1037   : > { %v3829_v48 = vpop.eup %3828  ;;  %v2892_v4 = vadd.f32 1.0, %v3827_v14  ;;  %v2899_v57 = vmul.f32 %v2891_v6, %v2867_v19 }
0x1038   : > { %v2890_v33 = vadd.f32 1.0, %v3829_v48  ;;  %v2897_v42 = vmul.f32 %v2889_v15, %v2865_v26 }
0x1039   : > { %v2900_v47 = vmul.f32 %v2892_v4, %v2868_v50 }
0x103a   : > { %v2898_v22 = vmul.f32 %v2890_v33, %v2866_v17 }
0x103b   : > { %v2906_v30 = vpack.c.bf16 %v2900_v47, %v2899_v57 }
0x103c   : > { %v2905_v34 = vpack.c.bf16 %v2898_v22, %v2897_v42 }
0x103d   : > { %v3831_v28 = vpop.eup %3830 }
0x103e   : > { %v3833_v12 = vpop.eup %3832  ;;  %v2895_v29 = vadd.f32 1.0, %v3831_v28  ;;  %3565 = vmatprep.mubr.bf16.mxu1 %v2905_v34 }
0x103f   : > { %v3835_v49 = vpop.eup %3834  ;;  %v2893_v11 = vadd.f32 1.0, %v3833_v12  ;;  %3566 = vmatmul.mubr.bf16.vlgmr.msra.gmra.mrb[44].mxu1 %v2906_v30 }
0x1040   : > { %v3837_v51 = vpop.eup %3836  ;;  %v2896_v44 = vadd.f32 1.0, %v3835_v49  ;;  %v2903_v18 = vmul.f32 %v2895_v29, %v2871_v9 }
0x1041   : > { %v2894_v21 = vadd.f32 1.0, %v3837_v51  ;;  %v2901_v46 = vmul.f32 %v2893_v11, %v2869_v32 }
0x1042   : > { %v2904_v53 = vmul.f32 %v2896_v44, %v2872_v0 }
0x1043   : > { %v2902_v10 = vmul.f32 %v2894_v21, %v2870_v8 }
0x1044   : > { %v2908_v23 = vpack.c.bf16 %v2904_v53, %v2903_v18 }
0x1045   : > { %v2907_v1 = vpack.c.bf16 %v2902_v10, %v2901_v46 }
0x1047   : > { %3569 = vmatprep.mubr.bf16.mxu1 %v2907_v1 }
0x1048   : > { %3570 = vmatmul.mubr.bf16.gmra.mrb[48].mxu1 %v2908_v23 }
0x1112   : > { %v3567_v59 = vpop.f32.mrb[44].mxu1 }
0x1113   : > { %v3023_v61 = vadd.f32 %v3567_v59, %v3242_v24  ;;  %v3014_v54 = vpop.f32.mrb[45].mxu1 }
0x1114   : > { %v3015_v60 = vadd.f32 %v3242_v24, %v3014_v54  ;;  %v3568_v36 = vpop.f32.mrb[46].mxu1 }
0x1115   : > { %v3047_v31 = vadd.f32 %v3023_v61, %v4809_v7  ;;  %v3026_v58 = vadd.f32 %v3568_v36, %v3242_v24  ;;  %v3017_v20 = vpop.f32.mrb[47].mxu1 }
0x1116   : > { %v3045_v39 = vadd.f32 %v3015_v60, %v4806_v5  ;;  %v3018_v3 = vadd.f32 %v3242_v24, %v3017_v20 }
0x1117   : > { %3055 = vst.msk [vmem:[%s744_s1 + $0x10] sm:$0xff] %vm764_vm0, %v3047_v31  ;;  %v3048_v63 = vadd.f32 %v3026_v58, %v4819_v55 }
0x1118   : > { %3053 = vst.msk [vmem:[%s744_s1] sm:$0xff] %vm764_vm0, %v3045_v39  ;;  %v3046_v2 = vadd.f32 %v3018_v3, %v4812_v16 }
0x1119   : > { %3056 = vst.msk [vmem:[%s744_s1 + $0x18] sm:$0xff] %vm764_vm0, %v3048_v63 }
0x111a   : > { %3054 = vst.msk [vmem:[%s744_s1 + $0x8] sm:$0xff] %vm764_vm0, %v3046_v2 }
0x111b   : > { %v3571_v7 = vpop.f32.mrb[48].mxu1 }
0x111c   : > { %v3039_v35 = vadd.f32 %v3571_v7, %v3242_v24  ;;  %v3030_v40 = vpop.f32.mrb[49].mxu1 }
0x111d   : > { %v3031_v5 = vadd.f32 %v3242_v24, %v3030_v40  ;;  %v3572_v13 = vpop.f32.mrb[50].mxu1 }
0x111e   : > { %v3051_v62 = vadd.f32 %v3039_v35, %v4834_v27  ;;  %v3042_v38 = vadd.f32 %v3572_v13, %v3242_v24  ;;  %v3033_v55 = vpop.f32.mrb[51].mxu1 }
0x111f   : > { %v3049_v16 = vadd.f32 %v3031_v5, %v4826_v56  ;;  %v3034_v41 = vadd.f32 %v3242_v24, %v3033_v55 }
0x1120   : > { %3059 = vst.msk [vmem:[%s744_s1 + $0x30] sm:$0xff] %vm764_vm0, %v3051_v62  ;;  %v3052_v43 = vadd.f32 %v3042_v38, %v4837_v52 }
0x1121   : > { %3057 = vst.msk [vmem:[%s744_s1 + $0x20] sm:$0xff] %vm764_vm0, %v3049_v16  ;;  %v3050_v27 = vadd.f32 %v3034_v41, %v4829_v45 }
0x1122   : > { %3060 = vst.msk [vmem:[%s744_s1 + $0x38] sm:$0xff] %vm764_vm0, %v3052_v43 }
0x1123   : > { %3058 = vst.msk [vmem:[%s744_s1 + $0x28] sm:$0xff] %vm764_vm0, %v3050_v27 }
0x1124   : > { %3859 = shalt.err (!%p3856_p5)
}
0x1125   : > { %s3860_s1 = scalar_lea.hbm %s4969_s22, 1024  ;;  %s3864_s23 = scalar_lea.hbm %s5037_s19, 2048 }
0x1126   : > { %p3861_p7 = scmp.ne.s32.totalorder %s4969_s22, %s3860_s1  ;;  %p3865_p12 = scmp.lt.u32.totalorder %s4969_s22, %s5037_s19 }
0x1127   : > { %p3866_p13 = scmp.lt.u32.totalorder %s3864_s23, %s3860_s1  ;;  %p3868_p1 = scmp.lt.u32.totalorder %s3860_s1, %s4969_s22 }
0x1128   : > { %p3862_p10 = pnand %p3861_p7, %p4061_p6 }
0x1129   : > { %p3867_p0 = por %p3866_p13, %p3865_p12 }
0x112a   : > { %p3863_p11 = pneg %p3862_p10 }
0x112b   : > { %p3869_p2 = por %p3868_p1, %p3867_p0 }
0x112d   : > { %p3870_p3 = pnand %p3869_p2, %p3863_p11 }
0x112f   : > { %3873 = shalt.err (!%p3870_p3)
}
0x1130   : > { %s3917_s5 = smov 128   ;;  %s3918_s0 = smov 256  }
0x1131   : > { %s5071_s25 = smov 8  }
0x1132   : > { %3597 = dma.vmem_to_hbm [thread:$0]  (%p4061_p6), %s4960_s29, 1024, %s4969_s22, %s4975_s2, %s3917_s5, %s3918_s0, %s5071_s25  }
0x1133 PF: > { %s5072_s28 = sld [smem:[#allocation8_spill]]  ;;  %p3600_p4 = pnand %p3162_p9, %p4065_p8 }
0x1139   : > { %s3089_s3 = sand.u32 1, %s5072_s28  }
0x113a   : > { %s3090_s1 = scalar_lea.sflag [#allocation6], %s3089_s3 }
0x113b   : > { %3891 = dma.done.wait (!%p3600_p4), %s3090_s1, 1024  }
0x113c   : > { %3893 = vsyncadd (!%p3600_p4), %s3090_s1, 4294966272  ;;  %s5074_s21 = sld [smem:[#allocation9_spill]]  ;;  %s5075_s23 = sld [smem:[#allocation10_spill]] }
0x113d   : > { %s5076_s0 = smov %s3900_s30  ;;  %s5077_s30 = smov %s3904_s20 }
0x1142   : > { %p29_p5 = scmp.ge.s32.totalorder %s5074_s21, 4   ;;  %s5078_s20 = smov %s5075_s23 }
0x1144   :  { %31 = sbr.rel (!%p29_p5) target bundleno = 10 (0xa), region = 220 }
0x114b   :  { %3095 = vsyncpa [#allocation6], 1 }
0x114c   :  { %3097 = vsyncpa [#allocation6 + $0x1], 1 }

// kernel: residual_cross_attention_block.1
= control target key start
LH: loop header
LB: loop body
LE: loop exit
PB: predicated region body
PF: predicated region fallthrough
CT: control target
= control target key end

     0   :  { %s5018_s0 = inlined_call_operand.vmem [shape: f32[8,16,32], index: 0, kind: input, shape index: {}]   ;;  %s5019_s1 = inlined_call_operand.vmem [shape: f32[8,16,32], index: 1, kind: input, shape index: {}]   ;;  %s5020_s2 = inlined_call_operand.vmem [shape: f32[64,64], index: 2, kind: input, shape index: {}]   ;;  %s5021_s3 = inlined_call_operand.vmem [shape: f32[1,32], index: 3, kind: input, shape index: {}]   ;;  %s5022_s4 = inlined_call_operand.vmem [shape: f32[1,32], index: 4, kind: input, shape index: {}]   ;;  %s5023_s5 = inlined_call_operand.vmem [shape: bf16[32,32], index: 5, kind: input, shape index: {}]   ;;  %s5024_s6 = inlined_call_operand.vmem [shape: bf16[32,32], index: 6, kind: input, shape index: {}]   ;;  %s5025_s7 = inlined_call_operand.vmem [shape: bf16[32,32], index: 7, kind: input, shape index: {}]   ;;  %s5026_s8 = inlined_call_operand.vmem [shape: f32[1,32], index: 8, kind: input, shape index: {}]   ;;  %s5027_s9 = inlined_call_operand.vmem [shape: f32[1,32], index: 9, kind: input, shape index: {}]   ;;  %s5028_s10 = inlined_call_operand.vmem [shape: f32[1,32], index: 10, kind: input, shape index: {}]   ;;  %s5029_s11 = inlined_call_operand.vmem [shape: bf16[32,32], index: 11, kind: input, shape index: {}]   ;;  %s5030_s12 = inlined_call_operand.vmem [shape: f32[1,32], index: 12, kind: input, shape index: {}]   ;;  %s5031_s13 = inlined_call_operand.vmem [shape: f32[1,32], index: 13, kind: input, shape index: {}]   ;;  %s5032_s14 = inlined_call_operand.vmem [shape: f32[1,32], index: 14, kind: input, shape index: {}]   ;;  %s5033_s15 = inlined_call_operand.vmem [shape: bf16[32,128], index: 15, kind: input, shape index: {}]   ;;  %s5034_s16 = inlined_call_operand.vmem [shape: f32[1,128], index: 16, kind: input, shape index: {}]   ;;  %s5035_s17 = inlined_call_operand.vmem [shape: bf16[128,32], index: 17, kind: input, shape index: {}]   ;;  %s5036_s18 = inlined_call_operand.vmem [shape: f32[1,32], index: 18, kind: input, shape index: {}]   ;;  %s5037_s19 = inlined_call_operand.hbm [shape: f32[8,16,32], index: 19, kind: output, shape index: {}]  }
   0x1   :  { %5048 = sst [smem:[#allocation12_spill]] %s5018_s0 }
   0x2   :  { %5049 = sst [smem:[#allocation13_spill]] %s5019_s1 }
   0x3   :  { %5050 = sst [smem:[#allocation14_spill]] %s5020_s2 }
   0x4   :  { %5051 = sst [smem:[#allocation15_spill]] %s5021_s3 }
   0x5   :  { %5052 = sst [smem:[#allocation16_spill]] %s5022_s4 }
   0x6   :  { %5053 = sst [smem:[#allocation17_spill]] %s5023_s5 }
   0x7   :  { %24 = vsyncpa [#allocation6], 0 }
   0x8   :  { %26 = vsyncpa [#allocation6 + $0x1], 0  ;;  %s4019_s0 = smov 0   ;;  %s4021_s30 = smov 0  }
   0x9   :  { %s4023_s20 = smov 0   ;;  %s4025_s21 = smov 0  }
   0xa LB: > { %5054 = sst [smem:[#allocation8_spill]] %s3896_s0  ;;  %s5039_s1 = sadd.s32 4294967295, %s3908_s21   ;;  %s3908_s21 = sphi %s4025_s21, %s5074_s21   ;;  %s3904_s20 = sphi %s4023_s20, %s5078_s20   ;;  %s3900_s30 = sphi %s4021_s30, %s5077_s30   ;;  %s3896_s0 = sphi %s4019_s0, %s5076_s0  }
   0xb   : > { %s3160_s22 = sadd.s32 4294967294, %s3908_s21   ;;  %s4042_s2 = sadd.s32 1, %s3908_s21  }
   0xc   : > { %5055 = sst [smem:[#allocation9_spill]] %s4042_s2  ;;  %s39_s23 = sadd.s32 1, %s3904_s20 }
   0xd   : > { %s36_s24 = ssub.s32 %s3908_s21, %s4042_s2  ;;  %p46_p0 = scmp.ne.s32.totalorder %s3904_s20, %s3900_s30 }
   0xe   : > { %p37_p1 = scmp.eq.s32.totalorder %s36_s24, 0  ;;  %p47_p2 = scmp.eq.s32.totalorder %s3908_s21, 0 }
   0xf   : > { %p459_p3 = scmp.eq.s32.totalorder %s5039_s1, 1  ;;  %p464_p4 = scmp.ne.s32.totalorder %s3900_s30, %s3896_s0 }
  0x10   : > { %s4055_s25 = scalar_select %p37_p1, %s3904_s20, %s39_s23  }
  0x11   : > { %p4057_p5 = por %p47_p2, %p46_p0  ;;  %p4061_p6 = por %p459_p3, %p46_p0 }
  0x12   : > { %5056 = sst [smem:[#allocation10_spill]] %s4055_s25  ;;  %p465_p7 = scmp.eq.s32.totalorder %s3160_s22, 1 }
  0x13   : > { %p3162_p9 = scmp.ge.s32.totalorder %s3908_s21, 2 }
  0x14   : > { %p4065_p8 = por %p465_p7, %p464_p4 }
  0x15   : > { %532 = sbr.rel (%p3162_p9) target bundleno = 56 (0x38), region = 84 }
  0x16   : > { %s5059_s27 = scalar_select %p4065_p8, 1, 0 }
  0x18   : > { %5060 = sst [smem:[#allocation11_spill]] %s5059_s27 }
  0x1c   : > { %535 = sbr.rel (!%p4057_p5) target bundleno = 42 (0x2a), region = 88  ;;  %s537_s28 = sand.u32 (%p4057_p5), 1, %s3904_s20  }
  0x1d   : > { %s3164_s29 = sshll.u32 (%p4057_p5), %s3908_s21, 3  ;;  %s3163_s23 = sshll.u32 (%p4057_p5), %s537_s28, 6 }
  0x1e   : > { %s5061_s22 = sld [smem:[#allocation12_spill]] (%p4057_p5)  ;;  %s539_s2 = scalar_lea.vmem (%p4057_p5), [#allocation3], %s3163_s23 }
  0x24   : > { %s541_s25 = scalar_lea.vmem %s5061_s22, %s3164_s29 }
  0x25   : > { %v583_v0 = vld [vmem:[%s541_s25] sm:$0xff]  ;;  %v585_v1 = vld [vmem:[%s541_s25 + $0x10] sm:$0xff] }
  0x26   : > { %v587_v2 = vld [vmem:[%s541_s25 + $0x20] sm:$0xff]  ;;  %584 = vst [vmem:[%s539_s2] sm:$0xff] %v583_v0  ;;  %586 = vst [vmem:[%s539_s2 + $0x8] sm:$0xff] %v585_v1  ;;  %v589_v3 = vld [vmem:[%s541_s25 + $0x30] sm:$0xff] }
  0x27   : > { %588 = vst [vmem:[%s539_s2 + $0x10] sm:$0xff] %v587_v2  ;;  %v591_v4 = vld [vmem:[%s541_s25 + $0x40] sm:$0xff]  ;;  %v593_v5 = vld [vmem:[%s541_s25 + $0x50] sm:$0xff]  ;;  %590 = vst [vmem:[%s539_s2 + $0x18] sm:$0xff] %v589_v3 }
  0x28   : > { %592 = vst [vmem:[%s539_s2 + $0x20] sm:$0xff] %v591_v4  ;;  %594 = vst [vmem:[%s539_s2 + $0x28] sm:$0xff] %v593_v5  ;;  %v595_v6 = vld [vmem:[%s541_s25 + $0x60] sm:$0xff]  ;;  %v597_v7 = vld [vmem:[%s541_s25 + $0x70] sm:$0xff] }
  0x29   : > { %596 = vst [vmem:[%s539_s2 + $0x30] sm:$0xff] %v595_v6  ;;  %598 = vst [vmem:[%s539_s2 + $0x38] sm:$0xff] %v597_v7 }
  0x2a PF: > { %604 = sbr.rel (!%p4057_p5) target bundleno = 56 (0x38), region = 126  ;;  %s606_s1 = sand.u32 (%p4057_p5), 1, %s3904_s20  }
  0x2b   : > { %s3166_s28 = sshll.u32 (%p4057_p5), %s3908_s21, 3  ;;  %s3165_s29 = sshll.u32 (%p4057_p5), %s606_s1, 6 }
  0x2c   : > { %s5062_s22 = sld [smem:[#allocation13_spill]] (%p4057_p5)  ;;  %s608_s0 = scalar_lea.vmem (%p4057_p5), [#allocation4], %s3165_s29 }
  0x32   : > { %s610_s27 = scalar_lea.vmem %s5062_s22, %s3166_s28 }
  0x33   : > { %v652_v8 = vld [vmem:[%s610_s27] sm:$0xff]  ;;  %v654_v9 = vld [vmem:[%s610_s27 + $0x10] sm:$0xff] }
  0x34   : > { %v656_v10 = vld [vmem:[%s610_s27 + $0x20] sm:$0xff]  ;;  %653 = vst [vmem:[%s608_s0] sm:$0xff] %v652_v8  ;;  %655 = vst [vmem:[%s608_s0 + $0x8] sm:$0xff] %v654_v9  ;;  %v658_v11 = vld [vmem:[%s610_s27 + $0x30] sm:$0xff] }
  0x35   : > { %657 = vst [vmem:[%s608_s0 + $0x10] sm:$0xff] %v656_v10  ;;  %v660_v12 = vld [vmem:[%s610_s27 + $0x40] sm:$0xff]  ;;  %v662_v13 = vld [vmem:[%s610_s27 + $0x50] sm:$0xff]  ;;  %659 = vst [vmem:[%s608_s0 + $0x18] sm:$0xff] %v658_v11 }
  0x36   : > { %661 = vst [vmem:[%s608_s0 + $0x20] sm:$0xff] %v660_v12  ;;  %663 = vst [vmem:[%s608_s0 + $0x28] sm:$0xff] %v662_v13  ;;  %v664_v14 = vld [vmem:[%s610_s27 + $0x60] sm:$0xff]  ;;  %v666_v15 = vld [vmem:[%s610_s27 + $0x70] sm:$0xff] }
  0x37   : > { %665 = vst [vmem:[%s608_s0 + $0x30] sm:$0xff] %v664_v14  ;;  %667 = vst [vmem:[%s608_s0 + $0x38] sm:$0xff] %v666_v15 }
  0x38 PF: > { %p3167_p10 = scmp.ge.s32.totalorder %s3908_s21, 1  ;;  %p672_p11 = scmp.lt.s32.totalorder %s3908_s21, 3 }
  0x3a   : > { %p673_p12 = pnand %p3167_p10, %p672_p11 }
  0x3b   : > { %s5044_s2 = sand.u32 (!%p673_p12), 1, %s3900_s30   ;;  %vm764_vm0 = vcmask (!%p673_p12), 261120   ;;  %v3644_v32 = vld [vmem:[%s5024_s6] sm:$0xff] (!%p673_p12)   ;;  %v3645_v33 = vld [vmem:[%s5024_s6 + $0x8] sm:$0xff] (!%p673_p12)   ;;  %s5063_s5 = sld [smem:[#allocation17_spill]] (!%p673_p12)  ;;  %vm1222_vm1 = vcmask (!%p673_p12), 64512  }
  0x3c   : > { %676 = sbr.rel (%p673_p12) target bundleno = 4403 (0x1133), region = 164  ;;  %s4091_s25 = sshll.u32 (!%p673_p12), %s5044_s2, 6  ;;  %3373 = vmatprep.subr.bf16.mxu1 (!%p673_p12), %v3644_v32  ;;  %vm1312_vm2 = vcmask (!%p673_p12), 523264   ;;  %vm1828_vm3 = vcmask (!%p673_p12), 130112   ;;  %vm2163_vm4 = vcmask (!%p673_p12), 195712   ;;  %vm2498_vm5 = vcmask (!%p673_p12), 261312  }
  0x3d   : > { %s4094_s3 = scalar_lea.vmem (!%p673_p12), [#allocation3], %s4091_s25  ;;  %s4119_s29 = scalar_lea.vmem (!%p673_p12), [#allocation4], %s4091_s25  ;;  %3374 = vmatpush3.bf16.msra.mxu1 (!%p673_p12), %v3644_v32 }
  0x3e   : > { %v746_v16 = vld [vmem:[%s4094_s3] sm:$0xff] (!%p673_p12)  ;;  %v748_v17 = vld [vmem:[%s4094_s3 + $0x10] sm:$0xff] (!%p673_p12)  ;;  %v747_v18 = vld [vmem:[%s4094_s3 + $0x8] sm:$0xff] (!%p673_p12)  ;;  %3375 = vmatprep.subr.bf16.mxu1 (!%p673_p12), %v3645_v33  ;;  %s5064_s23 = sld [smem:[#allocation15_spill]] (!%p673_p12)  ;;  %s5065_s4 = sld [smem:[#allocation16_spill]] (!%p673_p12) }
  0x3f   : > { %v765_v19 = vsel (!%p673_p12), %vm764_vm0, %v746_v16, 0.0  ;;  %v771_v20 = vsel (!%p673_p12), %vm764_vm0, %v748_v17, 0.0  ;;  %v749_v21 = vld [vmem:[%s4094_s3 + $0x18] sm:$0xff] (!%p673_p12)  ;;  %v750_v22 = vld [vmem:[%s4094_s3 + $0x20] sm:$0xff] (!%p673_p12)  ;;  %v751_v23 = vld [vmem:[%s4094_s3 + $0x28] sm:$0xff] (!%p673_p12)  ;;  %v768_v24 = vsel (!%p673_p12), %vm764_vm0, %v747_v18, 0.0 }
  0x40   : > { %766 = vadd.xlane.f32.xlu0 (!%p673_p12), %v765_v19  ;;  %772 = vadd.xlane.f32.xlu1 (!%p673_p12), %v771_v20  ;;  %v774_v25 = vsel (!%p673_p12), %vm764_vm0, %v749_v21, 0.0  ;;  %v777_v26 = vsel (!%p673_p12), %vm764_vm0, %v750_v22, 0.0  ;;  %v780_v27 = vsel (!%p673_p12), %vm764_vm0, %v751_v23, 0.0  ;;  %v752_v28 = vld [vmem:[%s4094_s3 + $0x30] sm:$0xff] (!%p673_p12)  ;;  %v753_v29 = vld [vmem:[%s4094_s3 + $0x38] sm:$0xff] (!%p673_p12)  ;;  %v754_v34 = vld [vmem:[%s4119_s29] sm:$0xff] (!%p673_p12) }
  0x41   : > { %v783_v30 = vsel (!%p673_p12), %vm764_vm0, %v752_v28, 0.0  ;;  %v786_v31 = vsel (!%p673_p12), %vm764_vm0, %v753_v29, 0.0  ;;  %v755_v35 = vld [vmem:[%s4119_s29 + $0x8] sm:$0xff] (!%p673_p12)  ;;  %v756_v37 = vld [vmem:[%s4119_s29 + $0x10] sm:$0xff] (!%p673_p12)  ;;  %v757_v38 = vld [vmem:[%s4119_s29 + $0x18] sm:$0xff] (!%p673_p12)  ;;  %3376 = vmatpush3.bf16.msra.mxu1 (!%p673_p12), %v3645_v33  ;;  %s5066_s0 = sld [smem:[#allocation14_spill]] (!%p673_p12) }
  0x42   : > { %v4123_v36 = vpack.c.bf16 (!%p673_p12), %v755_v35, %v754_v34  ;;  %v4129_v39 = vpack.c.bf16 (!%p673_p12), %v757_v38, %v756_v37  ;;  %v760_v19 = vld [vmem:[%s4119_s29 + $0x30] sm:$0xff] (!%p673_p12)  ;;  %v761_v20 = vld [vmem:[%s4119_s29 + $0x38] sm:$0xff] (!%p673_p12)  ;;  %s3910_s2 = smov (!%p673_p12), 120   ;;  %s3911_s1 = smov (!%p673_p12), 112  }
  0x43   : > { %s5045_s28 = smov 104   ;;  %s3914_s24 = smov 16  }
  0x44   : > { %769 = vadd.xlane.f32.xlu0 %v768_v24  ;;  %775 = vadd.xlane.f32.xlu1 %v774_v25  ;;  %v4194_v24 = vld [vmem:[%s5027_s9] ss:$0 sm:$0xff] }
  0x45   : > { %3377 = vmatprep.mubr.msk.bf16.mxu1 %vm764_vm0, %v4123_v36 }
  0x46   : > { %3378 = vmatmul.mubr.msk.bf16.vlgmr.msra.gmra.mrb[0].mxu1 %vm764_vm0, %v4129_v39 }
  0x47   : > { %s5067_s27 = smov %s5066_s0 }
  0x48   : > { %778 = vadd.xlane.f32.xlu0 %v777_v26  ;;  %781 = vadd.xlane.f32.xlu1 %v780_v27 }
  0x4c   : > { %784 = vadd.xlane.f32.xlu0 %v783_v30  ;;  %787 = vadd.xlane.f32.xlu1 %v786_v31 }
  0xcd   : > { %v767_v40 = vpop.xlane.xlu0 %766  ;;  %v773_v41 = vpop.xlane.xlu1 %772 }
  0xce   : > { %v790_v42 = vmul.f32 0.03125, %v767_v40  ;;  %v792_v43 = vmul.f32 0.03125, %v773_v41 }
  0xd0   : > { %v4133_v44 = vsub.f32 %v746_v16, %v790_v42  ;;  %v4135_v45 = vsub.f32 %v748_v17, %v792_v43  ;;  %v758_v16 = vld [vmem:[%s4119_s29 + $0x20] sm:$0xff]  ;;  %v759_v17 = vld [vmem:[%s4119_s29 + $0x28] sm:$0xff]  ;;  %s3915_s29 = smov 24  }
  0xd1   : > { %v770_v46 = vpop.xlane.xlu0 %769  ;;  %v776_v47 = vpop.xlane.xlu1 %775 }
  0xd2   : > { %v791_v48 = vmul.f32 0.03125, %v770_v46  ;;  %v793_v49 = vmul.f32 0.03125, %v776_v47  ;;  %v806_v50 = vmul.f32 %v4133_v44, %v4133_v44  ;;  %v808_v51 = vmul.f32 %v4135_v45, %v4135_v45 }
  0xd4   : > { %v4141_v52 = vsub.f32 %v747_v18, %v791_v48  ;;  %v4143_v53 = vsub.f32 %v749_v21, %v793_v49  ;;  %v814_v54 = vsel %vm764_vm0, %v806_v50, 0.0  ;;  %v820_v57 = vsel %vm764_vm0, %v808_v51, 0.0 }
  0xd5   : > { %815 = vadd.xlane.f32.xlu0 %v814_v54  ;;  %v779_v55 = vpop.xlane.xlu0 %778  ;;  %v782_v56 = vpop.xlane.xlu1 %781  ;;  %v4175_v18 = vpack.c.bf16 %v759_v17, %v758_v16  ;;  %v4179_v21 = vpack.c.bf16 %v761_v20, %v760_v19 }
  0xd6   : > { %v794_v58 = vmul.f32 0.03125, %v779_v55  ;;  %v795_v59 = vmul.f32 0.03125, %v782_v56  ;;  %v807_v60 = vmul.f32 %v4141_v52, %v4141_v52  ;;  %v809_v61 = vmul.f32 %v4143_v53, %v4143_v53 }
  0xd7   : > { %3381 = vmatprep.mubr.msk.bf16.mxu1 %vm764_vm0, %v4175_v18 }
  0xd8   : > { %v4151_v62 = vsub.f32 %v750_v22, %v794_v58  ;;  %v4153_v63 = vsub.f32 %v751_v23, %v795_v59  ;;  %v817_v0 = vsel %vm764_vm0, %v807_v60, 0.0  ;;  %v823_v3 = vsel %vm764_vm0, %v809_v61, 0.0  ;;  %3382 = vmatmul.mubr.msk.bf16.gmra.mrb[4].mxu1 %vm764_vm0, %v4179_v21  ;;  %v3646_v22 = vld [vmem:[%s5063_s5] sm:$0xff]   ;;  %v3647_v23 = vld [vmem:[%s5063_s5 + $0x8] sm:$0xff]  }
  0xd9   : > { %821 = vadd.xlane.f32.xlu0 %v820_v57  ;;  %818 = vadd.xlane.f32.xlu1 %v817_v0  ;;  %v785_v1 = vpop.xlane.xlu0 %784  ;;  %v788_v2 = vpop.xlane.xlu1 %787 }
  0xda   : > { %v796_v4 = vmul.f32 0.03125, %v785_v1  ;;  %v797_v5 = vmul.f32 0.03125, %v788_v2  ;;  %v810_v6 = vmul.f32 %v4151_v62, %v4151_v62  ;;  %v811_v7 = vmul.f32 %v4153_v63, %v4153_v63  ;;  %3361 = vmatprep.subr.bf16.mxu0 %v3646_v22 }
  0xdb   : > { %3362 = vmatpush3.bf16.msra.mxu0 %v3646_v22 }
  0xdc   : > { %v4161_v8 = vsub.f32 %v752_v28, %v796_v4  ;;  %v4163_v9 = vsub.f32 %v753_v29, %v797_v5  ;;  %v826_v10 = vsel %vm764_vm0, %v810_v6, 0.0  ;;  %v829_v11 = vsel %vm764_vm0, %v811_v7, 0.0  ;;  %3363 = vmatprep.subr.bf16.mxu0 %v3647_v23  ;;  %v3171_v6 = vld [vmem:[%s5064_s23] ss:$0 sm:$0xff]  ;;  %s5047_s23 = smov 8  }
  0xdd   : > { %824 = vadd.xlane.f32.xlu1 %v823_v3  ;;  %827 = vadd.xlane.f32.xlu0 %v826_v10 }
  0xde   : > { %v812_v12 = vmul.f32 %v4161_v8, %v4161_v8  ;;  %v813_v13 = vmul.f32 %v4163_v9, %v4163_v9 }
  0xdf   : > { %3364 = vmatpush3.bf16.msra.mxu0 %v3647_v23 }
  0xe0   : > { %v832_v14 = vsel %vm764_vm0, %v812_v12, 0.0  ;;  %v835_v15 = vsel %vm764_vm0, %v813_v13, 0.0 }
  0xe1   : > { %830 = vadd.xlane.f32.xlu1 %v829_v11  ;;  %833 = vadd.xlane.f32.xlu0 %v832_v14  ;;  %v3172_v14 = vld [vmem:[%s5065_s4] ss:$0 sm:$0xff] }
  0xe5   : > { %836 = vadd.xlane.f32.xlu1 %v835_v15 }
 0x119   : > { %v3379_v25 = vpop.f32.mrb[0].mxu1 }
 0x11a   : > { %v1084_v26 = vadd.f32 %v3379_v25, %v4194_v24  ;;  %v1075_v27 = vpop.f32.mrb[1].mxu1 }
 0x11b   : > { %v1076_v28 = vadd.f32 %v4194_v24, %v1075_v27  ;;  %v3380_v29 = vpop.f32.mrb[2].mxu1 }
 0x11c   : > { %v1087_v30 = vadd.f32 %v3380_v29, %v4194_v24  ;;  %v1078_v31 = vpop.f32.mrb[3].mxu1 }
 0x11d   : > { %v1079_v32 = vadd.f32 %v4194_v24, %v1078_v31 }
 0x11e   : > { %v4200_v33 = vpack.c.bf16 %v1087_v30, %v1084_v26 }
 0x11f   : > { %v4202_v34 = vpack.c.bf16 %v1079_v32, %v1076_v28 }
 0x120   : > { %v1239_v37 = vsel %vm1222_vm1, %v4200_v33, 0 }
 0x121   : > { %3581 = vmatprep.subr.msk.bf16.mxu1 %vm1222_vm1, %v4202_v34  ;;  %v1236_v35 = vsel %vm1222_vm1, %v4202_v34, 0 }
 0x122   : > { %3398 = vmatpush3.bf16.xpose.msra.mxu1 %v1236_v35 }
 0x123   : > { %3582 = vmatprep.subr.msk.bf16.mxu1 %vm1222_vm1, %v4200_v33 }
 0x12a   : > { %3400 = vmatpush3.bf16.xpose.msra.mxu1 %v1239_v37 }
 0x162   : > { %v816_v38 = vpop.xlane.xlu0 %815 }
 0x163   : > { %v838_v40 = vmul.f32 0.03125, %v816_v38 }
 0x165   : > { %v846_v41 = vadd.f32 1e-05, %v838_v40 }
 0x166   : > { %v819_v42 = vpop.xlane.xlu1 %818  ;;  %v822_v43 = vpop.xlane.xlu0 %821 }
 0x167   : > { %3662 = vrsqrt.f32 %v846_v41  ;;  %v839_v46 = vmul.f32 0.03125, %v819_v42  ;;  %v840_v47 = vmul.f32 0.03125, %v822_v43 }
 0x169   : > { %v847_v48 = vadd.f32 1e-05, %v839_v46  ;;  %v848_v49 = vadd.f32 1e-05, %v840_v47 }
 0x16a   : > { %v825_v50 = vpop.xlane.xlu1 %824  ;;  %v828_v51 = vpop.xlane.xlu0 %827 }
 0x16b   : > { %3664 = vrsqrt.f32 %v847_v48  ;;  %v841_v54 = vmul.f32 0.03125, %v825_v50  ;;  %v842_v55 = vmul.f32 0.03125, %v828_v51 }
 0x16c   : > { %3666 = vrsqrt.f32 %v848_v49 }
 0x16d   : > { %v849_v56 = vadd.f32 1e-05, %v841_v54  ;;  %v850_v57 = vadd.f32 1e-05, %v842_v55 }
 0x16e   : > { %v831_v58 = vpop.xlane.xlu1 %830  ;;  %v834_v59 = vpop.xlane.xlu0 %833 }
 0x16f   : > { %3668 = vrsqrt.f32 %v849_v56  ;;  %v843_v60 = vmul.f32 0.03125, %v831_v58  ;;  %v844_v61 = vmul.f32 0.03125, %v834_v59 }
 0x170   : > { %3670 = vrsqrt.f32 %v850_v57 }
 0x171   : > { %v3663_v0 = vpop.eup %3662  ;;  %v851_v1 = vadd.f32 1e-05, %v843_v60  ;;  %v852_v2 = vadd.f32 1e-05, %v844_v61 }
 0x172   : > { %v837_v3 = vpop.xlane.xlu1 %836  ;;  %v862_v4 = vmul.f32 %v3663_v0, %v4133_v44 }
 0x173   : > { %3672 = vrsqrt.f32 %v851_v1  ;;  %v845_v5 = vmul.f32 0.03125, %v837_v3 }
 0x174   : > { %3674 = vrsqrt.f32 %v852_v2  ;;  %v876_v13 = vmul.f32 %v3171_v6, %v862_v4 }
 0x175   : > { %v3665_v7 = vpop.eup %3664  ;;  %v853_v10 = vadd.f32 1e-05, %v845_v5 }
 0x176   : > { %v3667_v11 = vpop.eup %3666  ;;  %v863_v12 = vmul.f32 %v3665_v7, %v4141_v52  ;;  %v890_v19 = vadd.f32 %v3172_v14, %v876_v13 }
 0x177   : > { %3676 = vrsqrt.f32 %v853_v10  ;;  %v864_v44 = vmul.f32 %v3667_v11, %v4135_v45 }
 0x178   : > { %v877_v15 = vmul.f32 %v3171_v6, %v863_v12 }
 0x179   : > { %v3669_v16 = vpop.eup %3668  ;;  %v878_v23 = vmul.f32 %v3171_v6, %v864_v44 }
 0x17a   : > { %v3671_v17 = vpop.eup %3670  ;;  %v891_v20 = vadd.f32 %v3172_v14, %v877_v15  ;;  %v865_v22 = vmul.f32 %v3669_v16, %v4143_v53 }
 0x17b   : > { %v866_v25 = vmul.f32 %v3671_v17, %v4151_v62  ;;  %v892_v29 = vadd.f32 %v3172_v14, %v878_v23 }
 0x17c   : > { %v898_v26 = vpack.c.bf16 %v891_v20, %v890_v19  ;;  %v879_v52 = vmul.f32 %v3171_v6, %v865_v22 }
 0x17d   : > { %v3673_v27 = vpop.eup %3672  ;;  %v880_v31 = vmul.f32 %v3171_v6, %v866_v25 }
 0x17e   : > { %v3675_v28 = vpop.eup %3674  ;;  %3365 = vmatprep.mubr.msk.bf16.mxu0 %vm764_vm0, %v898_v26  ;;  %v893_v30 = vadd.f32 %v3172_v14, %v879_v52  ;;  %v867_v45 = vmul.f32 %v3673_v27, %v4153_v63 }
 0x17f   : > { %v868_v32 = vmul.f32 %v3675_v28, %v4161_v8  ;;  %v894_v53 = vadd.f32 %v3172_v14, %v880_v31  ;;  %v3648_v28 = vld [vmem:[%s5025_s7] sm:$0xff]   ;;  %v4287_v31 = vld [vmem:[%s5067_s27 + $0x10] sm:$0xff] }
 0x180   : > { %v899_v35 = vpack.c.bf16 %v893_v30, %v892_v29  ;;  %v881_v37 = vmul.f32 %v3171_v6, %v867_v45  ;;  %v3649_v29 = vld [vmem:[%s5025_s7 + $0x8] sm:$0xff]   ;;  %3385 = vmatprep.subr.bf16.mxu0 %v3648_v28  ;;  %v4282_v30 = vld [vmem:[%s5066_s0] sm:$0xff]  ;;  %s5070_s0 = sand.u32 1, %s3900_s30  }
 0x181   : > { %v3677_v38 = vpop.eup %3676  ;;  %v882_v41 = vmul.f32 %v3171_v6, %v868_v32 }
 0x182   : > { %3366 = vmatmul.mubr.msk.bf16.vlgmr.msra.gmra.mrb[0].mxu0 %vm764_vm0, %v899_v35  ;;  %v895_v62 = vadd.f32 %v3172_v14, %v881_v37  ;;  %v869_v40 = vmul.f32 %v3677_v38, %v4163_v9  ;;  %v4298_v35 = vld [vmem:[%s5067_s27 + $0x18] sm:$0xff] }
 0x183   : > { %v896_v46 = vadd.f32 %v3172_v14, %v882_v41  ;;  %3386 = vmatpush3.bf16.msra.mxu0 %v3648_v28 }
 0x184   : > { %v900_v42 = vpack.c.bf16 %v895_v62, %v894_v53  ;;  %v883_v43 = vmul.f32 %v3171_v6, %v869_v40  ;;  %3387 = vmatprep.subr.bf16.mxu0 %v3649_v29 }
 0x186   : > { %3369 = vmatprep.mubr.msk.bf16.mxu0 %vm764_vm0, %v900_v42  ;;  %v897_v47 = vadd.f32 %v3172_v14, %v883_v43  ;;  %v4308_v42 = vld [vmem:[%s5067_s27 + $0x20] sm:$0xff] }
 0x187   : > { %3388 = vmatpush3.bf16.msra.mxu0 %v3649_v29 }
 0x188   : > { %v901_v63 = vpack.c.bf16 %v897_v47, %v896_v46  ;;  %v4314_v47 = vld [vmem:[%s5067_s27 + $0x30] sm:$0xff] }
 0x18a   : > { %3370 = vmatmul.mubr.msk.bf16.gmra.mrb[4].mxu0 %vm764_vm0, %v901_v63 }
 0x18b   : > { %3389 = vmatprep.mubr.msk.bf16.mxu0 %vm764_vm0, %v4123_v36 }
 0x192   : > { %3390 = vmatmul.mubr.msk.bf16.vlgmr.msra.gmra.mrb[8].mxu0 %vm764_vm0, %v4129_v39  ;;  %v4292_v39 = vld [vmem:[%s5067_s27 + $0x8] sm:$0xff] }
 0x193   : > { %3393 = vmatprep.mubr.msk.bf16.mxu0 %vm764_vm0, %v4175_v18 }
 0x19a   : > { %3394 = vmatmul.mubr.msk.bf16.gmra.mrb[12].mxu0 %vm764_vm0, %v4179_v21 }
 0x1ab   : > { %v3383_v8 = vpop.f32.mrb[4].mxu1 }
 0x1ac   : > { %v1100_v48 = vadd.f32 %v3383_v8, %v4194_v24  ;;  %v1091_v49 = vpop.f32.mrb[5].mxu1  ;;  %v4319_v8 = vld [vmem:[%s5067_s27 + $0x28] sm:$0xff] }
 0x1ad   : > { %v1092_v50 = vadd.f32 %v4194_v24, %v1091_v49  ;;  %v3384_v9 = vpop.f32.mrb[6].mxu1 }
 0x1ae   : > { %v1103_v51 = vadd.f32 %v3384_v9, %v4194_v24  ;;  %v1094_v54 = vpop.f32.mrb[7].mxu1  ;;  %v4326_v9 = vld [vmem:[%s5067_s27 + $0x38] sm:$0xff] }
 0x1af   : > { %v1095_v55 = vadd.f32 %v4194_v24, %v1094_v54  ;;  %v3173_v24 = vld [vmem:[%s5026_s8] ss:$0 sm:$0xff] }
 0x1b0   : > { %v4236_v56 = vpack.c.bf16 %v1103_v51, %v1100_v48 }
 0x1b1   : > { %v4238_v57 = vpack.c.bf16 %v1095_v55, %v1092_v50 }
 0x1b2   : > { %v1245_v58 = vsel %vm1222_vm1, %v4236_v56, 0 }
 0x1b3   : > { %3583 = vmatprep.subr.msk.bf16.mxu1 %vm1222_vm1, %v4238_v57  ;;  %v1242_v36 = vsel %vm1222_vm1, %v4238_v57, 0 }
 0x1b4   : > { %3402 = vmatpush3.bf16.xpose.msra.mxu1 %v1242_v36 }
 0x1b5   : > { %3584 = vmatprep.subr.msk.bf16.mxu1 %vm1222_vm1, %v4236_v56 }
 0x1bc   : > { %3404 = vmatpush3.bf16.xpose.msra.mxu1 %v1245_v58 }
 0x255   : > { %v3367_v59 = vpop.f32.mrb[0].mxu0 }
 0x256   : > { %v984_v60 = vadd.f32 %v3367_v59, %v3173_v24  ;;  %v975_v61 = vpop.f32.mrb[1].mxu0 }
 0x257   : > { %v976_v0 = vadd.f32 %v3173_v24, %v975_v61  ;;  %v3368_v1 = vpop.f32.mrb[2].mxu0 }
 0x258   : > { %v987_v2 = vadd.f32 %v3368_v1, %v3173_v24  ;;  %v978_v3 = vpop.f32.mrb[3].mxu0  ;;  %v1196_v5 = vmul.f32 0.35355338, %v984_v60 }
 0x259   : > { %v979_v4 = vadd.f32 %v3173_v24, %v978_v3  ;;  %v1194_v7 = vmul.f32 0.35355338, %v976_v0  ;;  %v4344_v0 = vld [vmem:[%s5028_s10] ss:$0 sm:$0xff] }
 0x25a   : > { %v1197_v6 = vmul.f32 0.35355338, %v987_v2 }
 0x25b   : > { %v1195_v10 = vmul.f32 0.35355338, %v979_v4 }
 0x25c   : > { %v4251_v11 = vpack.c.bf16 %v1197_v6, %v1196_v5 }
 0x25d   : > { %v4253_v12 = vpack.c.bf16 %v1195_v10, %v1194_v7  ;;  %v3371_v13 = vpop.f32.mrb[4].mxu0 }
 0x25e   : > { %v1000_v14 = vadd.f32 %v3371_v13, %v3173_v24  ;;  %v991_v44 = vpop.f32.mrb[5].mxu0 }
 0x25f   : > { %v992_v15 = vadd.f32 %v3173_v24, %v991_v44  ;;  %v3372_v16 = vpop.f32.mrb[6].mxu0  ;;  %3405 = vmatprep.mubr.msk.bf16.mxu1 %vm1222_vm1, %v4253_v12 }
 0x260   : > { %v1003_v17 = vadd.f32 %v3372_v16, %v3173_v24  ;;  %v994_v19 = vpop.f32.mrb[7].mxu0  ;;  %3406 = vmatmul.mubr.msk.bf16.vlgmr.msra.gmra.mrb[8].mxu1 %vm1222_vm1, %v4251_v11  ;;  %v1200_v22 = vmul.f32 0.35355338, %v1000_v14 }
 0x261   : > { %v995_v20 = vadd.f32 %v3173_v24, %v994_v19  ;;  %v1198_v25 = vmul.f32 0.35355338, %v992_v15 }
 0x262   : > { %v1201_v23 = vmul.f32 0.35355338, %v1003_v17 }
 0x263   : > { %v1199_v26 = vmul.f32 0.35355338, %v995_v20 }
 0x264   : > { %v4259_v52 = vpack.c.bf16 %v1201_v23, %v1200_v22 }
 0x265   : > { %v4261_v27 = vpack.c.bf16 %v1199_v26, %v1198_v25  ;;  %v3391_v61 = vpop.f32.mrb[8].mxu0 }
 0x266   : > { %v1172_v1 = vadd.f32 %v3391_v61, %v4344_v0  ;;  %v1163_v2 = vpop.f32.mrb[9].mxu0 }
 0x267   : > { %3409 = vmatprep.mubr.msk.bf16.mxu1 %vm1222_vm1, %v4261_v27  ;;  %v1164_v3 = vadd.f32 %v4344_v0, %v1163_v2  ;;  %v3392_v4 = vpop.f32.mrb[10].mxu0 }
 0x268   : > { %3410 = vmatmul.mubr.msk.bf16.gmra.mrb[12].mxu1 %vm1222_vm1, %v4259_v52  ;;  %v1175_v5 = vadd.f32 %v3392_v4, %v4344_v0  ;;  %v1166_v6 = vpop.f32.mrb[11].mxu0 }
 0x269   : > { %v1167_v7 = vadd.f32 %v4344_v0, %v1166_v6 }
 0x26a   : > { %v4350_v10 = vpack.c.bf16 %v1175_v5, %v1172_v1 }
 0x26b   : > { %v4352_v13 = vpack.c.bf16 %v1167_v7, %v1164_v3 }
 0x26d   : > { %3413 = vmatprep.subr.bf16.mxu0 %v4352_v13 }
 0x26e   : > { %3414 = vmatpush3.bf16.msra.mxu0 %v4352_v13 }
 0x26f   : > { %3415 = vmatprep.subr.bf16.mxu0 %v4350_v10 }
 0x272   : > { %3416 = vmatpush3.bf16.msra.mxu0 %v4350_v10 }
 0x333   : > { %v3407_v45 = vpop.f32.mrb[8].mxu1 }
 0x334   : > { %v1281_v32 = vpop.f32.mrb[9].mxu1  ;;  %v1290_v38 = vadd.f32 %v3407_v45, %v4287_v31 }
 0x335   : > { %v1282_v18 = vadd.f32 %v1281_v32, %v4282_v30  ;;  %v3408_v21 = vpop.f32.mrb[10].mxu1 }
 0x336   : > { %v1284_v37 = vpop.f32.mrb[11].mxu1  ;;  %v1293_v40 = vadd.f32 %v3408_v21, %v4298_v35  ;;  %v1319_v46 = vsel %vm1312_vm2, %v1290_v38, -inf }
 0x337   : > { %v1285_v53 = vadd.f32 %v1284_v37, %v4292_v39  ;;  %v1313_v62 = vsel %vm1312_vm2, %v1282_v18, -inf }
 0x338   : > { %1314 = vmax.xlane.f32.xlu0 %v1313_v62  ;;  %v1322_v50 = vsel %vm1312_vm2, %v1293_v40, -inf }
 0x339   : > { %v1316_v41 = vsel %vm1312_vm2, %v1285_v53, -inf }
 0x33a   : > { %1317 = vmax.xlane.f32.xlu1 %v1316_v41 }
 0x33b   : > { %v3411_v43 = vpop.f32.mrb[12].mxu1 }
 0x33c   : > { %1320 = vmax.xlane.f32.xlu0 %v1319_v46  ;;  %v1297_v63 = vpop.f32.mrb[13].mxu1  ;;  %v1306_v54 = vadd.f32 %v3411_v43, %v4314_v47 }
 0x33d   : > { %v1298_v48 = vadd.f32 %v1297_v63, %v4308_v42  ;;  %v3412_v49 = vpop.f32.mrb[14].mxu1 }
 0x33e   : > { %1323 = vmax.xlane.f32.xlu1 %v1322_v50  ;;  %v1300_v51 = vpop.f32.mrb[15].mxu1  ;;  %v4334_v58 = vadd.f32 %v3412_v49, %v4326_v9  ;;  %v1331_v59 = vsel %vm1312_vm2, %v1306_v54, -inf }
 0x33f   : > { %v4330_v55 = vadd.f32 %v1300_v51, %v4319_v8  ;;  %v1325_v36 = vsel %vm1312_vm2, %v1298_v48, -inf }
 0x340   : > { %1326 = vmax.xlane.f32.xlu0 %v1325_v36  ;;  %v1334_v60 = vsel %vm1312_vm2, %v4334_v58, -inf }
 0x341   : > { %v1328_v24 = vsel %vm1312_vm2, %v4330_v55, -inf }
 0x342   : > { %1329 = vmax.xlane.f32.xlu1 %v1328_v24 }
 0x344   : > { %1332 = vmax.xlane.f32.xlu0 %v1331_v59 }
 0x346   : > { %1335 = vmax.xlane.f32.xlu1 %v1334_v60 }
 0x3c5   : > { %v1315_v14 = vpop.xlane.xlu0 %1314 }
 0x3c6   : > { %v1337_v44 = vsub.f32 %v1282_v18, %v1315_v14 }
 0x3c7   : > { %v1318_v15 = vpop.xlane.xlu1 %1317 }
 0x3c8   : > { %v1338_v17 = vsub.f32 %v1285_v53, %v1318_v15  ;;  %v1345_v20 = vmul.f32 1.442695, %v1337_v44 }
 0x3c9   : > { %v1321_v16 = vpop.xlane.xlu0 %1320 }
 0x3ca   : > { %v1339_v19 = vsub.f32 %v1290_v38, %v1321_v16  ;;  %v1347_v28 = vmul.f32 1.442695, %v1338_v17 }
 0x3cb   : > { %v1324_v22 = vpop.xlane.xlu1 %1323 }
 0x3cc   : > { %v1349_v23 = vmul.f32 1.442695, %v1339_v19  ;;  %v1340_v25 = vsub.f32 %v1293_v40, %v1324_v22 }
 0x3cd   : > { %v1327_v26 = vpop.xlane.xlu0 %1326 }
 0x3ce   : > { %3678 = vpow2.f32 %v1349_v23  ;;  %v1351_v29 = vmul.f32 1.442695, %v1340_v25  ;;  %v1341_v45 = vsub.f32 %v1298_v48, %v1327_v26 }
 0x3cf   : > { %3680 = vpow2.f32 %v1345_v20  ;;  %v1330_v5 = vpop.xlane.xlu1 %1329 }
 0x3d0   : > { %3682 = vpow2.f32 %v1351_v29  ;;  %v1353_v37 = vmul.f32 1.442695, %v1341_v45  ;;  %v1342_v7 = vsub.f32 %v4330_v55, %v1330_v5 }
 0x3d1   : > { %v1333_v32 = vpop.xlane.xlu0 %1332  ;;  %3684 = vpow2.f32 %v1347_v28 }
 0x3d2   : > { %v1343_v21 = vsub.f32 %v1306_v54, %v1333_v32  ;;  %v3395_v54 = vpop.f32.mrb[12].mxu0  ;;  %v1355_v44 = vmul.f32 1.442695, %v1342_v7 }
 0x3d3   : > { %v1179_v36 = vpop.f32.mrb[13].mxu0  ;;  %v1188_v2 = vadd.f32 %v3395_v54, %v4344_v0  ;;  %v1336_v6 = vpop.xlane.xlu1 %1335 }
 0x3d4   : > { %v1357_v18 = vmul.f32 1.442695, %v1343_v21  ;;  %v3396_v24 = vpop.f32.mrb[14].mxu0  ;;  %v1180_v60 = vadd.f32 %v4344_v0, %v1179_v36 }
 0x3d5   : > { %v1182_v59 = vpop.f32.mrb[15].mxu0  ;;  %v1191_v3 = vadd.f32 %v3396_v24, %v4344_v0 }
 0x3d6   : > { %3686 = vpow2.f32 %v1357_v18  ;;  %v1183_v61 = vadd.f32 %v4344_v0, %v1182_v59  ;;  %v1344_v0 = vsub.f32 %v4334_v58, %v1336_v6 }
 0x3d7   : > { %3688 = vpow2.f32 %v1353_v37  ;;  %v4392_v4 = vpack.c.bf16 %v1191_v3, %v1188_v2 }
 0x3d8   : > { %v4358_v62 = vpop.eup %3678  ;;  %v4384_v1 = vpack.c.bf16 %v1183_v61, %v1180_v60  ;;  %v1359_v14 = vmul.f32 1.442695, %v1344_v0 }
 0x3d9   : > { %v4360_v38 = vpop.eup %3680  ;;  %v1367_v53 = vsel %vm1312_vm2, %v4358_v62, 0.0 }
 0x3da   : > { %v4364_v40 = vpop.eup %3682  ;;  %1368 = vadd.xlane.f32.xlu0 %v1367_v53  ;;  %v1361_v46 = vsel %vm1312_vm2, %v4360_v38, 0.0  ;;  %3417 = vmatprep.subr.bf16.mxu0 %v4384_v1  ;;  %3690 = vpow2.f32 %v1359_v14 }
 0x3db   : > { %v1370_v41 = vsel %vm1312_vm2, %v4364_v40, 0.0  ;;  %v4368_v43 = vpop.eup %3684  ;;  %3418 = vmatpush3.bf16.msra.mxu0 %v4384_v1  ;;  %3692 = vpow2.f32 %v1355_v44 }
 0x3dc   : > { %1371 = vadd.xlane.f32.xlu1 %v1370_v41  ;;  %v1364_v63 = vsel %vm1312_vm2, %v4368_v43, 0.0  ;;  %3419 = vmatprep.subr.bf16.mxu0 %v4392_v4 }
 0x3de   : > { %1362 = vadd.xlane.f32.xlu0 %v1361_v46 }
 0x3df   : > { %3420 = vmatpush3.bf16.msra.mxu0 %v4392_v4 }
 0x3e0   : > { %v4374_v48 = vpop.eup %3686  ;;  %1365 = vadd.xlane.f32.xlu1 %v1364_v63 }
 0x3e1   : > { %v1379_v49 = vsel %vm1312_vm2, %v4374_v48, 0.0  ;;  %v4378_v50 = vpop.eup %3688 }
 0x3e2   : > { %1380 = vadd.xlane.f32.xlu0 %v1379_v49  ;;  %v1373_v51 = vsel %vm1312_vm2, %v4378_v50, 0.0 }
 0x3e4   : > { %v3691_v15 = vpop.eup %3690 }
 0x3e5   : > { %v1382_v16 = vsel %vm1312_vm2, %v3691_v15, 0.0  ;;  %v3693_v17 = vpop.eup %3692 }
 0x3e6   : > { %1374 = vadd.xlane.f32.xlu0 %v1373_v51  ;;  %v1376_v19 = vsel %vm1312_vm2, %v3693_v17, 0.0 }
 0x3f1   : > { %1516 = vrot.lane.b32.xlu1 %v4200_v33, %s3910_s2 }
 0x3f5   : > { %1518 = vrot.lane.b32.xlu1 %v4238_v57, %s3910_s2 }
 0x3fc   : > { %1514 = vrot.lane.b32.xlu0 %v4202_v34, %s3910_s2 }
 0x400   : > { %1502 = vrot.lane.b32.xlu0 %v4253_v12, %s3910_s2 }
 0x404   : > { %1506 = vrot.lane.b32.xlu0 %v4261_v27, %s3910_s2 }
 0x419   : > { %1383 = vadd.xlane.f32.xlu1 %v1382_v16 }
 0x41d   : > { %1377 = vadd.xlane.f32.xlu1 %v1376_v19 }
 0x42e   : > { %1520 = vrot.lane.b32.xlu1 %v4236_v56, %s3910_s2 }
 0x432   : > { %1504 = vrot.lane.b32.xlu1 %v4251_v11, %s3910_s2 }
 0x436   : > { %1508 = vrot.lane.b32.xlu1 %v4259_v52, %s3910_s2 }
 0x467   : > { %v1369_v55 = vpop.xlane.xlu0 %1368 }
 0x469   : > { %v1372_v58 = vpop.xlane.xlu1 %1371 }
 0x46a   : > { %3694 = vrcp.f32 %v1372_v58 }
 0x46b   : > { %v1363_v20 = vpop.xlane.xlu0 %1362 }
 0x46c   : > { %3696 = vrcp.f32 %v1363_v20 }
 0x46d   : > { %3698 = vrcp.f32 %v1369_v55  ;;  %v1366_v22 = vpop.xlane.xlu1 %1365 }
 0x46e   : > { %3700 = vrcp.f32 %v1366_v22 }
 0x46f   : > { %v1381_v23 = vpop.xlane.xlu0 %1380 }
 0x471   : > { %v1517_v49 = vpop.permute.xlu1 %1516 }
 0x473   : > { %v1375_v25 = vpop.xlane.xlu0 %1374 }
 0x474   : > { %v3695_v26 = vpop.eup %3694 }
 0x475   : > { %v1396_v21 = vmul.f32 %v3695_v26, %v4364_v40  ;;  %v1538_v40 = vsel %vm1222_vm1, %v1517_v49, 0  ;;  %v1519_v51 = vpop.permute.xlu1 %1518 }
 0x476   : > { %v3697_v28 = vpop.eup %3696 }
 0x477   : > { %v3699_v29 = vpop.eup %3698  ;;  %v1515_v45 = vpop.permute.xlu0 %1514  ;;  %v1393_v37 = vmul.f32 %v3697_v28, %v4360_v38 }
 0x478   : > { %v3701_v32 = vpop.eup %3700  ;;  %3585 = vmatprep.subr.msk.bf16.mxu0 %vm1222_vm1, %v1515_v45  ;;  %v1395_v53 = vmul.f32 %v3699_v29, %v4358_v62  ;;  %v1535_v63 = vsel %vm1222_vm1, %v1515_v45, 0  ;;  %v1541_v62 = vsel %vm1222_vm1, %v1519_v51, 0 }
 0x479   : > { %v1394_v18 = vmul.f32 %v3701_v32, %v4368_v43 }
 0x47a   : > { %v1402_v46 = vpack.c.bf16 %v1396_v21, %v1395_v53 }
 0x47b   : > { %v1401_v41 = vpack.c.bf16 %v1394_v18, %v1393_v37  ;;  %v1503_v14 = vpop.permute.xlu0 %1502 }
 0x47d   : > { %3421 = vmatprep.mubr.msk.bf16.mxu0 %vm1312_vm2, %v1401_v41 }
 0x47e   : > { %3422 = vmatmul.mubr.msk.bf16.vlgmr.msra.gmra.mrb[16].mxu0 %vm1312_vm2, %v1402_v46 }
 0x47f   : > { %3430 = vmatpush3.bf16.xpose.msra.mxu0 %v1535_v63  ;;  %v1507_v16 = vpop.permute.xlu0 %1506 }
 0x480   : > { %3586 = vmatprep.subr.msk.bf16.mxu0 %vm1222_vm1, %v1517_v49 }
 0x487   : > { %3432 = vmatpush3.bf16.xpose.msra.mxu0 %v1538_v40 }
 0x488   : > { %3587 = vmatprep.subr.msk.bf16.mxu0 %vm1222_vm1, %v1519_v51 }
 0x48f   : > { %3434 = vmatpush3.bf16.xpose.msra.mxu0 %v1541_v62 }
 0x4a6   : > { %v1384_v38 = vpop.xlane.xlu1 %1383 }
 0x4a7   : > { %3702 = vrcp.f32 %v1384_v38 }
 0x4a8   : > { %3704 = vrcp.f32 %v1375_v25 }
 0x4a9   : > { %3706 = vrcp.f32 %v1381_v23 }
 0x4aa   : > { %v1378_v43 = vpop.xlane.xlu1 %1377 }
 0x4ab   : > { %3708 = vrcp.f32 %v1378_v43 }
 0x4ae   : > { %v1521_v54 = vpop.permute.xlu1 %1520 }
 0x4af   : > { %3588 = vmatprep.subr.msk.bf16.mxu0 %vm1222_vm1, %v1521_v54  ;;  %v1544_v36 = vsel %vm1222_vm1, %v1521_v54, 0 }
 0x4b0   : > { %3436 = vmatpush3.bf16.xpose.msra.mxu0 %v1544_v36 }
 0x4b1   : > { %v3703_v24 = vpop.eup %3702 }
 0x4b2   : > { %v3705_v59 = vpop.eup %3704  ;;  %v1400_v2 = vmul.f32 %v3703_v24, %v3691_v15  ;;  %v1505_v44 = vpop.permute.xlu1 %1504 }
 0x4b3   : > { %v3707_v60 = vpop.eup %3706  ;;  %v1397_v3 = vmul.f32 %v3705_v59, %v4378_v50 }
 0x4b4   : > { %v1399_v6 = vmul.f32 %v3707_v60, %v4374_v48 }
 0x4b5   : > { %v3709_v61 = vpop.eup %3708 }
 0x4b6   : > { %v1398_v5 = vmul.f32 %v3709_v61, %v3693_v17  ;;  %v1404_v7 = vpack.c.bf16 %v1400_v2, %v1399_v6  ;;  %v1509_v15 = vpop.permute.xlu1 %1508 }
 0x4b8   : > { %v1403_v0 = vpack.c.bf16 %v1398_v5, %v1397_v3 }
 0x4ba   : > { %3425 = vmatprep.mubr.msk.bf16.mxu0 %vm1312_vm2, %v1403_v0 }
 0x4bb   : > { %3426 = vmatmul.mubr.msk.bf16.gmra.mrb[20].mxu0 %vm1312_vm2, %v1404_v7 }
 0x4bc   : > { %3437 = vmatprep.mubr.msk.bf16.mxu0 %vm1222_vm1, %v1503_v14 }
 0x4c3   : > { %3438 = vmatmul.mubr.msk.bf16.vlgmr.msra.gmra.mrb[24].mxu0 %vm1222_vm1, %v1505_v44 }
 0x4c4   : > { %3441 = vmatprep.mubr.msk.bf16.mxu0 %vm1222_vm1, %v1507_v16 }
 0x4cb   : > { %3442 = vmatmul.mubr.msk.bf16.gmra.mrb[28].mxu0 %vm1222_vm1, %v1509_v15 }
 0x551   : > { %v3423_v50 = vpop.f32.mrb[16].mxu0 }
 0x552   : > { %1484 = vst.msk [vmem:[#allocation2 + $0x10] sm:$0xff] %vm1222_vm1, %v3423_v50  ;;  %v1451_v48 = vpop.f32.mrb[17].mxu0 }
 0x553   : > { %1482 = vst.msk [vmem:[#allocation2] sm:$0xff] %vm1222_vm1, %v1451_v48  ;;  %v3424_v17 = vpop.f32.mrb[18].mxu0 }
 0x554   : > { %1485 = vst.msk [vmem:[#allocation2 + $0x18] sm:$0xff] %vm1222_vm1, %v3424_v17  ;;  %v1454_v19 = vpop.f32.mrb[19].mxu0 }
 0x555   : > { %1483 = vst.msk [vmem:[#allocation2 + $0x8] sm:$0xff] %vm1222_vm1, %v1454_v19 }
 0x58e   : > { %v3427_v55 = vpop.f32.mrb[20].mxu0 }
 0x58f   : > { %1488 = vst.msk [vmem:[#allocation2 + $0x30] sm:$0xff] %vm1222_vm1, %v3427_v55  ;;  %v1467_v58 = vpop.f32.mrb[21].mxu0 }
 0x590   : > { %1486 = vst.msk [vmem:[#allocation2 + $0x20] sm:$0xff] %vm1222_vm1, %v1467_v58  ;;  %v3428_v20 = vpop.f32.mrb[22].mxu0 }
 0x591   : > { %1489 = vst.msk [vmem:[#allocation2 + $0x38] sm:$0xff] %vm1222_vm1, %v3428_v20  ;;  %v1470_v22 = vpop.f32.mrb[23].mxu0 }
 0x592   : > { %1487 = vst.msk [vmem:[#allocation2 + $0x28] sm:$0xff] %vm1222_vm1, %v1470_v22 }
 0x596   : > { %v3439_v23 = vpop.f32.mrb[24].mxu0 }
 0x597   : > { %v1589_v25 = vadd.f32 %v3439_v23, %v4287_v31  ;;  %v1580_v26 = vpop.f32.mrb[25].mxu0 }
 0x598   : > { %v3440_v28 = vpop.f32.mrb[26].mxu0  ;;  %v1581_v29 = vadd.f32 %v1580_v26, %v4282_v30 }
 0x599   : > { %v1583_v45 = vpop.f32.mrb[27].mxu0  ;;  %v1617_v32 = vsel %vm1312_vm2, %v1589_v25, -inf  ;;  %v1592_v18 = vadd.f32 %v3440_v28, %v4298_v35 }
 0x59a   : > { %v1584_v21 = vadd.f32 %v1583_v45, %v4292_v39  ;;  %1618 = vmax.xlane.f32.xlu0 %v1617_v32  ;;  %v1611_v53 = vsel %vm1312_vm2, %v1581_v29, -inf }
 0x59b   : > { %v1620_v51 = vsel %vm1312_vm2, %v1592_v18, -inf }
 0x59c   : > { %v1614_v37 = vsel %vm1312_vm2, %v1584_v21, -inf }
 0x59d   : > { %1615 = vmax.xlane.f32.xlu1 %v1614_v37 }
 0x59e   : > { %1612 = vmax.xlane.f32.xlu0 %v1611_v53  ;;  %v3443_v41 = vpop.f32.mrb[28].mxu0 }
 0x59f   : > { %v1596_v46 = vpop.f32.mrb[29].mxu0  ;;  %v1605_v49 = vadd.f32 %v3443_v41, %v4314_v47 }
 0x5a0   : > { %v3444_v63 = vpop.f32.mrb[30].mxu0  ;;  %v1597_v62 = vadd.f32 %v1596_v46, %v4308_v42 }
 0x5a1   : > { %v1599_v40 = vpop.f32.mrb[31].mxu0  ;;  %v1629_v38 = vsel %vm1312_vm2, %v1605_v49, -inf  ;;  %v4463_v54 = vadd.f32 %v3444_v63, %v4326_v9 }
 0x5a2   : > { %1621 = vmax.xlane.f32.xlu0 %v1620_v51  ;;  %v1623_v43 = vsel %vm1312_vm2, %v1597_v62, -inf  ;;  %v4466_v36 = vadd.f32 %v1599_v40, %v4319_v8 }
 0x5a3   : > { %v1632_v24 = vsel %vm1312_vm2, %v4463_v54, -inf }
 0x5a4   : > { %v1626_v59 = vsel %vm1312_vm2, %v4466_v36, -inf }
 0x5a6   : > { %1630 = vmax.xlane.f32.xlu0 %v1629_v38 }
 0x5aa   : > { %1624 = vmax.xlane.f32.xlu0 %v1623_v43 }
 0x5ae   : > { %1709 = vrot.lane.b32.xlu1 %v4350_v10, %s3910_s2 }
 0x5b2   : > { %1711 = vrot.lane.b32.xlu1 %v4384_v1, %s3910_s2 }
 0x5c0   : > { %1707 = vrot.lane.b32.xlu0 %v4352_v13, %s3910_s2 }
 0x5d6   : > { %1633 = vmax.xlane.f32.xlu1 %v1632_v24 }
 0x5da   : > { %1627 = vmax.xlane.f32.xlu1 %v1626_v59 }
 0x5eb   : > { %1713 = vrot.lane.b32.xlu1 %v4392_v4, %s3910_s2  ;;  %s4975_s2 = scalar_lea.sflag [#allocation6], %s5070_s0 }
 0x627   : > { %v1619_v60 = vpop.xlane.xlu0 %1618 }
 0x628   : > { %v1637_v61 = vsub.f32 %v1589_v25, %v1619_v60 }
 0x62a   : > { %v1647_v2 = vmul.f32 1.442695, %v1637_v61  ;;  %v1616_v3 = vpop.xlane.xlu1 %1615 }
 0x62b   : > { %v1613_v5 = vpop.xlane.xlu0 %1612  ;;  %v1636_v0 = vsub.f32 %v1584_v21, %v1616_v3 }
 0x62c   : > { %3710 = vpow2.f32 %v1647_v2  ;;  %v1635_v6 = vsub.f32 %v1581_v29, %v1613_v5 }
 0x62d   : > { %v1645_v16 = vmul.f32 1.442695, %v1636_v0 }
 0x62e   : > { %v1643_v7 = vmul.f32 1.442695, %v1635_v6  ;;  %v1710_v25 = vpop.permute.xlu1 %1709 }
 0x62f   : > { %v1622_v14 = vpop.xlane.xlu0 %1621 }
 0x630   : > { %3712 = vpow2.f32 %v1643_v7  ;;  %v1638_v44 = vsub.f32 %v1592_v18, %v1622_v14 }
 0x632   : > { %v1649_v15 = vmul.f32 1.442695, %v1638_v44  ;;  %v1712_v21 = vpop.permute.xlu1 %1711 }
 0x633   : > { %v1631_v50 = vpop.xlane.xlu0 %1630 }
 0x634   : > { %3714 = vpow2.f32 %v1649_v15  ;;  %v1641_v48 = vsub.f32 %v1605_v49, %v1631_v50 }
 0x635   : > { %3716 = vpow2.f32 %v1645_v16 }
 0x636   : > { %v4474_v17 = vpop.eup %3710  ;;  %v1655_v19 = vmul.f32 1.442695, %v1641_v48 }
 0x637   : > { %v1625_v55 = vpop.xlane.xlu0 %1624  ;;  %v1665_v58 = vsel %vm1312_vm2, %v4474_v17, 0.0 }
 0x638   : > { %3718 = vpow2.f32 %v1655_v19  ;;  %v1639_v20 = vsub.f32 %v1597_v62, %v1625_v55  ;;  %1666 = vadd.xlane.f32.xlu0 %v1665_v58 }
 0x63a   : > { %v4478_v22 = vpop.eup %3712  ;;  %v1651_v23 = vmul.f32 1.442695, %v1639_v20 }
 0x63b   : > { %v1708_v26 = vpop.permute.xlu0 %1707  ;;  %v1659_v28 = vsel %vm1312_vm2, %v4478_v22, 0.0 }
 0x63c   : > { %3720 = vpow2.f32 %v1651_v23  ;;  %1660 = vadd.xlane.f32.xlu0 %v1659_v28  ;;  %3445 = vmatprep.subr.bf16.mxu1 %v1708_v26 }
 0x63d   : > { %3446 = vmatpush3.bf16.msra.mxu1 %v1708_v26 }
 0x63e   : > { %v3715_v29 = vpop.eup %3714  ;;  %3447 = vmatprep.subr.bf16.mxu1 %v1710_v25 }
 0x63f   : > { %v1668_v45 = vsel %vm1312_vm2, %v3715_v29, 0.0  ;;  %v3717_v32 = vpop.eup %3716 }
 0x640   : > { %1669 = vadd.xlane.f32.xlu1 %v1668_v45  ;;  %v1662_v18 = vsel %vm1312_vm2, %v3717_v32, 0.0 }
 0x641   : > { %3448 = vmatpush3.bf16.msra.mxu1 %v1710_v25 }
 0x642   : > { %v4483_v37 = vpop.eup %3718  ;;  %3449 = vmatprep.subr.bf16.mxu1 %v1712_v21 }
 0x643   : > { %v1677_v53 = vsel %vm1312_vm2, %v4483_v37, 0.0 }
 0x644   : > { %1663 = vadd.xlane.f32.xlu1 %v1662_v18  ;;  %1678 = vadd.xlane.f32.xlu0 %v1677_v53 }
 0x645   : > { %3450 = vmatpush3.bf16.msra.mxu1 %v1712_v21 }
 0x646   : > { %v4488_v41 = vpop.eup %3720 }
 0x647   : > { %v1671_v46 = vsel %vm1312_vm2, %v4488_v41, 0.0 }
 0x648   : > { %1672 = vadd.xlane.f32.xlu0 %v1671_v46 }
 0x655   : > { %1855 = vrot.lane.b32.xlu1 %v4200_v33, %s3911_s1 }
 0x659   : > { %1857 = vrot.lane.b32.xlu1 %v4238_v57, %s3911_s1 }
 0x663   : > { %v1634_v63 = vpop.xlane.xlu1 %1633 }
 0x664   : > { %v1642_v49 = vsub.f32 %v4463_v54, %v1634_v63 }
 0x666   : > { %v1657_v40 = vmul.f32 1.442695, %v1642_v49 }
 0x667   : > { %v1628_v51 = vpop.xlane.xlu1 %1627 }
 0x668   : > { %3722 = vpow2.f32 %v1657_v40  ;;  %v1640_v62 = vsub.f32 %v4466_v36, %v1628_v51 }
 0x66a   : > { %v1653_v38 = vmul.f32 1.442695, %v1640_v62 }
 0x66b   : > { %v1714_v43 = vpop.permute.xlu1 %1713 }
 0x66c   : > { %3451 = vmatprep.subr.bf16.mxu1 %v1714_v43  ;;  %3724 = vpow2.f32 %v1653_v38 }
 0x66d   : > { %3452 = vmatpush3.bf16.msra.mxu1 %v1714_v43 }
 0x672   : > { %v3723_v24 = vpop.eup %3722 }
 0x673   : > { %v1680_v59 = vsel %vm1312_vm2, %v3723_v24, 0.0 }
 0x674   : > { %1681 = vadd.xlane.f32.xlu0 %v1680_v59 }
 0x676   : > { %v3725_v60 = vpop.eup %3724 }
 0x677   : > { %v1674_v61 = vsel %vm1312_vm2, %v3725_v60, 0.0 }
 0x67d   : > { %1675 = vadd.xlane.f32.xlu1 %v1674_v61 }
 0x68a   : > { %1853 = vrot.lane.b32.xlu0 %v4202_v34, %s3911_s1 }
 0x68e   : > { %1859 = vrot.lane.b32.xlu1 %v4236_v56, %s3911_s1  ;;  %1845 = vrot.lane.b32.xlu0 %v4253_v12, %s3911_s1 }
 0x692   : > { %1847 = vrot.lane.b32.xlu1 %v4251_v11, %s3911_s1  ;;  %1849 = vrot.lane.b32.xlu0 %v4261_v27, %s3911_s1 }
 0x696   : > { %1851 = vrot.lane.b32.xlu1 %v4259_v52, %s3911_s1 }
 0x6c5   : > { %v1667_v54 = vpop.xlane.xlu0 %1666 }
 0x6c9   : > { %v1661_v36 = vpop.xlane.xlu0 %1660 }
 0x6cd   : > { %v1670_v2 = vpop.xlane.xlu1 %1669 }
 0x6ce   : > { %3726 = vrcp.f32 %v1670_v2 }
 0x6cf   : > { %3728 = vrcp.f32 %v1661_v36 }
 0x6d0   : > { %3730 = vrcp.f32 %v1667_v54 }
 0x6d1   : > { %v1664_v3 = vpop.xlane.xlu1 %1663  ;;  %v1679_v19 = vpop.xlane.xlu0 %1678 }
 0x6d2   : > { %3732 = vrcp.f32 %v1664_v3 }
 0x6d5   : > { %v1673_v55 = vpop.xlane.xlu0 %1672  ;;  %v1856_v58 = vpop.permute.xlu1 %1855 }
 0x6d8   : > { %v3727_v5 = vpop.eup %3726 }
 0x6d9   : > { %v3729_v6 = vpop.eup %3728  ;;  %v1694_v14 = vmul.f32 %v3727_v5, %v3715_v29  ;;  %v1858_v25 = vpop.permute.xlu1 %1857 }
 0x6da   : > { %v3731_v0 = vpop.eup %3730  ;;  %v1691_v44 = vmul.f32 %v3729_v6, %v4478_v22  ;;  %v1877_v22 = vsel %vm1222_vm1, %v1856_v58, 0  ;;  %v1880_v18 = vsel %vm1222_vm1, %v1858_v25, 0 }
 0x6db   : > { %v1693_v15 = vmul.f32 %v3731_v0, %v4474_v17 }
 0x6dc   : > { %v3733_v7 = vpop.eup %3732 }
 0x6dd   : > { %v1692_v16 = vmul.f32 %v3733_v7, %v3717_v32  ;;  %v1700_v48 = vpack.c.bf16 %v1694_v14, %v1693_v15 }
 0x6df   : > { %v1699_v50 = vpack.c.bf16 %v1692_v16, %v1691_v44 }
 0x6e1   : > { %3453 = vmatprep.mubr.msk.bf16.mxu1 %vm1312_vm2, %v1699_v50 }
 0x6e2   : > { %3454 = vmatmul.mubr.msk.bf16.vlgmr.msra.gmra.mrb[16].mxu1 %vm1312_vm2, %v1700_v48 }
 0x701   : > { %v1682_v20 = vpop.xlane.xlu0 %1681 }
 0x702   : > { %3734 = vrcp.f32 %v1682_v20 }
 0x703   : > { %3736 = vrcp.f32 %v1673_v55 }
 0x704   : > { %3738 = vrcp.f32 %v1679_v19 }
 0x705   : > { %v1854_v23 = vpop.permute.xlu0 %1853 }
 0x706   : > { %v1874_v26 = vsel %vm1222_vm1, %v1854_v23, 0  ;;  %3589 = vmatprep.subr.msk.bf16.mxu1 %vm1222_vm1, %v1854_v23 }
 0x707   : > { %3462 = vmatpush3.bf16.xpose.msra.mxu1 %v1874_v26 }
 0x708   : > { %3590 = vmatprep.subr.msk.bf16.mxu1 %vm1222_vm1, %v1856_v58 }
 0x709   : > { %v1846_v62 = vpop.permute.xlu0 %1845 }
 0x70a   : > { %v1676_v17 = vpop.xlane.xlu1 %1675 }
 0x70b   : > { %3740 = vrcp.f32 %v1676_v17 }
 0x70c   : > { %v3735_v28 = vpop.eup %3734 }
 0x70d   : > { %v3737_v29 = vpop.eup %3736  ;;  %v1698_v21 = vmul.f32 %v3735_v28, %v3723_v24  ;;  %v1850_v43 = vpop.permute.xlu0 %1849 }
 0x70e   : > { %v3739_v45 = vpop.eup %3738  ;;  %v1695_v53 = vmul.f32 %v3737_v29, %v4488_v41  ;;  %v1860_v63 = vpop.permute.xlu1 %1859 }
 0x70f   : > { %3464 = vmatpush3.bf16.xpose.msra.mxu1 %v1877_v22  ;;  %v1697_v49 = vmul.f32 %v3739_v45, %v4483_v37  ;;  %v1883_v38 = vsel %vm1222_vm1, %v1860_v63, 0 }
 0x710   : > { %3591 = vmatprep.subr.msk.bf16.mxu1 %vm1222_vm1, %v1858_v25 }
 0x711   : > { %v1702_v51 = vpack.c.bf16 %v1698_v21, %v1697_v49 }
 0x712   : > { %v1848_v41 = vpop.permute.xlu1 %1847 }
 0x715   : > { %v3741_v32 = vpop.eup %3740 }
 0x716   : > { %v1696_v46 = vmul.f32 %v3741_v32, %v3725_v60  ;;  %v1852_v37 = vpop.permute.xlu1 %1851 }
 0x717   : > { %3466 = vmatpush3.bf16.xpose.msra.mxu1 %v1880_v18 }
 0x718   : > { %3592 = vmatprep.subr.msk.bf16.mxu1 %vm1222_vm1, %v1860_v63  ;;  %v1701_v40 = vpack.c.bf16 %v1696_v46, %v1695_v53 }
 0x71a   : > { %3457 = vmatprep.mubr.msk.bf16.mxu1 %vm1312_vm2, %v1701_v40 }
 0x71b   : > { %3458 = vmatmul.mubr.msk.bf16.gmra.mrb[20].mxu1 %vm1312_vm2, %v1702_v51 }
 0x71c   : > { %3469 = vmatprep.mubr.msk.bf16.mxu1 %vm1222_vm1, %v1846_v62 }
 0x71f   : > { %3468 = vmatpush3.bf16.xpose.msra.mxu1 %v1883_v38 }
 0x726   : > { %3470 = vmatmul.mubr.msk.bf16.vlgmr.msra.gmra.mrb[24].mxu1 %vm1222_vm1, %v1848_v41 }
 0x727   : > { %3473 = vmatprep.mubr.msk.bf16.mxu1 %vm1222_vm1, %v1850_v43 }
 0x72e   : > { %3474 = vmatmul.mubr.msk.bf16.gmra.mrb[28].mxu1 %vm1222_vm1, %v1852_v37 }
 0x7b5   : > { %v4532_v24 = vpop.f32.mrb[16].mxu1 }
 0x7b6   : > { %v4534_v59 = vpop.f32.mrb[17].mxu1 }
 0x7b7   : > { %v4536_v60 = vpop.f32.mrb[18].mxu1 }
 0x7b8   : > { %v4538_v61 = vpop.f32.mrb[19].mxu1 }
 0x7ee   : > { %v4540_v54 = vpop.f32.mrb[20].mxu1 }
 0x7ef   : > { %v4542_v36 = vpop.f32.mrb[21].mxu1 }
 0x7f0   : > { %v4544_v2 = vpop.f32.mrb[22].mxu1 }
 0x7f1   : > { %v4546_v3 = vpop.f32.mrb[23].mxu1 }
 0x7f9   : > { %v3471_v5 = vpop.f32.mrb[24].mxu1 }
 0x7fa   : > { %v1928_v6 = vadd.f32 %v3471_v5, %v4287_v31  ;;  %v1919_v0 = vpop.f32.mrb[25].mxu1 }
 0x7fb   : > { %v3472_v7 = vpop.f32.mrb[26].mxu1  ;;  %v1920_v14 = vadd.f32 %v1919_v0, %v4282_v30 }
 0x7fc   : > { %v1922_v44 = vpop.f32.mrb[27].mxu1  ;;  %v1956_v16 = vsel %vm1312_vm2, %v1928_v6, -inf  ;;  %v1931_v48 = vadd.f32 %v3472_v7, %v4298_v35 }
 0x7fd   : > { %v1923_v15 = vadd.f32 %v1922_v44, %v4292_v39  ;;  %1957 = vmax.xlane.f32.xlu0 %v1956_v16  ;;  %v1950_v19 = vsel %vm1312_vm2, %v1920_v14, -inf }
 0x7fe   : > { %v1959_v23 = vsel %vm1312_vm2, %v1931_v48, -inf }
 0x7ff   : > { %v1953_v50 = vsel %vm1312_vm2, %v1923_v15, -inf }
 0x800   : > { %1954 = vmax.xlane.f32.xlu1 %v1953_v50 }
 0x801   : > { %1951 = vmax.xlane.f32.xlu0 %v1950_v19  ;;  %v3475_v55 = vpop.f32.mrb[28].mxu1 }
 0x802   : > { %v1935_v31 = vpop.f32.mrb[29].mxu1  ;;  %v1944_v20 = vadd.f32 %v3475_v55, %v4314_v47 }
 0x803   : > { %v3476_v58 = vpop.f32.mrb[30].mxu1  ;;  %v1936_v39 = vadd.f32 %v1935_v31, %v4308_v42 }
 0x804   : > { %v1938_v30 = vpop.f32.mrb[31].mxu1  ;;  %v1968_v25 = vsel %vm1312_vm2, %v1944_v20, -inf  ;;  %v4567_v47 = vadd.f32 %v3476_v58, %v4326_v9 }
 0x805   : > { %1960 = vmax.xlane.f32.xlu0 %v1959_v23  ;;  %v1962_v35 = vsel %vm1312_vm2, %v1936_v39, -inf  ;;  %v4570_v42 = vadd.f32 %v1938_v30, %v4319_v8 }
 0x806   : > { %v1971_v26 = vsel %vm1312_vm2, %v4567_v47, -inf }
 0x807   : > { %v1965_v17 = vsel %vm1312_vm2, %v4570_v42, -inf }
 0x809   : > { %1969 = vmax.xlane.f32.xlu0 %v1968_v25 }
 0x80d   : > { %1963 = vmax.xlane.f32.xlu0 %v1962_v35 }
 0x811   : > { %2044 = vrot.lane.b32.xlu1 %v4350_v10, %s3911_s1 }
 0x815   : > { %2046 = vrot.lane.b32.xlu1 %v4384_v1, %s3911_s1 }
 0x823   : > { %2042 = vrot.lane.b32.xlu0 %v4352_v13, %s3911_s1 }
 0x839   : > { %1972 = vmax.xlane.f32.xlu1 %v1971_v26 }
 0x83d   : > { %1966 = vmax.xlane.f32.xlu1 %v1965_v17 }
 0x84e   : > { %2048 = vrot.lane.b32.xlu1 %v4392_v4, %s3911_s1  ;;  %s744_s1 = scalar_lea.vmem [#allocation5], %s4091_s25  ;;  %s5069_s25 = sadd.s32 4294967295, %s3908_s21  }
 0x88a   : > { %v1958_v22 = vpop.xlane.xlu0 %1957 }
 0x88b   : > { %v1976_v28 = vsub.f32 %v1928_v6, %v1958_v22 }
 0x88d   : > { %v1986_v29 = vmul.f32 1.442695, %v1976_v28  ;;  %v1955_v45 = vpop.xlane.xlu1 %1954 }
 0x88e   : > { %v1952_v9 = vpop.xlane.xlu0 %1951  ;;  %v1975_v8 = vsub.f32 %v1923_v15, %v1955_v45 }
 0x88f   : > { %3742 = vpow2.f32 %v1986_v29  ;;  %v1974_v32 = vsub.f32 %v1920_v14, %v1952_v9 }
 0x890   : > { %v1984_v46 = vmul.f32 1.442695, %v1975_v8 }
 0x891   : > { %v1982_v21 = vmul.f32 1.442695, %v1974_v32  ;;  %v2045_v6 = vpop.permute.xlu1 %2044 }
 0x892   : > { %v1961_v18 = vpop.xlane.xlu0 %1960 }
 0x893   : > { %3744 = vpow2.f32 %v1982_v21  ;;  %v1977_v53 = vsub.f32 %v1931_v48, %v1961_v18 }
 0x895   : > { %v1988_v63 = vmul.f32 1.442695, %v1977_v53  ;;  %v2047_v15 = vpop.permute.xlu1 %2046 }
 0x896   : > { %v1970_v49 = vpop.xlane.xlu0 %1969 }
 0x897   : > { %3746 = vpow2.f32 %v1988_v63  ;;  %v1980_v40 = vsub.f32 %v1944_v20, %v1970_v49 }
 0x898   : > { %3748 = vpow2.f32 %v1984_v46 }
 0x899   : > { %v4578_v51 = vpop.eup %3742  ;;  %v1994_v62 = vmul.f32 1.442695, %v1980_v40 }
 0x89a   : > { %v1964_v38 = vpop.xlane.xlu0 %1963  ;;  %v2004_v41 = vsel %vm1312_vm2, %v4578_v51, 0.0 }
 0x89b   : > { %3750 = vpow2.f32 %v1994_v62  ;;  %v1978_v43 = vsub.f32 %v1936_v39, %v1964_v38  ;;  %2005 = vadd.xlane.f32.xlu0 %v2004_v41 }
 0x89d   : > { %v4582_v37 = vpop.eup %3744  ;;  %v1990_v5 = vmul.f32 1.442695, %v1978_v43 }
 0x89e   : > { %v2043_v0 = vpop.permute.xlu0 %2042  ;;  %v1998_v7 = vsel %vm1312_vm2, %v4582_v37, 0.0 }
 0x89f   : > { %3752 = vpow2.f32 %v1990_v5  ;;  %1999 = vadd.xlane.f32.xlu0 %v1998_v7  ;;  %3477 = vmatprep.subr.bf16.mxu0 %v2043_v0 }
 0x8a0   : > { %3478 = vmatpush3.bf16.msra.mxu0 %v2043_v0 }
 0x8a1   : > { %v3747_v14 = vpop.eup %3746  ;;  %3479 = vmatprep.subr.bf16.mxu0 %v2045_v6 }
 0x8a2   : > { %v2007_v44 = vsel %vm1312_vm2, %v3747_v14, 0.0  ;;  %v3749_v16 = vpop.eup %3748 }
 0x8a3   : > { %2008 = vadd.xlane.f32.xlu1 %v2007_v44  ;;  %v2001_v48 = vsel %vm1312_vm2, %v3749_v16, 0.0 }
 0x8a4   : > { %3480 = vmatpush3.bf16.msra.mxu0 %v2045_v6 }
 0x8a5   : > { %v4587_v50 = vpop.eup %3750  ;;  %3481 = vmatprep.subr.bf16.mxu0 %v2047_v15 }
 0x8a6   : > { %v2016_v19 = vsel %vm1312_vm2, %v4587_v50, 0.0 }
 0x8a7   : > { %2002 = vadd.xlane.f32.xlu1 %v2001_v48  ;;  %2017 = vadd.xlane.f32.xlu0 %v2016_v19 }
 0x8a8   : > { %3482 = vmatpush3.bf16.msra.mxu0 %v2047_v15 }
 0x8a9   : > { %v4592_v55 = vpop.eup %3752 }
 0x8aa   : > { %v2010_v31 = vsel %vm1312_vm2, %v4592_v55, 0.0 }
 0x8ab   : > { %2011 = vadd.xlane.f32.xlu0 %v2010_v31 }
 0x8b8   : > { %2190 = vrot.lane.b32.xlu1 %v4200_v33, %s5045_s28 }
 0x8bc   : > { %2192 = vrot.lane.b32.xlu1 %v4238_v57, %s5045_s28 }
 0x8c6   : > { %v1973_v58 = vpop.xlane.xlu1 %1972 }
 0x8c7   : > { %v1981_v20 = vsub.f32 %v4567_v47, %v1973_v58 }
 0x8c9   : > { %v1996_v30 = vmul.f32 1.442695, %v1981_v20 }
 0x8ca   : > { %v1967_v23 = vpop.xlane.xlu1 %1966 }
 0x8cb   : > { %3754 = vpow2.f32 %v1996_v30  ;;  %v1979_v39 = vsub.f32 %v4570_v42, %v1967_v23 }
 0x8cd   : > { %v1992_v25 = vmul.f32 1.442695, %v1979_v39 }
 0x8ce   : > { %v2049_v35 = vpop.permute.xlu1 %2048 }
 0x8cf   : > { %3483 = vmatprep.subr.bf16.mxu0 %v2049_v35  ;;  %3756 = vpow2.f32 %v1992_v25 }
 0x8d0   : > { %3484 = vmatpush3.bf16.msra.mxu0 %v2049_v35 }
 0x8d5   : > { %v3755_v26 = vpop.eup %3754 }
 0x8d6   : > { %v2019_v17 = vsel %vm1312_vm2, %v3755_v26, 0.0 }
 0x8d7   : > { %2020 = vadd.xlane.f32.xlu0 %v2019_v17 }
 0x8d9   : > { %v3757_v33 = vpop.eup %3756 }
 0x8da   : > { %v2013_v57 = vsel %vm1312_vm2, %v3757_v33, 0.0 }
 0x8e0   : > { %2014 = vadd.xlane.f32.xlu1 %v2013_v57 }
 0x8ed   : > { %2188 = vrot.lane.b32.xlu0 %v4202_v34, %s5045_s28 }
 0x8f1   : > { %2194 = vrot.lane.b32.xlu1 %v4236_v56, %s5045_s28  ;;  %2180 = vrot.lane.b32.xlu0 %v4253_v12, %s5045_s28 }
 0x8f5   : > { %2182 = vrot.lane.b32.xlu1 %v4251_v11, %s5045_s28  ;;  %2184 = vrot.lane.b32.xlu0 %v4261_v27, %s5045_s28 }
 0x8f9   : > { %2186 = vrot.lane.b32.xlu1 %v4259_v52, %s5045_s28  ;;  %s5068_s28 = smov 104  }
 0x928   : > { %v2006_v47 = vpop.xlane.xlu0 %2005 }
 0x92c   : > { %v2000_v42 = vpop.xlane.xlu0 %1999 }
 0x930   : > { %v2009_v22 = vpop.xlane.xlu1 %2008 }
 0x931   : > { %3758 = vrcp.f32 %v2009_v22 }
 0x932   : > { %3760 = vrcp.f32 %v2000_v42 }
 0x933   : > { %3762 = vrcp.f32 %v2006_v47  ;;  %v2173_v47 = vld [vmem:[%s5067_s27 + $0x8] sm:$0xff] }
 0x934   : > { %v2003_v34 = vpop.xlane.xlu1 %2002  ;;  %v2018_v8 = vpop.xlane.xlu0 %2017 }
 0x935   : > { %3764 = vrcp.f32 %v2003_v34 }
 0x938   : > { %v2012_v21 = vpop.xlane.xlu0 %2011  ;;  %v2191_v18 = vpop.permute.xlu1 %2190 }
 0x93b   : > { %v3759_v56 = vpop.eup %3758 }
 0x93c   : > { %v3761_v28 = vpop.eup %3760  ;;  %v2033_v45 = vmul.f32 %v3759_v56, %v3747_v14  ;;  %v2193_v63 = vpop.permute.xlu1 %2192 }
 0x93d   : > { %v3763_v12 = vpop.eup %3762  ;;  %v2030_v11 = vmul.f32 %v3761_v28, %v4582_v37  ;;  %v2215_v5 = vsel %vm1222_vm1, %v2193_v63, 0 }
 0x93e   : > { %v2032_v27 = vmul.f32 %v3763_v12, %v4578_v51  ;;  %v2212_v51 = vsel %vm1222_vm1, %v2191_v18, 0 }
 0x93f   : > { %v3765_v29 = vpop.eup %3764 }
 0x940   : > { %v2031_v9 = vmul.f32 %v3765_v29, %v3749_v16  ;;  %v2039_v52 = vpack.c.bf16 %v2033_v45, %v2032_v27  ;;  %v2175_v29 = vld [vmem:[%s5067_s27 + $0x18] sm:$0xff] }
 0x942   : > { %v2038_v32 = vpack.c.bf16 %v2031_v9, %v2030_v11 }
 0x944   : > { %3485 = vmatprep.mubr.msk.bf16.mxu0 %vm1312_vm2, %v2038_v32 }
 0x945   : > { %3486 = vmatmul.mubr.msk.bf16.vlgmr.msra.gmra.mrb[32].mxu0 %vm1312_vm2, %v2039_v52  ;;  %v2176_v52 = vld [vmem:[%s5067_s27 + $0x20] sm:$0xff] }
 0x964   : > { %v2021_v53 = vpop.xlane.xlu0 %2020 }
 0x965   : > { %3766 = vrcp.f32 %v2021_v53 }
 0x966   : > { %3768 = vrcp.f32 %v2012_v21 }
 0x967   : > { %3770 = vrcp.f32 %v2018_v8  ;;  %v2177_v8 = vld [vmem:[%s5067_s27 + $0x28] sm:$0xff] }
 0x968   : > { %v2189_v46 = vpop.permute.xlu0 %2188 }
 0x969   : > { %v2209_v49 = vsel %vm1222_vm1, %v2189_v46, 0  ;;  %3593 = vmatprep.subr.msk.bf16.mxu0 %vm1222_vm1, %v2189_v46 }
 0x96a   : > { %3494 = vmatpush3.bf16.xpose.msra.mxu0 %v2209_v49 }
 0x96b   : > { %3594 = vmatprep.subr.msk.bf16.mxu0 %vm1222_vm1, %v2191_v18  ;;  %v2179_v18 = vld [vmem:[%s5067_s27 + $0x38] sm:$0xff] }
 0x96c   : > { %v2181_v15 = vpop.permute.xlu0 %2180 }
 0x96d   : > { %v2015_v40 = vpop.xlane.xlu1 %2014 }
 0x96e   : > { %3772 = vrcp.f32 %v2015_v40  ;;  %v2178_v40 = vld [vmem:[%s5067_s27 + $0x30] sm:$0xff] }
 0x96f   : > { %v3767_v62 = vpop.eup %3766 }
 0x970   : > { %v3769_v38 = vpop.eup %3768  ;;  %v2037_v37 = vmul.f32 %v3767_v62, %v3755_v26  ;;  %v2172_v26 = vld [vmem:[%s5067_s27] sm:$0xff] }
 0x971   : > { %v3771_v41 = vpop.eup %3770  ;;  %v2034_v6 = vmul.f32 %v3769_v38, %v4592_v55  ;;  %v2195_v7 = vpop.permute.xlu1 %2194 }
 0x972   : > { %3496 = vmatpush3.bf16.xpose.msra.mxu0 %v2212_v51  ;;  %v2036_v14 = vmul.f32 %v3771_v41, %v4587_v50  ;;  %v2218_v48 = vsel %vm1222_vm1, %v2195_v7, 0  ;;  %v2185_v55 = vpop.permute.xlu0 %2184 }
 0x973   : > { %3595 = vmatprep.subr.msk.bf16.mxu0 %vm1222_vm1, %v2193_v63 }
 0x974   : > { %v2041_v16 = vpack.c.bf16 %v2037_v37, %v2036_v14 }
 0x975   : > { %v2183_v19 = vpop.permute.xlu1 %2182 }
 0x978   : > { %v3773_v43 = vpop.eup %3772 }
 0x979   : > { %v2035_v0 = vmul.f32 %v3773_v43, %v3757_v33  ;;  %v2187_v50 = vpop.permute.xlu1 %2186  ;;  %v2174_v33 = vld [vmem:[%s5067_s27 + $0x10] sm:$0xff] }
 0x97a   : > { %3498 = vmatpush3.bf16.xpose.msra.mxu0 %v2215_v5 }
 0x97b   : > { %3596 = vmatprep.subr.msk.bf16.mxu0 %vm1222_vm1, %v2195_v7  ;;  %v2040_v44 = vpack.c.bf16 %v2035_v0, %v2034_v6 }
 0x97d   : > { %3489 = vmatprep.mubr.msk.bf16.mxu0 %vm1312_vm2, %v2040_v44 }
 0x97e   : > { %3490 = vmatmul.mubr.msk.bf16.gmra.mrb[36].mxu0 %vm1312_vm2, %v2041_v16 }
 0x97f   : > { %3501 = vmatprep.mubr.msk.bf16.mxu0 %vm1222_vm1, %v2181_v15 }
 0x982   : > { %3500 = vmatpush3.bf16.xpose.msra.mxu0 %v2218_v48 }
 0x989   : > { %3502 = vmatmul.mubr.msk.bf16.vlgmr.msra.gmra.mrb[40].mxu0 %vm1222_vm1, %v2183_v19 }
 0x98a   : > { %3505 = vmatprep.mubr.msk.bf16.mxu0 %vm1222_vm1, %v2185_v55 }
 0x991   : > { %3506 = vmatmul.mubr.msk.bf16.gmra.mrb[44].mxu0 %vm1222_vm1, %v2187_v50 }
 0xa18   : > { %v4636_v31 = vpop.f32.mrb[32].mxu0 }
 0xa19   : > { %v4638_v58 = vpop.f32.mrb[33].mxu0 }
 0xa1a   : > { %v4640_v20 = vpop.f32.mrb[34].mxu0 }
 0xa1b   : > { %v4642_v30 = vpop.f32.mrb[35].mxu0 }
 0xa51   : > { %v4644_v23 = vpop.f32.mrb[36].mxu0 }
 0xa52   : > { %v4646_v39 = vpop.f32.mrb[37].mxu0 }
 0xa53   : > { %v4648_v25 = vpop.f32.mrb[38].mxu0 }
 0xa54   : > { %v4650_v35 = vpop.f32.mrb[39].mxu0 }
 0xa5c   : > { %v3503_v17 = vpop.f32.mrb[40].mxu0 }
 0xa5d   : > { %v2254_v57 = vpop.f32.mrb[41].mxu0  ;;  %v2263_v56 = vadd.f32 %v3503_v17, %v2174_v33 }
 0xa5e   : > { %v2255_v42 = vadd.f32 %v2254_v57, %v2172_v26  ;;  %v3504_v22 = vpop.f32.mrb[42].mxu0 }
 0xa5f   : > { %v2257_v34 = vpop.f32.mrb[43].mxu0  ;;  %v2266_v11 = vadd.f32 %v3504_v22, %v2175_v29  ;;  %v2291_v27 = vsel %vm1312_vm2, %v2263_v56, -inf }
 0xa60   : > { %v2258_v28 = vadd.f32 %v2257_v34, %v2173_v47  ;;  %v2285_v12 = vsel %vm1312_vm2, %v2255_v42, -inf }
 0xa61   : > { %2286 = vmax.xlane.f32.xlu0 %v2285_v12  ;;  %v2294_v49 = vsel %vm1312_vm2, %v2266_v11, -inf }
 0xa62   : > { %v2288_v45 = vsel %vm1312_vm2, %v2258_v28, -inf }
 0xa63   : > { %2289 = vmax.xlane.f32.xlu1 %v2288_v45 }
 0xa64   : > { %v3507_v9 = vpop.f32.mrb[44].mxu0 }
 0xa65   : > { %2292 = vmax.xlane.f32.xlu0 %v2291_v27  ;;  %v2270_v32 = vpop.f32.mrb[45].mxu0  ;;  %v2279_v38 = vadd.f32 %v3507_v9, %v2178_v40 }
 0xa66   : > { %v3508_v21 = vpop.f32.mrb[46].mxu0  ;;  %v2271_v46 = vadd.f32 %v2270_v32, %v2176_v52 }
 0xa67   : > { %v2273_v53 = vpop.f32.mrb[47].mxu0  ;;  %v2282_v51 = vadd.f32 %v3508_v21, %v2179_v18  ;;  %v2303_v37 = vsel %vm1312_vm2, %v2279_v38, -inf }
 0xa68   : > { %v4676_v63 = vadd.f32 %v2273_v53, %v2177_v8  ;;  %v2297_v41 = vsel %vm1312_vm2, %v2271_v46, -inf }
 0xa69   : > { %2295 = vmax.xlane.f32.xlu0 %v2294_v49  ;;  %v2306_v43 = vsel %vm1312_vm2, %v2282_v51, -inf }
 0xa6a   : > { %v2300_v62 = vsel %vm1312_vm2, %v4676_v63, -inf }
 0xa6b   : > { %2301 = vmax.xlane.f32.xlu1 %v2300_v62 }
 0xa6d   : > { %2298 = vmax.xlane.f32.xlu0 %v2297_v41 }
 0xa6f   : > { %2307 = vmax.xlane.f32.xlu1 %v2306_v43 }
 0xa71   : > { %2304 = vmax.xlane.f32.xlu0 %v2303_v37 }
 0xaee   : > { %v2287_v5 = vpop.xlane.xlu0 %2286 }
 0xaef   : > { %v2309_v6 = vsub.f32 %v2255_v42, %v2287_v5 }
 0xaf0   : > { %v2290_v0 = vpop.xlane.xlu1 %2289 }
 0xaf1   : > { %v2317_v44 = vmul.f32 1.442695, %v2309_v6  ;;  %v2310_v16 = vsub.f32 %v2258_v28, %v2290_v0 }
 0xaf2   : > { %v2293_v7 = vpop.xlane.xlu0 %2292 }
 0xaf3   : > { %v2311_v14 = vsub.f32 %v2263_v56, %v2293_v7  ;;  %v2319_v55 = vmul.f32 1.442695, %v2310_v16 }
 0xaf5   : > { %v2321_v15 = vmul.f32 1.442695, %v2311_v14 }
 0xaf6   : > { %v2296_v48 = vpop.xlane.xlu0 %2295 }
 0xaf7   : > { %3774 = vpow2.f32 %v2321_v15  ;;  %v2312_v19 = vsub.f32 %v2266_v11, %v2296_v48 }
 0xaf8   : > { %3776 = vpow2.f32 %v2317_v44  ;;  %v2302_v8 = vpop.xlane.xlu1 %2301 }
 0xaf9   : > { %v2323_v50 = vmul.f32 1.442695, %v2312_v19  ;;  %v2314_v53 = vsub.f32 %v4676_v63, %v2302_v8 }
 0xafa   : > { %v2299_v26 = vpop.xlane.xlu0 %2298 }
 0xafb   : > { %3778 = vpow2.f32 %v2323_v50  ;;  %v2313_v17 = vsub.f32 %v2271_v46, %v2299_v26 }
 0xafc   : > { %3780 = vpow2.f32 %v2319_v55  ;;  %v2308_v21 = vpop.xlane.xlu1 %2307 }
 0xafd   : > { %v2325_v42 = vmul.f32 1.442695, %v2313_v17  ;;  %v2316_v18 = vsub.f32 %v2282_v51, %v2308_v21 }
 0xafe   : > { %v2305_v33 = vpop.xlane.xlu0 %2304 }
 0xaff   : > { %v2315_v57 = vsub.f32 %v2279_v38, %v2305_v33  ;;  %v2331_v46 = vmul.f32 1.442695, %v2316_v18 }
 0xb01   : > { %v4687_v47 = vpop.eup %3774  ;;  %v2329_v22 = vmul.f32 1.442695, %v2315_v57 }
 0xb02   : > { %v2339_v34 = vsel %vm1312_vm2, %v4687_v47, 0.0  ;;  %v4691_v56 = vpop.eup %3776 }
 0xb03   : > { %3782 = vpow2.f32 %v2329_v22  ;;  %2340 = vadd.xlane.f32.xlu0 %v2339_v34  ;;  %v2333_v12 = vsel %vm1312_vm2, %v4691_v56, 0.0 }
 0xb04   : > { %3784 = vpow2.f32 %v2325_v42 }
 0xb05   : > { %v4693_v28 = vpop.eup %3778  ;;  %3786 = vpow2.f32 %v2331_v46 }
 0xb06   : > { %v2342_v29 = vsel %vm1312_vm2, %v4693_v28, 0.0  ;;  %v3781_v45 = vpop.eup %3780 }
 0xb07   : > { %2334 = vadd.xlane.f32.xlu0 %v2333_v12  ;;  %2343 = vadd.xlane.f32.xlu1 %v2342_v29  ;;  %v2336_v11 = vsel %vm1312_vm2, %v3781_v45, 0.0 }
 0xb0b   : > { %2337 = vadd.xlane.f32.xlu1 %v2336_v11 }
 0xb0d   : > { %v4700_v9 = vpop.eup %3782 }
 0xb0e   : > { %v2351_v27 = vsel %vm1312_vm2, %v4700_v9, 0.0  ;;  %v4704_v32 = vpop.eup %3784 }
 0xb0f   : > { %2352 = vadd.xlane.f32.xlu0 %v2351_v27  ;;  %v2345_v52 = vsel %vm1312_vm2, %v4704_v32, 0.0 }
 0xb13   : > { %2346 = vadd.xlane.f32.xlu0 %v2345_v52 }
 0xb1c   : > { %2379 = vrot.lane.b32.xlu1 %v4350_v10, %s5068_s28  ;;  %v2327_v10 = vmul.f32 1.442695, %v2314_v53 }
 0xb1e   : > { %3788 = vpow2.f32 %v2327_v10 }
 0xb20   : > { %2381 = vrot.lane.b32.xlu1 %v4384_v1, %s5068_s28 }
 0xb29   : > { %2377 = vrot.lane.b32.xlu0 %v4352_v13, %s5068_s28  ;;  %v4725_v13 = vpop.eup %3786 }
 0xb2a   : > { %v2354_v1 = vsel %vm1312_vm2, %v4725_v13, 0.0 }
 0xb2d   : > { %1804 = vrot.lane.b32.xlu0 %v4534_v59, %s5047_s23 }
 0xb31   : > { %1808 = vrot.lane.b32.xlu0 %v4532_v24, %s5047_s23  ;;  %v4731_v24 = vpop.eup %3788 }
 0xb32   : > { %v2348_v59 = vsel %vm1312_vm2, %v4731_v24, 0.0 }
 0xb35   : > { %2139 = vrot.lane.b32.xlu0 %v4638_v58, %s3914_s24 }
 0xb39   : > { %2143 = vrot.lane.b32.xlu0 %v4636_v31, %s3914_s24 }
 0xb3d   : > { %1812 = vrot.lane.b32.xlu0 %v4542_v36, %s5047_s23 }
 0xb41   : > { %1816 = vrot.lane.b32.xlu0 %v4540_v54, %s5047_s23 }
 0xb44   : > { %2355 = vadd.xlane.f32.xlu1 %v2354_v1 }
 0xb45   : > { %2147 = vrot.lane.b32.xlu0 %v4646_v39, %s3914_s24 }
 0xb48   : > { %2349 = vadd.xlane.f32.xlu1 %v2348_v59 }
 0xb59   : > { %2383 = vrot.lane.b32.xlu1 %v4392_v4, %s5068_s28  ;;  %s3252_s28 = sshll.u32 %s5069_s25, 7 }
 0xb5a   : > { %s4969_s22 = scalar_lea.hbm %s5037_s19, %s3252_s28 }
 0xb5d   : > { %1806 = vrot.lane.b32.xlu1 %v4538_v61, %s5047_s23 }
 0xb61   : > { %1810 = vrot.lane.b32.xlu1 %v4536_v60, %s5047_s23 }
 0xb65   : > { %2141 = vrot.lane.b32.xlu1 %v4642_v30, %s3914_s24 }
 0xb69   : > { %2145 = vrot.lane.b32.xlu1 %v4640_v20, %s3914_s24 }
 0xb6d   : > { %1814 = vrot.lane.b32.xlu1 %v4546_v3, %s5047_s23 }
 0xb71   : > { %1818 = vrot.lane.b32.xlu1 %v4544_v2, %s5047_s23  ;;  %s3916_s23 = smov [#allocation5]  }
 0xb72   : > { %s3850_s4 = sshll.u32 %s3916_s23, 4  ;;  %s3851_s4 = int_to_ptr.vmem [resolvable:$false] %s3850_s4 }
 0xb73   : > { %s3852_s5 = scalar_lea.vmem %s3851_s4, 2048 }
 0xb75   : > { %2149 = vrot.lane.b32.xlu1 %v4650_v35, %s3914_s24 }
 0xb90   : > { %v2341_v4 = vpop.xlane.xlu0 %2340 }
 0xb94   : > { %v2344_v61 = vpop.xlane.xlu1 %2343  ;;  %v2335_v54 = vpop.xlane.xlu0 %2334 }
 0xb95   : > { %3790 = vrcp.f32 %v2335_v54 }
 0xb98   : > { %v2338_v60 = vpop.xlane.xlu1 %2337 }
 0xb99   : > { %3792 = vrcp.f32 %v2338_v60 }
 0xb9a   : > { %3794 = vrcp.f32 %v2344_v61 }
 0xb9b   : > { %3796 = vrcp.f32 %v2341_v4 }
 0xb9c   : > { %v2353_v36 = vpop.xlane.xlu0 %2352  ;;  %v2380_v20 = vpop.permute.xlu1 %2379 }
 0xb9f   : > { %v3791_v58 = vpop.eup %3790 }
 0xba0   : > { %v2347_v31 = vpop.xlane.xlu0 %2346  ;;  %v2365_v3 = vmul.f32 %v3791_v58, %v4691_v56  ;;  %v2382_v49 = vpop.permute.xlu1 %2381 }
 0xba3   : > { %v3793_v30 = vpop.eup %3792 }
 0xba4   : > { %v2378_v39 = vpop.permute.xlu0 %2377  ;;  %v2366_v63 = vmul.f32 %v3793_v30, %v3781_v45  ;;  %v3795_v5 = vpop.eup %3794  ;;  %v3650_v45 = vld [vmem:[%s5029_s11] sm:$0xff]  }
 0xba5   : > { %3509 = vmatprep.subr.bf16.mxu0 %v2378_v39  ;;  %3573 = vmatprep.subr.bf16.mxu1 %v2378_v39  ;;  %v3797_v0 = vpop.eup %3796  ;;  %v2368_v7 = vmul.f32 %v3795_v5, %v4693_v28 }
 0xba6   : > { %3510 = vmatpush3.bf16.msra.mxu0 %v2378_v39  ;;  %3577 = vmatpush3.bf16.msra.mxu1 %v2378_v39  ;;  %v2373_v2 = vpack.c.bf16 %v2366_v63, %v2365_v3  ;;  %v2367_v44 = vmul.f32 %v3797_v0, %v4687_v47  ;;  %v3839_v0 = vld [vmem:[%s4094_s3 + $0x10] sm:$0xff] }
 0xba7   : > { %3511 = vmatprep.subr.bf16.mxu0 %v2380_v20  ;;  %3574 = vmatprep.subr.bf16.mxu1 %v2380_v20 }
 0xba8   : > { %3517 = vmatprep.mubr.msk.bf16.mxu0 %vm1312_vm2, %v2373_v2  ;;  %v1805_v35 = vpop.permute.xlu0 %1804  ;;  %v2374_v16 = vpack.c.bf16 %v2368_v7, %v2367_v44  ;;  %v3840_v44 = vld [vmem:[%s4094_s3 + $0x8] sm:$0xff] }
 0xba9   : > { %1829 = vst.msk [vmem:[#allocation2] sm:$0xff] %vm1828_vm3, %v1805_v35 }
 0xbaa   : > { %3512 = vmatpush3.bf16.msra.mxu0 %v2380_v20  ;;  %3578 = vmatpush3.bf16.msra.mxu1 %v2380_v20 }
 0xbab   : > { %3513 = vmatprep.subr.bf16.mxu0 %v2382_v49  ;;  %3575 = vmatprep.subr.bf16.mxu1 %v2382_v49 }
 0xbac   : > { %v1809_v40 = vpop.permute.xlu0 %1808 }
 0xbad   : > { %1831 = vst.msk [vmem:[#allocation2 + $0x10] sm:$0xff] %vm1828_vm3, %v1809_v40 }
 0xbae   : > { %3514 = vmatpush3.bf16.msra.mxu0 %v2382_v49  ;;  %3579 = vmatpush3.bf16.msra.mxu1 %v2382_v49  ;;  %v3226_v49 = vld [vmem:[%s5030_s12] ss:$0 sm:$0xff] }
 0xbb0   : > { %v2140_v51 = vpop.permute.xlu0 %2139 }
 0xbb1   : > { %2164 = vst.msk [vmem:[#allocation2] sm:$0xff] %vm2163_vm4, %v2140_v51 }
 0xbb4   : > { %v2144_v62 = vpop.permute.xlu0 %2143 }
 0xbb5   : > { %2166 = vst.msk [vmem:[#allocation2 + $0x10] sm:$0xff] %vm2163_vm4, %v2144_v62 }
 0xbb8   : > { %v1813_v38 = vpop.permute.xlu0 %1812 }
 0xbb9   : > { %1833 = vst.msk [vmem:[#allocation2 + $0x20] sm:$0xff] %vm1828_vm3, %v1813_v38 }
 0xbbc   : > { %v1817_v41 = vpop.permute.xlu0 %1816 }
 0xbbd   : > { %1835 = vst.msk [vmem:[#allocation2 + $0x30] sm:$0xff] %vm1828_vm3, %v1817_v41 }
 0xbc0   : > { %v2148_v43 = vpop.permute.xlu0 %2147 }
 0xbc1   : > { %2168 = vst.msk [vmem:[#allocation2 + $0x20] sm:$0xff] %vm2163_vm4, %v2148_v43 }
 0xbd1   : > { %v2356_v37 = vpop.xlane.xlu1 %2355 }
 0xbd2   : > { %3798 = vrcp.f32 %v2356_v37  ;;  %v3838_v37 = vld [vmem:[%s4094_s3] sm:$0xff] }
 0xbd3   : > { %3800 = vrcp.f32 %v2347_v31 }
 0xbd4   : > { %3802 = vrcp.f32 %v2353_v36 }
 0xbd5   : > { %v2350_v6 = vpop.xlane.xlu1 %2349 }
 0xbd6   : > { %3804 = vrcp.f32 %v2350_v6 }
 0xbd9   : > { %v2384_v14 = vpop.permute.xlu1 %2383 }
 0xbda   : > { %3515 = vmatprep.subr.bf16.mxu0 %v2384_v14  ;;  %3576 = vmatprep.subr.bf16.mxu1 %v2384_v14 }
 0xbdb   : > { %3516 = vmatpush3.bf16.msra.mxu0 %v2384_v14  ;;  %3580 = vmatpush3.bf16.msra.mxu1 %v2384_v14 }
 0xbdc   : > { %v3799_v15 = vpop.eup %3798  ;;  %3525 = vmatprep.subr.bf16.mxu1 %v3650_v45 }
 0xbdd   : > { %v1807_v48 = vpop.permute.xlu1 %1806  ;;  %v3801_v19 = vpop.eup %3800  ;;  %v2372_v26 = vmul.f32 %v3799_v15, %v4725_v13 }
 0xbde   : > { %1830 = vst.msk [vmem:[#allocation2 + $0x8] sm:$0xff] %vm1828_vm3, %v1807_v48  ;;  %3518 = vmatmul.mubr.msk.bf16.vlgmr.msra.gmra.mrb[48].mxu0 %vm1312_vm2, %v2374_v16  ;;  %v3803_v55 = vpop.eup %3802  ;;  %v2369_v33 = vmul.f32 %v3801_v19, %v4704_v32  ;;  %v3841_v19 = vld [vmem:[%s4094_s3 + $0x18] sm:$0xff] }
 0xbdf   : > { %v2371_v47 = vmul.f32 %v3803_v55, %v4700_v9  ;;  %v3651_v9 = vld [vmem:[%s5029_s11 + $0x8] sm:$0xff]  }
 0xbe0   : > { %v3805_v50 = vpop.eup %3804 }
 0xbe1   : > { %v1811_v17 = vpop.permute.xlu1 %1810  ;;  %v2370_v57 = vmul.f32 %v3805_v50, %v4731_v24  ;;  %v2376_v22 = vpack.c.bf16 %v2372_v26, %v2371_v47 }
 0xbe2   : > { %1832 = vst.msk [vmem:[#allocation2 + $0x18] sm:$0xff] %vm1828_vm3, %v1811_v17 }
 0xbe3   : > { %v2375_v42 = vpack.c.bf16 %v2370_v57, %v2369_v33 }
 0xbe5   : > { %v2142_v34 = vpop.permute.xlu1 %2141  ;;  %3521 = vmatprep.mubr.msk.bf16.mxu1 %vm1312_vm2, %v2375_v42 }
 0xbe6   : > { %2165 = vst.msk [vmem:[#allocation2 + $0x8] sm:$0xff] %vm2163_vm4, %v2142_v34  ;;  %3522 = vmatmul.mubr.msk.bf16.vlgmr.msra.gmra.mrb[32].mxu1 %vm1312_vm2, %v2376_v22  ;;  %v3842_v34 = vld [vmem:[%s4094_s3 + $0x20] sm:$0xff] }
 0xbe7   : > { %3526 = vmatpush3.bf16.msra.mxu1 %v3650_v45 }
 0xbe8   : > { %3527 = vmatprep.subr.bf16.mxu1 %v3651_v9 }
 0xbe9   : > { %v2146_v56 = vpop.permute.xlu1 %2145 }
 0xbea   : > { %2167 = vst.msk [vmem:[#allocation2 + $0x18] sm:$0xff] %vm2163_vm4, %v2146_v56 }
 0xbeb   : > { %3528 = vmatpush3.bf16.msra.mxu1 %v3651_v9  ;;  %v3844_v9 = vld [vmem:[%s4094_s3 + $0x30] sm:$0xff] }
 0xbed   : > { %v1815_v28 = vpop.permute.xlu1 %1814 }
 0xbee   : > { %1834 = vst.msk [vmem:[#allocation2 + $0x28] sm:$0xff] %vm1828_vm3, %v1815_v28 }
 0xbf1   : > { %v1819_v12 = vpop.permute.xlu1 %1818 }
 0xbf2   : > { %1836 = vst.msk [vmem:[#allocation2 + $0x38] sm:$0xff] %vm1828_vm3, %v1819_v12 }
 0xbf5   : > { %v2150_v29 = vpop.permute.xlu1 %2149 }
 0xbf6   : > { %2169 = vst.msk [vmem:[#allocation2 + $0x28] sm:$0xff] %vm2163_vm4, %v2150_v29  ;;  %v3843_v29 = vld [vmem:[%s4094_s3 + $0x28] sm:$0xff] }
 0xcb1   : > { %v3519_v11 = vpop.f32.mrb[48].mxu0 }
 0xcb2   : > { %2478 = vrot.lane.b32.xlu0 %v3519_v11, %s3915_s29  ;;  %v2435_v27 = vpop.f32.mrb[49].mxu0 }
 0xcb3   : > { %v3520_v32 = vpop.f32.mrb[50].mxu0 }
 0xcb4   : > { %2480 = vrot.lane.b32.xlu1 %v3520_v32, %s3915_s29  ;;  %v2438_v52 = vpop.f32.mrb[51].mxu0  ;;  %v3845_v32 = vld [vmem:[%s4094_s3 + $0x38] sm:$0xff] }
 0xcb6   : > { %2474 = vrot.lane.b32.xlu0 %v2435_v27, %s3915_s29 }
 0xcb8   : > { %2476 = vrot.lane.b32.xlu1 %v2438_v52, %s3915_s29 }
 0xcb9   : > { %v3523_v8 = vpop.f32.mrb[32].mxu1 }
 0xcba   : > { %v2451_v21 = vpop.f32.mrb[33].mxu1  ;;  %2151 = vrot.lane.b32.xlu0 %v4644_v23, %s3914_s24 }
 0xcbb   : > { %v3524_v18 = vpop.f32.mrb[34].mxu1 }
 0xcbc   : > { %v2454_v53 = vpop.f32.mrb[35].mxu1  ;;  %2153 = vrot.lane.b32.xlu1 %v4648_v25, %s3914_s24 }
 0xcbe   : > { %2482 = vrot.lane.b32.xlu0 %v2451_v21, %s3915_s29 }
 0xcc0   : > { %2484 = vrot.lane.b32.xlu1 %v2454_v53, %s3915_s29 }
 0xcc2   : > { %2486 = vrot.lane.b32.xlu0 %v3523_v8, %s3915_s29 }
 0xcc4   : > { %2488 = vrot.lane.b32.xlu1 %v3524_v18, %s3915_s29  ;;  %s3074_s29 = sshll.u32 %s744_s1, 4  ;;  %s4960_s29 = int_to_ptr.vmem [resolvable:$true] %s3074_s29 }
 0xcc5   : > { %s3846_s25 = scalar_lea.vmem %s4960_s29, 1024  ;;  %p3853_p2 = scmp.lt.s32.totalorder %s4960_s29, %s3851_s4 }
 0xcc6   : > { %p3847_p13 = scmp.ne.s32.totalorder %s4960_s29, %s3846_s25  ;;  %p3854_p3 = scmp.lt.s32.totalorder %s3852_s5, %s3846_s25 }
 0xcc8   : > { %p3848_p0 = pnand %p3847_p13, %p4061_p6  ;;  %p3855_p4 = por %p3854_p3, %p3853_p2 }
 0xcca   : > { %p3849_p1 = pneg %p3848_p0 }
 0xccc   : > { %p3856_p5 = pnand %p3855_p4, %p3849_p1 }
 0xd24   : > { %v2479_v46 = vpop.permute.xlu0 %2478 }
 0xd25   : > { %2501 = vst.msk [vmem:[#allocation2 + $0x10] sm:$0xff] %vm2498_vm5, %v2479_v46 }
 0xd26   : > { %v2481_v10 = vpop.permute.xlu1 %2480 }
 0xd27   : > { %2502 = vst.msk [vmem:[#allocation2 + $0x18] sm:$0xff] %vm2498_vm5, %v2481_v10 }
 0xd28   : > { %v2475_v13 = vpop.permute.xlu0 %2474 }
 0xd29   : > { %2499 = vst.msk [vmem:[#allocation2] sm:$0xff] %vm2498_vm5, %v2475_v13 }
 0xd2a   : > { %v2477_v23 = vpop.permute.xlu1 %2476 }
 0xd2b   : > { %2500 = vst.msk [vmem:[#allocation2 + $0x8] sm:$0xff] %vm2498_vm5, %v2477_v23 }
 0xd2c   : > { %v2152_v1 = vpop.permute.xlu0 %2151  ;;  %v2509_v36 = vld [vmem:[#allocation2 + $0x10] sm:$0xff] }
 0xd2d   : > { %2170 = vst.msk [vmem:[#allocation2 + $0x30] sm:$0xff] %vm2163_vm4, %v2152_v1 }
 0xd2e   : > { %v2154_v25 = vpop.permute.xlu1 %2153  ;;  %v2510_v59 = vld [vmem:[#allocation2 + $0x18] sm:$0xff] }
 0xd2f   : > { %2171 = vst.msk [vmem:[#allocation2 + $0x38] sm:$0xff] %vm2163_vm4, %v2154_v25  ;;  %v2516_v58 = vpack.c.bf16 %v2510_v59, %v2509_v36 }
 0xd30   : > { %v2483_v24 = vpop.permute.xlu0 %2482  ;;  %v2507_v61 = vld [vmem:[#allocation2] sm:$0xff] }
 0xd31   : > { %2503 = vst.msk [vmem:[#allocation2 + $0x20] sm:$0xff] %vm2498_vm5, %v2483_v24 }
 0xd32   : > { %v2485_v4 = vpop.permute.xlu1 %2484  ;;  %v2508_v54 = vld [vmem:[#allocation2 + $0x8] sm:$0xff] }
 0xd33   : > { %2504 = vst.msk [vmem:[#allocation2 + $0x28] sm:$0xff] %vm2498_vm5, %v2485_v4  ;;  %v2515_v60 = vpack.c.bf16 %v2508_v54, %v2507_v61 }
 0xd34   : > { %v2487_v31 = vpop.permute.xlu0 %2486 }
 0xd35   : > { %2505 = vst.msk [vmem:[#allocation2 + $0x30] sm:$0xff] %vm2498_vm5, %v2487_v31  ;;  %3529 = vmatprep.mubr.msk.bf16.mxu1 %vm764_vm0, %v2515_v60 }
 0xd36   : > { %v2489_v30 = vpop.permute.xlu1 %2488  ;;  %3530 = vmatmul.mubr.msk.bf16.vlgmr.msra.gmra.mrb[36].mxu1 %vm764_vm0, %v2516_v58 }
 0xd37   : > { %2506 = vst.msk [vmem:[#allocation2 + $0x38] sm:$0xff] %vm2498_vm5, %v2489_v30 }
 0xd38   : > { %v2511_v20 = vld [vmem:[#allocation2 + $0x20] sm:$0xff] }
 0xd3a   : > { %v2512_v39 = vld [vmem:[#allocation2 + $0x28] sm:$0xff] }
 0xd3b   : > { %v2517_v3 = vpack.c.bf16 %v2512_v39, %v2511_v20 }
 0xd3c   : > { %v2513_v63 = vld [vmem:[#allocation2 + $0x30] sm:$0xff] }
 0xd3d   : > { %3533 = vmatprep.mubr.msk.bf16.mxu1 %vm764_vm0, %v2517_v3 }
 0xd3e   : > { %v2514_v2 = vld [vmem:[#allocation2 + $0x38] sm:$0xff] }
 0xd3f   : > { %v2518_v35 = vpack.c.bf16 %v2514_v2, %v2513_v63 }
 0xd41   : > { %3534 = vmatmul.mubr.msk.bf16.gmra.mrb[40].mxu1 %vm764_vm0, %v2518_v35 }
 0xe09   : > { %v3531_v40 = vpop.f32.mrb[36].mxu1 }
 0xe0a   : > { %v2588_v51 = vpop.f32.mrb[37].mxu1  ;;  %v2597_v62 = vadd.f32 %v3531_v40, %v3226_v49 }
 0xe0b   : > { %v2589_v38 = vadd.f32 %v3226_v49, %v2588_v51  ;;  %v3532_v41 = vpop.f32.mrb[38].mxu1 }
 0xe0c   : > { %v2591_v43 = vpop.f32.mrb[39].mxu1  ;;  %v4809_v7 = vadd.f32 %v3839_v0, %v2597_v62  ;;  %v2600_v14 = vadd.f32 %v3532_v41, %v3226_v49 }
 0xe0d   : > { %v4806_v5 = vadd.f32 %v3838_v37, %v2589_v38  ;;  %v2592_v6 = vadd.f32 %v3226_v49, %v2591_v43 }
 0xe0e   : > { %v4819_v55 = vadd.f32 %v3841_v19, %v2600_v14  ;;  %v2635_v50 = vsel %vm764_vm0, %v4809_v7, 0.0 }
 0xe0f   : > { %v4812_v16 = vadd.f32 %v3840_v44, %v2592_v6  ;;  %v2629_v15 = vsel %vm764_vm0, %v4806_v5, 0.0 }
 0xe10   : > { %2630 = vadd.xlane.f32.xlu0 %v2629_v15  ;;  %v2638_v22 = vsel %vm764_vm0, %v4819_v55, 0.0 }
 0xe11   : > { %v2632_v48 = vsel %vm764_vm0, %v4812_v16, 0.0 }
 0xe12   : > { %2633 = vadd.xlane.f32.xlu1 %v2632_v48 }
 0xe14   : > { %2636 = vadd.xlane.f32.xlu0 %v2635_v50  ;;  %v3535_v26 = vpop.f32.mrb[40].mxu1 }
 0xe15   : > { %v2604_v17 = vpop.f32.mrb[41].mxu1  ;;  %v2613_v47 = vadd.f32 %v3535_v26, %v3226_v49 }
 0xe16   : > { %v2605_v33 = vadd.f32 %v3226_v49, %v2604_v17  ;;  %v3536_v57 = vpop.f32.mrb[42].mxu1  ;;  %v3652_v17 = vld [vmem:[%s5033_s15] sm:$0xff]  }
 0xe17   : > { %v2607_v42 = vpop.f32.mrb[43].mxu1  ;;  %v2616_v28 = vadd.f32 %v3536_v57, %v3226_v49  ;;  %v4834_v27 = vadd.f32 %v3844_v9, %v2613_v47  ;;  %3537 = vmatprep.subr.bf16.mxu0 %v3652_v17  ;;  %v3654_v57 = vld [vmem:[%s5035_s17] sm:$0xff]   ;;  %v3655_v47 = vld [vmem:[%s5035_s17 + $0x8] sm:$0xff]  }
 0xe18   : > { %v4826_v56 = vadd.f32 %v3842_v34, %v2605_v33  ;;  %v2608_v12 = vadd.f32 %v3226_v49, %v2607_v42  ;;  %2639 = vadd.xlane.f32.xlu0 %v2638_v22  ;;  %3538 = vmatpush3.bf16.msra.mxu0 %v3652_v17  ;;  %v3653_v33 = vld [vmem:[%s5033_s15 + $0x8] sm:$0xff]  }
 0xe19   : > { %v4837_v52 = vadd.f32 %v3845_v32, %v2616_v28  ;;  %v2647_v21 = vsel %vm764_vm0, %v4834_v27, 0.0  ;;  %3539 = vmatprep.subr.bf16.mxu0 %v3653_v33  ;;  %3549 = vmatprep.subr.bf16.mxu1 %v3654_v57 }
 0xe1a   : > { %v4829_v45 = vadd.f32 %v3843_v29, %v2608_v12  ;;  %v2641_v11 = vsel %vm764_vm0, %v4826_v56, 0.0  ;;  %3550 = vmatpush3.bf16.msra.mxu1 %v3654_v57 }
 0xe1b   : > { %v2650_v18 = vsel %vm764_vm0, %v4837_v52, 0.0  ;;  %3551 = vmatprep.subr.bf16.mxu1 %v3655_v47 }
 0xe1c   : > { %2642 = vadd.xlane.f32.xlu0 %v2641_v11  ;;  %v2644_v8 = vsel %vm764_vm0, %v4829_v45, 0.0  ;;  %3540 = vmatpush3.bf16.msra.mxu0 %v3653_v33 }
 0xe1d   : > { %2645 = vadd.xlane.f32.xlu1 %v2644_v8 }
 0xe1e   : > { %3552 = vmatpush3.bf16.msra.mxu1 %v3655_v47 }
 0xe20   : > { %2648 = vadd.xlane.f32.xlu0 %v2647_v21 }
 0xe21   : > { %2651 = vadd.xlane.f32.xlu1 %v2650_v18 }
 0xe9d   : > { %v2631_v53 = vpop.xlane.xlu0 %2630 }
 0xe9e   : > { %v2653_v46 = vmul.f32 0.03125, %v2631_v53 }
 0xe9f   : > { %v2634_v10 = vpop.xlane.xlu1 %2633 }
 0xea0   : > { %v4846_v13 = vsub.f32 %v4806_v5, %v2653_v46  ;;  %v2654_v23 = vmul.f32 0.03125, %v2634_v10 }
 0xea1   : > { %v2637_v1 = vpop.xlane.xlu0 %2636 }
 0xea2   : > { %v4849_v25 = vsub.f32 %v4812_v16, %v2654_v23  ;;  %v2655_v24 = vmul.f32 0.03125, %v2637_v1  ;;  %v2669_v59 = vmul.f32 %v4846_v13, %v4846_v13 }
 0xea4   : > { %v4854_v4 = vsub.f32 %v4809_v7, %v2655_v24  ;;  %v2677_v61 = vsel %vm764_vm0, %v2669_v59, 0.0  ;;  %v2670_v54 = vmul.f32 %v4849_v25, %v4849_v25  ;;  %v3233_v24 = vld [vmem:[%s5031_s13] ss:$0 sm:$0xff] }
 0xea5   : > { %2678 = vadd.xlane.f32.xlu0 %v2677_v61  ;;  %v2640_v60 = vpop.xlane.xlu0 %2639 }
 0xea6   : > { %v2656_v36 = vmul.f32 0.03125, %v2640_v60  ;;  %v2680_v31 = vsel %vm764_vm0, %v2670_v54, 0.0  ;;  %v2671_v58 = vmul.f32 %v4854_v4, %v4854_v4 }
 0xea7   : > { %2681 = vadd.xlane.f32.xlu1 %v2680_v31 }
 0xea8   : > { %v4863_v30 = vsub.f32 %v4819_v55, %v2656_v36  ;;  %v2683_v20 = vsel %vm764_vm0, %v2671_v58, 0.0 }
 0xea9   : > { %2684 = vadd.xlane.f32.xlu0 %v2683_v20  ;;  %v2643_v39 = vpop.xlane.xlu0 %2642 }
 0xeaa   : > { %v2657_v3 = vmul.f32 0.03125, %v2643_v39  ;;  %v2646_v63 = vpop.xlane.xlu1 %2645  ;;  %v2672_v2 = vmul.f32 %v4863_v30, %v4863_v30 }
 0xeab   : > { %v2658_v35 = vmul.f32 0.03125, %v2646_v63 }
 0xeac   : > { %v4869_v49 = vsub.f32 %v4826_v56, %v2657_v3  ;;  %v2686_v40 = vsel %vm764_vm0, %v2672_v2, 0.0 }
 0xead   : > { %v4873_v51 = vsub.f32 %v4829_v45, %v2658_v35  ;;  %2687 = vadd.xlane.f32.xlu1 %v2686_v40  ;;  %v2649_v62 = vpop.xlane.xlu0 %2648  ;;  %v3234_v35 = vld [vmem:[%s5032_s14] ss:$0 sm:$0xff] }
 0xeae   : > { %v2659_v38 = vmul.f32 0.03125, %v2649_v62  ;;  %v2652_v41 = vpop.xlane.xlu1 %2651  ;;  %v2673_v43 = vmul.f32 %v4869_v49, %v4869_v49 }
 0xeaf   : > { %v2660_v37 = vmul.f32 0.03125, %v2652_v41  ;;  %v2674_v6 = vmul.f32 %v4873_v51, %v4873_v51 }
 0xeb0   : > { %v4880_v0 = vsub.f32 %v4834_v27, %v2659_v38  ;;  %v2689_v14 = vsel %vm764_vm0, %v2673_v43, 0.0 }
 0xeb1   : > { %v4884_v44 = vsub.f32 %v4837_v52, %v2660_v37  ;;  %2690 = vadd.xlane.f32.xlu0 %v2689_v14  ;;  %v2692_v15 = vsel %vm764_vm0, %v2674_v6, 0.0 }
 0xeb2   : > { %2693 = vadd.xlane.f32.xlu1 %v2692_v15  ;;  %v2675_v48 = vmul.f32 %v4880_v0, %v4880_v0 }
 0xeb3   : > { %v2676_v19 = vmul.f32 %v4884_v44, %v4884_v44 }
 0xeb4   : > { %v2695_v50 = vsel %vm764_vm0, %v2675_v48, 0.0 }
 0xeb5   : > { %2696 = vadd.xlane.f32.xlu0 %v2695_v50  ;;  %v2698_v26 = vsel %vm764_vm0, %v2676_v19, 0.0 }
 0xeb6   : > { %2699 = vadd.xlane.f32.xlu1 %v2698_v26 }
 0xf32   : > { %v2679_v42 = vpop.xlane.xlu0 %2678 }
 0xf33   : > { %v2701_v22 = vmul.f32 0.03125, %v2679_v42 }
 0xf34   : > { %v2682_v34 = vpop.xlane.xlu1 %2681 }
 0xf35   : > { %v2709_v28 = vadd.f32 1e-05, %v2701_v22  ;;  %v2702_v12 = vmul.f32 0.03125, %v2682_v34 }
 0xf36   : > { %v2685_v29 = vpop.xlane.xlu0 %2684 }
 0xf37   : > { %3806 = vrsqrt.f32 %v2709_v28  ;;  %v2710_v11 = vadd.f32 1e-05, %v2702_v12  ;;  %v2703_v9 = vmul.f32 0.03125, %v2685_v29 }
 0xf39   : > { %3808 = vrsqrt.f32 %v2710_v11  ;;  %v2711_v32 = vadd.f32 1e-05, %v2703_v9 }
 0xf3a   : > { %v2688_v8 = vpop.xlane.xlu1 %2687 }
 0xf3b   : > { %3810 = vrsqrt.f32 %v2711_v32  ;;  %v2704_v21 = vmul.f32 0.03125, %v2688_v8  ;;  %v3658_v32 = vld [vmem:[%s5035_s17 + $0x20] sm:$0xff]   ;;  %v3659_v8 = vld [vmem:[%s5035_s17 + $0x28] sm:$0xff]  }
 0xf3d   : > { %v2712_v18 = vadd.f32 1e-05, %v2704_v21  ;;  %v3660_v21 = vld [vmem:[%s5035_s17 + $0x30] sm:$0xff]  }
 0xf3e   : > { %v2691_v53 = vpop.xlane.xlu0 %2690 }
 0xf3f   : > { %3812 = vrsqrt.f32 %v2712_v18  ;;  %v2705_v46 = vmul.f32 0.03125, %v2691_v53  ;;  %v2694_v10 = vpop.xlane.xlu1 %2693  ;;  %v3661_v18 = vld [vmem:[%s5035_s17 + $0x38] sm:$0xff]   ;;  %v3235_v53 = vld [vmem:[%s5034_s16] ss:$0 sm:$0xff] }
 0xf40   : > { %v2706_v23 = vmul.f32 0.03125, %v2694_v10 }
 0xf41   : > { %v3807_v1 = vpop.eup %3806  ;;  %v2713_v59 = vadd.f32 1e-05, %v2705_v46 }
 0xf42   : > { %v2725_v61 = vmul.f32 %v3807_v1, %v4846_v13  ;;  %v2714_v54 = vadd.f32 1e-05, %v2706_v23  ;;  %v2697_v60 = vpop.xlane.xlu0 %2696 }
 0xf43   : > { %v3809_v36 = vpop.eup %3808  ;;  %3814 = vrsqrt.f32 %v2713_v59  ;;  %v2707_v31 = vmul.f32 0.03125, %v2697_v60  ;;  %v2700_v58 = vpop.xlane.xlu1 %2699 }
 0xf44   : > { %v2726_v20 = vmul.f32 %v3809_v36, %v4849_v25  ;;  %3816 = vrsqrt.f32 %v2714_v54  ;;  %v2708_v39 = vmul.f32 0.03125, %v2700_v58  ;;  %v2739_v3 = vmul.f32 %v3233_v24, %v2725_v61 }
 0xf45   : > { %v3811_v63 = vpop.eup %3810  ;;  %v2715_v2 = vadd.f32 1e-05, %v2707_v31 }
 0xf46   : > { %v2727_v40 = vmul.f32 %v3811_v63, %v4854_v4  ;;  %v2716_v13 = vadd.f32 1e-05, %v2708_v39  ;;  %v2740_v62 = vmul.f32 %v3233_v24, %v2726_v20  ;;  %v2753_v38 = vadd.f32 %v3234_v35, %v2739_v3 }
 0xf47   : > { %3818 = vrsqrt.f32 %v2715_v2 }
 0xf48   : > { %3820 = vrsqrt.f32 %v2716_v13  ;;  %v2754_v41 = vadd.f32 %v3234_v35, %v2740_v62  ;;  %v2741_v37 = vmul.f32 %v3233_v24, %v2727_v40 }
 0xf49   : > { %v3813_v43 = vpop.eup %3812 }
 0xf4a   : > { %v2728_v25 = vmul.f32 %v3813_v43, %v4863_v30  ;;  %v2761_v6 = vpack.c.bf16 %v2754_v41, %v2753_v38  ;;  %v2755_v50 = vadd.f32 %v3234_v35, %v2741_v37 }
 0xf4c   : > { %v2742_v14 = vmul.f32 %v3233_v24, %v2728_v25  ;;  %3541 = vmatprep.mubr.msk.bf16.mxu0 %vm764_vm0, %v2761_v6 }
 0xf4d   : > { %v3815_v15 = vpop.eup %3814 }
 0xf4e   : > { %v3817_v48 = vpop.eup %3816  ;;  %v2729_v19 = vmul.f32 %v3815_v15, %v4869_v49  ;;  %v2756_v4 = vadd.f32 %v3234_v35, %v2742_v14 }
 0xf4f   : > { %v2730_v26 = vmul.f32 %v3817_v48, %v4873_v51 }
 0xf50   : > { %v2762_v17 = vpack.c.bf16 %v2756_v4, %v2755_v50  ;;  %v2743_v33 = vmul.f32 %v3233_v24, %v2729_v19 }
 0xf51   : > { %v3819_v57 = vpop.eup %3818  ;;  %v2744_v47 = vmul.f32 %v3233_v24, %v2730_v26 }
 0xf52   : > { %v3821_v42 = vpop.eup %3820  ;;  %v2731_v22 = vmul.f32 %v3819_v57, %v4880_v0  ;;  %3542 = vmatmul.mubr.msk.bf16.vlgmr.msra.gmra.mrb[52].mxu0 %vm764_vm0, %v2762_v17  ;;  %v2757_v30 = vadd.f32 %v3234_v35, %v2743_v33  ;;  %v3656_v0 = vld [vmem:[%s5035_s17 + $0x10] sm:$0xff]  }
 0xf53   : > { %v2732_v34 = vmul.f32 %v3821_v42, %v4884_v44  ;;  %v2758_v28 = vadd.f32 %v3234_v35, %v2744_v47  ;;  %3553 = vmatprep.subr.bf16.mxu1 %v3656_v0  ;;  %v3657_v44 = vld [vmem:[%s5035_s17 + $0x18] sm:$0xff]  }
 0xf54   : > { %v2745_v12 = vmul.f32 %v3233_v24, %v2731_v22  ;;  %3554 = vmatpush3.bf16.msra.mxu1 %v3656_v0 }
 0xf55   : > { %v2763_v29 = vpack.c.bf16 %v2758_v28, %v2757_v30  ;;  %v2746_v49 = vmul.f32 %v3233_v24, %v2732_v34  ;;  %3555 = vmatprep.subr.bf16.mxu1 %v3657_v44 }
 0xf56   : > { %v2759_v11 = vadd.f32 %v3234_v35, %v2745_v12 }
 0xf57   : > { %3545 = vmatprep.mubr.msk.bf16.mxu0 %vm764_vm0, %v2763_v29  ;;  %v2760_v51 = vadd.f32 %v3234_v35, %v2746_v49 }
 0xf58   : > { %3556 = vmatpush3.bf16.msra.mxu1 %v3657_v44 }
 0xf59   : > { %v2764_v9 = vpack.c.bf16 %v2760_v51, %v2759_v11  ;;  %3557 = vmatprep.subr.bf16.mxu1 %v3658_v32 }
 0xf5b   : > { %3546 = vmatmul.mubr.msk.bf16.gmra.mrb[56].mxu0 %vm764_vm0, %v2764_v9 }
 0xf5c   : > { %3558 = vmatpush3.bf16.msra.mxu1 %v3658_v32 }
 0xf5d   : > { %3559 = vmatprep.subr.bf16.mxu1 %v3659_v8 }
 0xf60   : > { %3560 = vmatpush3.bf16.msra.mxu1 %v3659_v8 }
 0xf61   : > { %3561 = vmatprep.subr.bf16.mxu1 %v3660_v21 }
 0xf64   : > { %3562 = vmatpush3.bf16.msra.mxu1 %v3660_v21 }
 0xf65   : > { %3563 = vmatprep.subr.bf16.mxu1 %v3661_v18 }
 0xf68   : > { %3564 = vmatpush3.bf16.msra.mxu1 %v3661_v18 }
0x1025   : > { %v3543_v46 = vpop.f32.mrb[52].mxu0 }
0x1026   : > { %v2843_v10 = vadd.f32 %v3543_v46, %v3235_v53  ;;  %v2834_v23 = vpop.f32.mrb[53].mxu0 }
0x1027   : > { %v2835_v1 = vadd.f32 %v3235_v53, %v2834_v23  ;;  %v3544_v24 = vpop.f32.mrb[54].mxu0 }
0x1028   : > { %v2875_v59 = vmul.f32 0.70710677, %v2843_v10  ;;  %v2846_v61 = vadd.f32 %v3544_v24, %v3235_v53  ;;  %v2837_v54 = vpop.f32.mrb[55].mxu0  ;;  %v2867_v19 = vmul.f32 0.5, %v2843_v10  ;;  %v3242_v24 = vld [vmem:[%s5036_s18] ss:$0 sm:$0xff] }
0x1029   : > { %v2873_v60 = vmul.f32 0.70710677, %v2835_v1  ;;  %v2838_v36 = vadd.f32 %v3235_v53, %v2837_v54  ;;  %v2865_v26 = vmul.f32 0.5, %v2835_v1 }
0x102a   : > { %3822 = verf.f32 %v2875_v59  ;;  %v2876_v31 = vmul.f32 0.70710677, %v2846_v61  ;;  %v2868_v50 = vmul.f32 0.5, %v2846_v61 }
0x102b   : > { %3824 = verf.f32 %v2873_v60  ;;  %v2874_v58 = vmul.f32 0.70710677, %v2838_v36  ;;  %v2866_v17 = vmul.f32 0.5, %v2838_v36 }
0x102c   : > { %3826 = verf.f32 %v2876_v31 }
0x102d   : > { %3828 = verf.f32 %v2874_v58 }
0x102e   : > { %v3547_v20 = vpop.f32.mrb[56].mxu0 }
0x102f   : > { %v2859_v39 = vadd.f32 %v3547_v20, %v3235_v53  ;;  %v2850_v3 = vpop.f32.mrb[57].mxu0 }
0x1030   : > { %v2851_v63 = vadd.f32 %v3235_v53, %v2850_v3  ;;  %v3548_v2 = vpop.f32.mrb[58].mxu0 }
0x1031   : > { %v2879_v35 = vmul.f32 0.70710677, %v2859_v39  ;;  %v2862_v40 = vadd.f32 %v3548_v2, %v3235_v53  ;;  %v2853_v13 = vpop.f32.mrb[59].mxu0  ;;  %v2871_v9 = vmul.f32 0.5, %v2859_v39 }
0x1032   : > { %v2877_v62 = vmul.f32 0.70710677, %v2851_v63  ;;  %v2854_v38 = vadd.f32 %v3235_v53, %v2853_v13  ;;  %v2869_v32 = vmul.f32 0.5, %v2851_v63 }
0x1033   : > { %3830 = verf.f32 %v2879_v35  ;;  %v2880_v41 = vmul.f32 0.70710677, %v2862_v40  ;;  %v2872_v0 = vmul.f32 0.5, %v2862_v40 }
0x1034   : > { %v3823_v43 = vpop.eup %3822  ;;  %3832 = verf.f32 %v2877_v62  ;;  %v2878_v37 = vmul.f32 0.70710677, %v2854_v38  ;;  %v2870_v8 = vmul.f32 0.5, %v2854_v38 }
0x1035   : > { %v3825_v25 = vpop.eup %3824  ;;  %v2891_v6 = vadd.f32 1.0, %v3823_v43  ;;  %3834 = verf.f32 %v2880_v41 }
0x1036   : > { %v3827_v14 = vpop.eup %3826  ;;  %v2889_v15 = vadd.f32 1.0, %v3825_v25  ;;  %3836 = verf.f32 %v2878_v37 }
0x1037   : > { %v3829_v48 = vpop.eup %3828  ;;  %v2892_v4 = vadd.f32 1.0, %v3827_v14  ;;  %v2899_v57 = vmul.f32 %v2891_v6, %v2867_v19 }
0x1038   : > { %v2890_v33 = vadd.f32 1.0, %v3829_v48  ;;  %v2897_v42 = vmul.f32 %v2889_v15, %v2865_v26 }
0x1039   : > { %v2900_v47 = vmul.f32 %v2892_v4, %v2868_v50 }
0x103a   : > { %v2898_v22 = vmul.f32 %v2890_v33, %v2866_v17 }
0x103b   : > { %v2906_v30 = vpack.c.bf16 %v2900_v47, %v2899_v57 }
0x103c   : > { %v2905_v34 = vpack.c.bf16 %v2898_v22, %v2897_v42 }
0x103d   : > { %v3831_v28 = vpop.eup %3830 }
0x103e   : > { %v3833_v12 = vpop.eup %3832  ;;  %v2895_v29 = vadd.f32 1.0, %v3831_v28  ;;  %3565 = vmatprep.mubr.bf16.mxu1 %v2905_v34 }
0x103f   : > { %v3835_v49 = vpop.eup %3834  ;;  %v2893_v11 = vadd.f32 1.0, %v3833_v12  ;;  %3566 = vmatmul.mubr.bf16.vlgmr.msra.gmra.mrb[44].mxu1 %v2906_v30 }
0x1040   : > { %v3837_v51 = vpop.eup %3836  ;;  %v2896_v44 = vadd.f32 1.0, %v3835_v49  ;;  %v2903_v18 = vmul.f32 %v2895_v29, %v2871_v9 }
0x1041   : > { %v2894_v21 = vadd.f32 1.0, %v3837_v51  ;;  %v2901_v46 = vmul.f32 %v2893_v11, %v2869_v32 }
0x1042   : > { %v2904_v53 = vmul.f32 %v2896_v44, %v2872_v0 }
0x1043   : > { %v2902_v10 = vmul.f32 %v2894_v21, %v2870_v8 }
0x1044   : > { %v2908_v23 = vpack.c.bf16 %v2904_v53, %v2903_v18 }
0x1045   : > { %v2907_v1 = vpack.c.bf16 %v2902_v10, %v2901_v46 }
0x1047   : > { %3569 = vmatprep.mubr.bf16.mxu1 %v2907_v1 }
0x1048   : > { %3570 = vmatmul.mubr.bf16.gmra.mrb[48].mxu1 %v2908_v23 }
0x1112   : > { %v3567_v59 = vpop.f32.mrb[44].mxu1 }
0x1113   : > { %v3023_v61 = vadd.f32 %v3567_v59, %v3242_v24  ;;  %v3014_v54 = vpop.f32.mrb[45].mxu1 }
0x1114   : > { %v3015_v60 = vadd.f32 %v3242_v24, %v3014_v54  ;;  %v3568_v36 = vpop.f32.mrb[46].mxu1 }
0x1115   : > { %v3047_v31 = vadd.f32 %v3023_v61, %v4809_v7  ;;  %v3026_v58 = vadd.f32 %v3568_v36, %v3242_v24  ;;  %v3017_v20 = vpop.f32.mrb[47].mxu1 }
0x1116   : > { %v3045_v39 = vadd.f32 %v3015_v60, %v4806_v5  ;;  %v3018_v3 = vadd.f32 %v3242_v24, %v3017_v20 }
0x1117   : > { %3055 = vst.msk [vmem:[%s744_s1 + $0x10] sm:$0xff] %vm764_vm0, %v3047_v31  ;;  %v3048_v63 = vadd.f32 %v3026_v58, %v4819_v55 }
0x1118   : > { %3053 = vst.msk [vmem:[%s744_s1] sm:$0xff] %vm764_vm0, %v3045_v39  ;;  %v3046_v2 = vadd.f32 %v3018_v3, %v4812_v16 }
0x1119   : > { %3056 = vst.msk [vmem:[%s744_s1 + $0x18] sm:$0xff] %vm764_vm0, %v3048_v63 }
0x111a   : > { %3054 = vst.msk [vmem:[%s744_s1 + $0x8] sm:$0xff] %vm764_vm0, %v3046_v2 }
0x111b   : > { %v3571_v7 = vpop.f32.mrb[48].mxu1 }
0x111c   : > { %v3039_v35 = vadd.f32 %v3571_v7, %v3242_v24  ;;  %v3030_v40 = vpop.f32.mrb[49].mxu1 }
0x111d   : > { %v3031_v5 = vadd.f32 %v3242_v24, %v3030_v40  ;;  %v3572_v13 = vpop.f32.mrb[50].mxu1 }
0x111e   : > { %v3051_v62 = vadd.f32 %v3039_v35, %v4834_v27  ;;  %v3042_v38 = vadd.f32 %v3572_v13, %v3242_v24  ;;  %v3033_v55 = vpop.f32.mrb[51].mxu1 }
0x111f   : > { %v3049_v16 = vadd.f32 %v3031_v5, %v4826_v56  ;;  %v3034_v41 = vadd.f32 %v3242_v24, %v3033_v55 }
0x1120   : > { %3059 = vst.msk [vmem:[%s744_s1 + $0x30] sm:$0xff] %vm764_vm0, %v3051_v62  ;;  %v3052_v43 = vadd.f32 %v3042_v38, %v4837_v52 }
0x1121   : > { %3057 = vst.msk [vmem:[%s744_s1 + $0x20] sm:$0xff] %vm764_vm0, %v3049_v16  ;;  %v3050_v27 = vadd.f32 %v3034_v41, %v4829_v45 }
0x1122   : > { %3060 = vst.msk [vmem:[%s744_s1 + $0x38] sm:$0xff] %vm764_vm0, %v3052_v43 }
0x1123   : > { %3058 = vst.msk [vmem:[%s744_s1 + $0x28] sm:$0xff] %vm764_vm0, %v3050_v27 }
0x1124   : > { %3859 = shalt.err (!%p3856_p5)
}
0x1125   : > { %s3860_s1 = scalar_lea.hbm %s4969_s22, 1024  ;;  %s3864_s23 = scalar_lea.hbm %s5037_s19, 2048 }
0x1126   : > { %p3861_p7 = scmp.ne.s32.totalorder %s4969_s22, %s3860_s1  ;;  %p3865_p12 = scmp.lt.u32.totalorder %s4969_s22, %s5037_s19 }
0x1127   : > { %p3866_p13 = scmp.lt.u32.totalorder %s3864_s23, %s3860_s1  ;;  %p3868_p1 = scmp.lt.u32.totalorder %s3860_s1, %s4969_s22 }
0x1128   : > { %p3862_p10 = pnand %p3861_p7, %p4061_p6 }
0x1129   : > { %p3867_p0 = por %p3866_p13, %p3865_p12 }
0x112a   : > { %p3863_p11 = pneg %p3862_p10 }
0x112b   : > { %p3869_p2 = por %p3868_p1, %p3867_p0 }
0x112d   : > { %p3870_p3 = pnand %p3869_p2, %p3863_p11 }
0x112f   : > { %3873 = shalt.err (!%p3870_p3)
}
0x1130   : > { %s3917_s5 = smov 128   ;;  %s3918_s0 = smov 256  }
0x1131   : > { %s5071_s25 = smov 8  }
0x1132   : > { %3597 = dma.vmem_to_hbm [thread:$0]  (%p4061_p6), %s4960_s29, 1024, %s4969_s22, %s4975_s2, %s3917_s5, %s3918_s0, %s5071_s25  }
0x1133 PF: > { %s5072_s28 = sld [smem:[#allocation8_spill]]  ;;  %p3600_p4 = pnand %p3162_p9, %p4065_p8 }
0x1139   : > { %s3089_s3 = sand.u32 1, %s5072_s28  }
0x113a   : > { %s3090_s1 = scalar_lea.sflag [#allocation6], %s3089_s3 }
0x113b   : > { %3891 = dma.done.wait (!%p3600_p4), %s3090_s1, 1024  }
0x113c   : > { %3893 = vsyncadd (!%p3600_p4), %s3090_s1, 4294966272  ;;  %s5074_s21 = sld [smem:[#allocation9_spill]]  ;;  %s5075_s23 = sld [smem:[#allocation10_spill]] }
0x113d   : > { %s5076_s0 = smov %s3900_s30  ;;  %s5077_s30 = smov %s3904_s20 }
0x1142   : > { %p29_p5 = scmp.ge.s32.totalorder %s5074_s21, 4   ;;  %s5078_s20 = smov %s5075_s23 }
0x1144   :  { %31 = sbr.rel (!%p29_p5) target bundleno = 10 (0xa), region = 220 }
0x114b   :  { %3095 = vsyncpa [#allocation6], 1 }
0x114c   :  { %3097 = vsyncpa [#allocation6 + $0x1], 1 }

</bundles_post_ra>
